<compile_context>
chip_gen: v6e
topology: v6e:2x2x1
jax: 0.10.0
libtpu: 0.0.40
codegen_flags: <defaults>
</compile_context>

<pallas_src>
import functools

import jax
import jax.numpy as jnp
from jax import lax
from jax.experimental import pallas as pl
from jax.experimental.pallas import tpu as pltpu

C1, C2, C3, C4 = 32, 64, 32, 10                    # conv output channels
_TAPS = tuple((dh, dw) for dh in range(3) for dw in range(3))


def _net_kernel(p1_ref, w1_ref, b1_ref, w2_ref, b2_ref, w3_ref, b3_ref,
                w4_ref, b4_ref, o_ref,
                xp2_ref, xp3_ref, xp4_ref, rm1_ref, rm2_ref,
                p2_ref, p3_ref, p4_ref, *, H, W):
    """Whole CNN forward for one image (one grid step). All refs in VMEM."""
    f32 = jnp.float32
    bf16 = jnp.bfloat16
    H2, W2 = H // 2, W // 2
    H3, W3 = H // 4, W // 4

    def maxpool2(y, h, w, c, rm_ref):
        # Row pairs: reshape + one vector max.  Column pairs: two
        # sublane-strided reads of the row-pooled scratch (stride-2 vld).
        y = y.reshape(h // 2, 2, w, c)
        rm_ref[...] = jnp.maximum(y[:, 0], y[:, 1])                 # (h/2, w, c)
        return jnp.maximum(rm_ref[:, pl.ds(0, w // 2, stride=2), :],
                           rm_ref[:, pl.ds(1, w // 2, stride=2), :])

    def im2col_conv(xp_ref, p_ref, w_ref, b_ref, h, w, cin):
        # Build the (h*w, 9*cin) bf16 patch matrix in VMEM, then one MXU matmul
        # with K = 9*cin (f32 accumulation).  Bounds the live range explicitly.
        for t, (dh, dw) in enumerate(_TAPS):
            tap = xp_ref[dh:dh + h, dw:dw + w, :].reshape(h * w, cin)
            p_ref[:, t * cin:(t + 1) * cin] = tap.astype(bf16)
        y = jnp.dot(p_ref[...], w_ref[...], preferred_element_type=f32)
        return y + b_ref[...]

    # ---- conv1 (1->32): input already in im2col form -> single matmul ----
    y1 = jnp.dot(p1_ref[0], w1_ref[...], preferred_element_type=f32)   # (H*W, 32)
    y1 = jnp.maximum(y1 + b1_ref[...], 0.0)
    pooled1 = maxpool2(y1, H, W, C1, rm1_ref)                          # (H/2, W/2, 32)

    xp2_ref[...] = jnp.zeros_like(xp2_ref)                             # in-kernel halo
    xp2_ref[1:1 + H2, 1:1 + W2, :] = pooled1

    # ---- conv2 (32->64) + ReLU + maxpool ----
    y2 = jnp.maximum(im2col_conv(xp2_ref, p2_ref, w2_ref, b2_ref, H2, W2, C1), 0.0)
    pooled2 = maxpool2(y2, H2, W2, C2, rm2_ref)                        # (H/4, W/4, 64)

    xp3_ref[...] = jnp.zeros_like(xp3_ref)
    xp3_ref[1:1 + H3, 1:1 + W3, :] = pooled2

    # ---- conv3 (64->32) + ReLU ----
    y3 = jnp.maximum(im2col_conv(xp3_ref, p3_ref, w3_ref, b3_ref, H3, W3, C2), 0.0)

    xp4_ref[...] = jnp.zeros_like(xp4_ref)
    xp4_ref[1:1 + H3, 1:1 + W3, :] = y3.reshape(H3, W3, C3)

    # ---- conv4 (32->10), no ReLU ----
    y4 = im2col_conv(xp4_ref, p4_ref, w4_ref, b4_ref, H3, W3, C3)      # (H3*W3, 10)

    # ---- fused global-average-pool + softmax (only (1,10) leaves the kernel) ----
    npix = H3 * W3
    mean_vec = jnp.full((1, npix), 1.0 / npix, dtype=f32)
    logits = jnp.dot(mean_vec, y4, preferred_element_type=f32)         # (1, 10)
    m = jnp.max(logits, axis=-1, keepdims=True)
    e = jnp.exp(logits - m)
    probs = e / jnp.sum(e, axis=-1, keepdims=True)                     # exact sum-to-1
    o_ref[0] = probs.astype(o_ref.dtype)


def _im2col_input(x_nchw, H, W):
    """(N,1,H,W) -> (N, H*W, 9) patches for the 3x3/pad=1 first conv (Cin=1)."""
    x2 = x_nchw[:, 0, :, :]
    xpad = jnp.pad(x2, ((0, 0), (1, 1), (1, 1)))
    taps = [xpad[:, dh:dh + H, dw:dw + W] for dh, dw in _TAPS]
    return jnp.stack(taps, axis=-1).reshape(x2.shape[0], H * W, 9)


@jax.jit
def net_forward(x_nchw, params):
    N, _, H, W = x_nchw.shape
    H2, W2, H3, W3 = H // 2, W // 2, H // 4, W // 4
    (w1, b1), (w2, b2), (w3, b3), (w4, b4) = params
    bf16 = jnp.bfloat16

    # Inputs to the fused kernel: im2col'd image + pre-reshaped bf16 weights.
    p1 = _im2col_input(x_nchw, H, W).astype(bf16)              # (N, H*W, 9)
    w1r = w1.reshape(9, C1).astype(bf16)
    w2r = w2.reshape(9 * C1, C2).astype(bf16)
    w3r = w3.reshape(9 * C2, C3).astype(bf16)
    w4r = w4.reshape(9 * C3, C4).astype(bf16)
    b1r, b2r, b3r, b4r = (b.reshape(1, -1) for b in (b1, b2, b3, b4))

    def full_spec(shape):
        return pl.BlockSpec(shape, lambda n: (0, 0))

    grid_spec = pltpu.PrefetchScalarGridSpec(
        num_scalar_prefetch=0,
        grid=(N,),
        in_specs=[
            pl.BlockSpec((1, H * W, 9), lambda n: (n, 0, 0)),
            full_spec((9, C1)), full_spec((1, C1)),
            full_spec((9 * C1, C2)), full_spec((1, C2)),
            full_spec((9 * C2, C3)), full_spec((1, C3)),
            full_spec((9 * C3, C4)), full_spec((1, C4)),
        ],
        out_specs=pl.BlockSpec((1, 1, C4), lambda n: (n, 0, 0)),
        scratch_shapes=[
            pltpu.VMEM((H2 + 2, W2 + 2, C1), jnp.float32),     # padded conv2 input
            pltpu.VMEM((H3 + 2, W3 + 2, C2), jnp.float32),     # padded conv3 input
            pltpu.VMEM((H3 + 2, W3 + 2, C3), jnp.float32),     # padded conv4 input
            pltpu.VMEM((H // 2, W, C1), jnp.float32),          # row-pooled conv1
            pltpu.VMEM((H2 // 2, W2, C2), jnp.float32),        # row-pooled conv2
            pltpu.VMEM((H2 * W2, 9 * C1), jnp.bfloat16),       # conv2 im2col patches
            pltpu.VMEM((H3 * W3, 9 * C2), jnp.bfloat16),       # conv3 im2col patches
            pltpu.VMEM((H3 * W3, 9 * C3), jnp.bfloat16),       # conv4 im2col patches
        ],
    )

    out = pl.pallas_call(
        functools.partial(_net_kernel, H=H, W=W),
        out_shape=jax.ShapeDtypeStruct((N, 1, C4), jnp.float32),
        grid_spec=grid_spec,
        compiler_params=pltpu.CompilerParams(
            dimension_semantics=("parallel",)),                # v7x: 2 TCs over batch
    )(p1, w1r, b1r, w2r, b2r, w3r, b3r, w4r, b4r)
    return out.reshape(N, C4)


def init_params(key):
    # (Cin, Cout) per conv layer of the PyTorch module; weights kept HWIO.
    dims = [(1, C1), (C1, C2), (C2, C3), (C3, C4)]
    params = []
    for i, (cin, cout) in enumerate(dims):
        kw, kb = jax.random.split(jax.random.fold_in(key, i))
        w = 0.1 * jax.random.normal(kw, (3, 3, cin, cout), jnp.float32)
        b = 0.01 * jax.random.normal(kb, (cout,), jnp.float32)
        params.append((w, b))
    return params


def _ref_forward(x_nchw, params):
    # Pure-JAX (f32) reference for correctness checking.
    x = jnp.transpose(x_nchw, (0, 2, 3, 1))

    def conv(x, w, b):
        y = lax.conv_general_dilated(x, w, (1, 1), 'SAME',
                                     dimension_numbers=('NHWC', 'HWIO', 'NHWC'),
                                     precision=lax.Precision.HIGHEST)
        return y + b

    def pool(x):
        return lax.reduce_window(x, -jnp.inf, lax.max,
                                 (1, 2, 2, 1), (1, 2, 2, 1), 'VALID')

    (w1, b1), (w2, b2), (w3, b3), (w4, b4) = params
    x = pool(jax.nn.relu(conv(x, w1, b1)))
    x = pool(jax.nn.relu(conv(x, w2, b2)))
    x = jax.nn.relu(conv(x, w3, b3))
    x = conv(x, w4, b4)
    x = jnp.mean(x, axis=(1, 2))
    return jax.nn.softmax(x, axis=1)


if __name__ == "__main__":
    key = jax.random.PRNGKey(0)
    kx, kp = jax.random.split(key)
    # MNIST-like input, NCHW as in PyTorch (1 input channel, 32x32 spatial)
    x = jax.random.normal(kx, (2, 1, 32, 32), jnp.float32)
    params = init_params(kp)

    out = jax.block_until_ready(net_forward(x, params))
    ref = _ref_forward(x, params)

    assert out.shape == (2, 10)
    assert bool(jnp.allclose(jnp.sum(out, axis=1), 1.0, atol=1e-5))
    # bf16 MXU operands with f32 accumulation -> bf16-appropriate tolerance.
    assert bool(jnp.allclose(out, ref, atol=2e-2, rtol=2e-2))
    print("KERNEL_OK")
</pallas_src>

<mosaic_0001>
module attributes {stable_mosaic.version = 11 : i64} {
  func.func @_net_kernel(%arg0: i32, %arg1: memref<1x1024x9xbf16, #tpu.memory_space<vmem>>, %arg2: memref<9x32xbf16, #tpu.memory_space<vmem>>, %arg3: memref<1x32xf32, #tpu.memory_space<vmem>>, %arg4: memref<288x64xbf16, #tpu.memory_space<vmem>>, %arg5: memref<1x64xf32, #tpu.memory_space<vmem>>, %arg6: memref<576x32xbf16, #tpu.memory_space<vmem>>, %arg7: memref<1x32xf32, #tpu.memory_space<vmem>>, %arg8: memref<288x10xbf16, #tpu.memory_space<vmem>>, %arg9: memref<1x10xf32, #tpu.memory_space<vmem>>, %arg10: memref<1x1x10xf32, #tpu.memory_space<vmem>>, %arg11: memref<18x18x32xf32, #tpu.memory_space<vmem>>, %arg12: memref<10x10x64xf32, #tpu.memory_space<vmem>>, %arg13: memref<10x10x32xf32, #tpu.memory_space<vmem>>, %arg14: memref<16x32x32xf32, #tpu.memory_space<vmem>>, %arg15: memref<8x16x64xf32, #tpu.memory_space<vmem>>, %arg16: memref<256x288xbf16, #tpu.memory_space<vmem>>, %arg17: memref<64x576xbf16, #tpu.memory_space<vmem>>, %arg18: memref<64x288xbf16, #tpu.memory_space<vmem>>) attributes {dimension_semantics = [#tpu.dimension_semantics<parallel>], iteration_bounds = array<i64: 2>, scalar_prefetch = 0 : i64, scratch_operands = 8 : i64, tpu.core_type = #tpu.core_type<tc>, window_params = [{transform_indices = @transform_0, window_bounds = array<i64: 1, 1024, 9>}, {pipeline_mode = #tpu.pipeline_mode<synchronous>, transform_indices = @transform_1, window_bounds = array<i64: 9, 32>}, {pipeline_mode = #tpu.pipeline_mode<synchronous>, transform_indices = @transform_2, window_bounds = array<i64: 1, 32>}, {pipeline_mode = #tpu.pipeline_mode<synchronous>, transform_indices = @transform_3, window_bounds = array<i64: 288, 64>}, {pipeline_mode = #tpu.pipeline_mode<synchronous>, transform_indices = @transform_4, window_bounds = array<i64: 1, 64>}, {pipeline_mode = #tpu.pipeline_mode<synchronous>, transform_indices = @transform_5, window_bounds = array<i64: 576, 32>}, {pipeline_mode = #tpu.pipeline_mode<synchronous>, transform_indices = @transform_6, window_bounds = array<i64: 1, 32>}, {pipeline_mode = #tpu.pipeline_mode<synchronous>, transform_indices = @transform_7, window_bounds = array<i64: 288, 10>}, {pipeline_mode = #tpu.pipeline_mode<synchronous>, transform_indices = @transform_8, window_bounds = array<i64: 1, 10>}, {transform_indices = @transform_9, window_bounds = array<i64: 1, 1, 10>}]} {
    %c0 = arith.constant 0 : index
    %c0_0 = arith.constant 0 : index
    %c0_1 = arith.constant 0 : index
    %0 = vector.load %arg1[%c0, %c0_0, %c0_1] : memref<1x1024x9xbf16, #tpu.memory_space<vmem>>, vector<1x1024x9xbf16>
    %1 = vector.shape_cast %0 : vector<1x1024x9xbf16> to vector<1024x9xbf16>
    %c0_2 = arith.constant 0 : index
    %c0_3 = arith.constant 0 : index
    %2 = vector.load %arg2[%c0_2, %c0_3] : memref<9x32xbf16, #tpu.memory_space<vmem>>, vector<9x32xbf16>
    %cst = arith.constant dense<0.000000e+00> : vector<1024x32xf32>
    %3 = tpu.matmul %1, %2, %cst {dimension_numbers = #tpu.dot_dimension_numbers<[1], [0], [0], [1], [0, 0, 1, 1], [], []>} : vector<1024x9xbf16>, vector<9x32xbf16>, vector<1024x32xf32> -> vector<1024x32xf32>
    %c0_4 = arith.constant 0 : index
    %c0_5 = arith.constant 0 : index
    %4 = vector.load %arg3[%c0_4, %c0_5] : memref<1x32xf32, #tpu.memory_space<vmem>>, vector<1x32xf32>
    %5 = vector.broadcast %4 : vector<1x32xf32> to vector<1024x32xf32>
    %6 = arith.addf %3, %5 : vector<1024x32xf32>
    %cst_6 = arith.constant 0.000000e+00 : f32
    %7 = vector.broadcast %cst_6 : f32 to vector<1024x32xf32>
    %8 = arith.maximumf %6, %7 : vector<1024x32xf32>
    %9 = vector.shape_cast %8 : vector<1024x32xf32> to vector<16x2x32x32xf32>
    %10 = vector.extract_strided_slice %9 {offsets = [0, 0, 0, 0], sizes = [16, 1, 32, 32], strides = [1, 1, 1, 1]} : vector<16x2x32x32xf32> to vector<16x1x32x32xf32>
    %11 = vector.shape_cast %10 : vector<16x1x32x32xf32> to vector<16x32x32xf32>
    %12 = vector.extract_strided_slice %9 {offsets = [0, 1, 0, 0], sizes = [16, 1, 32, 32], strides = [1, 1, 1, 1]} : vector<16x2x32x32xf32> to vector<16x1x32x32xf32>
    %13 = vector.shape_cast %12 : vector<16x1x32x32xf32> to vector<16x32x32xf32>
    %14 = arith.maximumf %11, %13 : vector<16x32x32xf32>
    %c0_7 = arith.constant 0 : index
    %c0_8 = arith.constant 0 : index
    %c0_9 = arith.constant 0 : index
    %15 = vector.load %arg14[%c0_7, %c0_8, %c0_9] : memref<16x32x32xf32, #tpu.memory_space<vmem>>, vector<16x32x32xf32>
    tpu.vector_store %arg14[%c0_7, %c0_8, %c0_9], %14 {strides = array<i32>} : memref<16x32x32xf32, #tpu.memory_space<vmem>>, vector<16x32x32xf32>,
    %c0_10 = arith.constant 0 : index
    %c0_11 = arith.constant 0 : index
    %c0_12 = arith.constant 0 : index
    %16 = tpu.strided_load %arg14[%c0_10, %c0_11, %c0_12] {strides = array<i32: 1, 2, 1>} : memref<16x32x32xf32, #tpu.memory_space<vmem>>, vector<16x16x32xf32>
    %c0_13 = arith.constant 0 : index
    %c1 = arith.constant 1 : index
    %c0_14 = arith.constant 0 : index
    %17 = tpu.strided_load %arg14[%c0_13, %c1, %c0_14] {strides = array<i32: 1, 2, 1>} : memref<16x32x32xf32, #tpu.memory_space<vmem>>, vector<16x16x32xf32>
    %18 = arith.maximumf %16, %17 : vector<16x16x32xf32>
    %cst_15 = arith.constant 0.000000e+00 : f32
    %19 = vector.broadcast %cst_15 : f32 to vector<18x18x32xf32>
    %c0_16 = arith.constant 0 : index
    %c0_17 = arith.constant 0 : index
    %c0_18 = arith.constant 0 : index
    %20 = vector.load %arg11[%c0_16, %c0_17, %c0_18] : memref<18x18x32xf32, #tpu.memory_space<vmem>>, vector<18x18x32xf32>
    tpu.vector_store %arg11[%c0_16, %c0_17, %c0_18], %19 {strides = array<i32>} : memref<18x18x32xf32, #tpu.memory_space<vmem>>, vector<18x18x32xf32>,
    %c1_19 = arith.constant 1 : index
    %c1_20 = arith.constant 1 : index
    %c0_21 = arith.constant 0 : index
    %21 = vector.load %arg11[%c1_19, %c1_20, %c0_21] : memref<18x18x32xf32, #tpu.memory_space<vmem>>, vector<16x16x32xf32>
    tpu.vector_store %arg11[%c1_19, %c1_20, %c0_21], %18 {strides = array<i32>} : memref<18x18x32xf32, #tpu.memory_space<vmem>>, vector<16x16x32xf32>,
    %c0_22 = arith.constant 0 : index
    %c0_23 = arith.constant 0 : index
    %c0_24 = arith.constant 0 : index
    %22 = vector.load %arg11[%c0_22, %c0_23, %c0_24] : memref<18x18x32xf32, #tpu.memory_space<vmem>>, vector<16x16x32xf32>
    %23 = vector.shape_cast %22 : vector<16x16x32xf32> to vector<256x32xf32>
    %24 = arith.truncf %23 : vector<256x32xf32> to vector<256x32xbf16>
    %c0_25 = arith.constant 0 : index
    %c0_26 = arith.constant 0 : index
    %25 = vector.load %arg16[%c0_25, %c0_26] : memref<256x288xbf16, #tpu.memory_space<vmem>>, vector<256x32xbf16>
    tpu.vector_store %arg16[%c0_25, %c0_26], %24 {strides = array<i32>} : memref<256x288xbf16, #tpu.memory_space<vmem>>, vector<256x32xbf16>,
    %c0_27 = arith.constant 0 : index
    %c1_28 = arith.constant 1 : index
    %c0_29 = arith.constant 0 : index
    %26 = vector.load %arg11[%c0_27, %c1_28, %c0_29] : memref<18x18x32xf32, #tpu.memory_space<vmem>>, vector<16x16x32xf32>
    %27 = vector.shape_cast %26 : vector<16x16x32xf32> to vector<256x32xf32>
    %28 = arith.truncf %27 : vector<256x32xf32> to vector<256x32xbf16>
    %c0_30 = arith.constant 0 : index
    %c32 = arith.constant 32 : index
    %29 = vector.load %arg16[%c0_30, %c32] : memref<256x288xbf16, #tpu.memory_space<vmem>>, vector<256x32xbf16>
    tpu.vector_store %arg16[%c0_30, %c32], %28 {strides = array<i32>} : memref<256x288xbf16, #tpu.memory_space<vmem>>, vector<256x32xbf16>,
    %c0_31 = arith.constant 0 : index
    %c2 = arith.constant 2 : index
    %c0_32 = arith.constant 0 : index
    %30 = vector.load %arg11[%c0_31, %c2, %c0_32] : memref<18x18x32xf32, #tpu.memory_space<vmem>>, vector<16x16x32xf32>
    %31 = vector.shape_cast %30 : vector<16x16x32xf32> to vector<256x32xf32>
    %32 = arith.truncf %31 : vector<256x32xf32> to vector<256x32xbf16>
    %c0_33 = arith.constant 0 : index
    %c64 = arith.constant 64 : index
    %33 = vector.load %arg16[%c0_33, %c64] : memref<256x288xbf16, #tpu.memory_space<vmem>>, vector<256x32xbf16>
    tpu.vector_store %arg16[%c0_33, %c64], %32 {strides = array<i32>} : memref<256x288xbf16, #tpu.memory_space<vmem>>, vector<256x32xbf16>,
    %c1_34 = arith.constant 1 : index
    %c0_35 = arith.constant 0 : index
    %c0_36 = arith.constant 0 : index
    %34 = vector.load %arg11[%c1_34, %c0_35, %c0_36] : memref<18x18x32xf32, #tpu.memory_space<vmem>>, vector<16x16x32xf32>
    %35 = vector.shape_cast %34 : vector<16x16x32xf32> to vector<256x32xf32>
    %36 = arith.truncf %35 : vector<256x32xf32> to vector<256x32xbf16>
    %c0_37 = arith.constant 0 : index
    %c96 = arith.constant 96 : index
    %37 = vector.load %arg16[%c0_37, %c96] : memref<256x288xbf16, #tpu.memory_space<vmem>>, vector<256x32xbf16>
    tpu.vector_store %arg16[%c0_37, %c96], %36 {strides = array<i32>} : memref<256x288xbf16, #tpu.memory_space<vmem>>, vector<256x32xbf16>,
    %c1_38 = arith.constant 1 : index
    %c1_39 = arith.constant 1 : index
    %c0_40 = arith.constant 0 : index
    %38 = vector.load %arg11[%c1_38, %c1_39, %c0_40] : memref<18x18x32xf32, #tpu.memory_space<vmem>>, vector<16x16x32xf32>
    %39 = vector.shape_cast %38 : vector<16x16x32xf32> to vector<256x32xf32>
    %40 = arith.truncf %39 : vector<256x32xf32> to vector<256x32xbf16>
    %c0_41 = arith.constant 0 : index
    %c128 = arith.constant 128 : index
    %41 = vector.load %arg16[%c0_41, %c128] : memref<256x288xbf16, #tpu.memory_space<vmem>>, vector<256x32xbf16>
    tpu.vector_store %arg16[%c0_41, %c128], %40 {strides = array<i32>} : memref<256x288xbf16, #tpu.memory_space<vmem>>, vector<256x32xbf16>,
    %c1_42 = arith.constant 1 : index
    %c2_43 = arith.constant 2 : index
    %c0_44 = arith.constant 0 : index
    %42 = vector.load %arg11[%c1_42, %c2_43, %c0_44] : memref<18x18x32xf32, #tpu.memory_space<vmem>>, vector<16x16x32xf32>
    %43 = vector.shape_cast %42 : vector<16x16x32xf32> to vector<256x32xf32>
    %44 = arith.truncf %43 : vector<256x32xf32> to vector<256x32xbf16>
    %c0_45 = arith.constant 0 : index
    %c160 = arith.constant 160 : index
    %45 = vector.load %arg16[%c0_45, %c160] : memref<256x288xbf16, #tpu.memory_space<vmem>>, vector<256x32xbf16>
    tpu.vector_store %arg16[%c0_45, %c160], %44 {strides = array<i32>} : memref<256x288xbf16, #tpu.memory_space<vmem>>, vector<256x32xbf16>,
    %c2_46 = arith.constant 2 : index
    %c0_47 = arith.constant 0 : index
    %c0_48 = arith.constant 0 : index
    %46 = vector.load %arg11[%c2_46, %c0_47, %c0_48] : memref<18x18x32xf32, #tpu.memory_space<vmem>>, vector<16x16x32xf32>
    %47 = vector.shape_cast %46 : vector<16x16x32xf32> to vector<256x32xf32>
    %48 = arith.truncf %47 : vector<256x32xf32> to vector<256x32xbf16>
    %c0_49 = arith.constant 0 : index
    %c192 = arith.constant 192 : index
    %49 = vector.load %arg16[%c0_49, %c192] : memref<256x288xbf16, #tpu.memory_space<vmem>>, vector<256x32xbf16>
    tpu.vector_store %arg16[%c0_49, %c192], %48 {strides = array<i32>} : memref<256x288xbf16, #tpu.memory_space<vmem>>, vector<256x32xbf16>,
    %c2_50 = arith.constant 2 : index
    %c1_51 = arith.constant 1 : index
    %c0_52 = arith.constant 0 : index
    %50 = vector.load %arg11[%c2_50, %c1_51, %c0_52] : memref<18x18x32xf32, #tpu.memory_space<vmem>>, vector<16x16x32xf32>
    %51 = vector.shape_cast %50 : vector<16x16x32xf32> to vector<256x32xf32>
    %52 = arith.truncf %51 : vector<256x32xf32> to vector<256x32xbf16>
    %c0_53 = arith.constant 0 : index
    %c224 = arith.constant 224 : index
    %53 = vector.load %arg16[%c0_53, %c224] : memref<256x288xbf16, #tpu.memory_space<vmem>>, vector<256x32xbf16>
    tpu.vector_store %arg16[%c0_53, %c224], %52 {strides = array<i32>} : memref<256x288xbf16, #tpu.memory_space<vmem>>, vector<256x32xbf16>,
    %c2_54 = arith.constant 2 : index
    %c2_55 = arith.constant 2 : index
    %c0_56 = arith.constant 0 : index
    %54 = vector.load %arg11[%c2_54, %c2_55, %c0_56] : memref<18x18x32xf32, #tpu.memory_space<vmem>>, vector<16x16x32xf32>
    %55 = vector.shape_cast %54 : vector<16x16x32xf32> to vector<256x32xf32>
    %56 = arith.truncf %55 : vector<256x32xf32> to vector<256x32xbf16>
    %c0_57 = arith.constant 0 : index
    %c256 = arith.constant 256 : index
    %57 = vector.load %arg16[%c0_57, %c256] : memref<256x288xbf16, #tpu.memory_space<vmem>>, vector<256x32xbf16>
    tpu.vector_store %arg16[%c0_57, %c256], %56 {strides = array<i32>} : memref<256x288xbf16, #tpu.memory_space<vmem>>, vector<256x32xbf16>,
    %c0_58 = arith.constant 0 : index
    %c0_59 = arith.constant 0 : index
    %58 = vector.load %arg16[%c0_58, %c0_59] : memref<256x288xbf16, #tpu.memory_space<vmem>>, vector<256x288xbf16>
    %c0_60 = arith.constant 0 : index
    %c0_61 = arith.constant 0 : index
    %59 = vector.load %arg4[%c0_60, %c0_61] : memref<288x64xbf16, #tpu.memory_space<vmem>>, vector<288x64xbf16>
    %cst_62 = arith.constant dense<0.000000e+00> : vector<256x64xf32>
    %60 = tpu.matmul %58, %59, %cst_62 {dimension_numbers = #tpu.dot_dimension_numbers<[1], [0], [0], [1], [0, 0, 1, 1], [], []>} : vector<256x288xbf16>, vector<288x64xbf16>, vector<256x64xf32> -> vector<256x64xf32>
    %c0_63 = arith.constant 0 : index
    %c0_64 = arith.constant 0 : index
    %61 = vector.load %arg5[%c0_63, %c0_64] : memref<1x64xf32, #tpu.memory_space<vmem>>, vector<1x64xf32>
    %62 = vector.broadcast %61 : vector<1x64xf32> to vector<256x64xf32>
    %63 = arith.addf %60, %62 : vector<256x64xf32>
    %cst_65 = arith.constant 0.000000e+00 : f32
    %64 = vector.broadcast %cst_65 : f32 to vector<256x64xf32>
    %65 = arith.maximumf %63, %64 : vector<256x64xf32>
    %66 = vector.shape_cast %65 : vector<256x64xf32> to vector<8x2x16x64xf32>
    %67 = vector.extract_strided_slice %66 {offsets = [0, 0, 0, 0], sizes = [8, 1, 16, 64], strides = [1, 1, 1, 1]} : vector<8x2x16x64xf32> to vector<8x1x16x64xf32>
    %68 = vector.shape_cast %67 : vector<8x1x16x64xf32> to vector<8x16x64xf32>
    %69 = vector.extract_strided_slice %66 {offsets = [0, 1, 0, 0], sizes = [8, 1, 16, 64], strides = [1, 1, 1, 1]} : vector<8x2x16x64xf32> to vector<8x1x16x64xf32>
    %70 = vector.shape_cast %69 : vector<8x1x16x64xf32> to vector<8x16x64xf32>
    %71 = arith.maximumf %68, %70 : vector<8x16x64xf32>
    %c0_66 = arith.constant 0 : index
    %c0_67 = arith.constant 0 : index
    %c0_68 = arith.constant 0 : index
    %72 = vector.load %arg15[%c0_66, %c0_67, %c0_68] : memref<8x16x64xf32, #tpu.memory_space<vmem>>, vector<8x16x64xf32>
    tpu.vector_store %arg15[%c0_66, %c0_67, %c0_68], %71 {strides = array<i32>} : memref<8x16x64xf32, #tpu.memory_space<vmem>>, vector<8x16x64xf32>,
    %c0_69 = arith.constant 0 : index
    %c0_70 = arith.constant 0 : index
    %c0_71 = arith.constant 0 : index
    %73 = tpu.strided_load %arg15[%c0_69, %c0_70, %c0_71] {strides = array<i32: 1, 2, 1>} : memref<8x16x64xf32, #tpu.memory_space<vmem>>, vector<8x8x64xf32>
    %c0_72 = arith.constant 0 : index
    %c1_73 = arith.constant 1 : index
    %c0_74 = arith.constant 0 : index
    %74 = tpu.strided_load %arg15[%c0_72, %c1_73, %c0_74] {strides = array<i32: 1, 2, 1>} : memref<8x16x64xf32, #tpu.memory_space<vmem>>, vector<8x8x64xf32>
    %75 = arith.maximumf %73, %74 : vector<8x8x64xf32>
    %cst_75 = arith.constant 0.000000e+00 : f32
    %76 = vector.broadcast %cst_75 : f32 to vector<10x10x64xf32>
    %c0_76 = arith.constant 0 : index
    %c0_77 = arith.constant 0 : index
    %c0_78 = arith.constant 0 : index
    %77 = vector.load %arg12[%c0_76, %c0_77, %c0_78] : memref<10x10x64xf32, #tpu.memory_space<vmem>>, vector<10x10x64xf32>
    tpu.vector_store %arg12[%c0_76, %c0_77, %c0_78], %76 {strides = array<i32>} : memref<10x10x64xf32, #tpu.memory_space<vmem>>, vector<10x10x64xf32>,
    %c1_79 = arith.constant 1 : index
    %c1_80 = arith.constant 1 : index
    %c0_81 = arith.constant 0 : index
    %78 = vector.load %arg12[%c1_79, %c1_80, %c0_81] : memref<10x10x64xf32, #tpu.memory_space<vmem>>, vector<8x8x64xf32>
    tpu.vector_store %arg12[%c1_79, %c1_80, %c0_81], %75 {strides = array<i32>} : memref<10x10x64xf32, #tpu.memory_space<vmem>>, vector<8x8x64xf32>,
    %c0_82 = arith.constant 0 : index
    %c0_83 = arith.constant 0 : index
    %c0_84 = arith.constant 0 : index
    %79 = vector.load %arg12[%c0_82, %c0_83, %c0_84] : memref<10x10x64xf32, #tpu.memory_space<vmem>>, vector<8x8x64xf32>
    %80 = vector.shape_cast %79 : vector<8x8x64xf32> to vector<64x64xf32>
    %81 = arith.truncf %80 : vector<64x64xf32> to vector<64x64xbf16>
    %c0_85 = arith.constant 0 : index
    %c0_86 = arith.constant 0 : index
    %82 = vector.load %arg17[%c0_85, %c0_86] : memref<64x576xbf16, #tpu.memory_space<vmem>>, vector<64x64xbf16>
    tpu.vector_store %arg17[%c0_85, %c0_86], %81 {strides = array<i32>} : memref<64x576xbf16, #tpu.memory_space<vmem>>, vector<64x64xbf16>,
    %c0_87 = arith.constant 0 : index
    %c1_88 = arith.constant 1 : index
    %c0_89 = arith.constant 0 : index
    %83 = vector.load %arg12[%c0_87, %c1_88, %c0_89] : memref<10x10x64xf32, #tpu.memory_space<vmem>>, vector<8x8x64xf32>
    %84 = vector.shape_cast %83 : vector<8x8x64xf32> to vector<64x64xf32>
    %85 = arith.truncf %84 : vector<64x64xf32> to vector<64x64xbf16>
    %c0_90 = arith.constant 0 : index
    %c64_91 = arith.constant 64 : index
    %86 = vector.load %arg17[%c0_90, %c64_91] : memref<64x576xbf16, #tpu.memory_space<vmem>>, vector<64x64xbf16>
    tpu.vector_store %arg17[%c0_90, %c64_91], %85 {strides = array<i32>} : memref<64x576xbf16, #tpu.memory_space<vmem>>, vector<64x64xbf16>,
    %c0_92 = arith.constant 0 : index
    %c2_93 = arith.constant 2 : index
    %c0_94 = arith.constant 0 : index
    %87 = vector.load %arg12[%c0_92, %c2_93, %c0_94] : memref<10x10x64xf32, #tpu.memory_space<vmem>>, vector<8x8x64xf32>
    %88 = vector.shape_cast %87 : vector<8x8x64xf32> to vector<64x64xf32>
    %89 = arith.truncf %88 : vector<64x64xf32> to vector<64x64xbf16>
    %c0_95 = arith.constant 0 : index
    %c128_96 = arith.constant 128 : index
    %90 = vector.load %arg17[%c0_95, %c128_96] : memref<64x576xbf16, #tpu.memory_space<vmem>>, vector<64x64xbf16>
    tpu.vector_store %arg17[%c0_95, %c128_96], %89 {strides = array<i32>} : memref<64x576xbf16, #tpu.memory_space<vmem>>, vector<64x64xbf16>,
    %c1_97 = arith.constant 1 : index
    %c0_98 = arith.constant 0 : index
    %c0_99 = arith.constant 0 : index
    %91 = vector.load %arg12[%c1_97, %c0_98, %c0_99] : memref<10x10x64xf32, #tpu.memory_space<vmem>>, vector<8x8x64xf32>
    %92 = vector.shape_cast %91 : vector<8x8x64xf32> to vector<64x64xf32>
    %93 = arith.truncf %92 : vector<64x64xf32> to vector<64x64xbf16>
    %c0_100 = arith.constant 0 : index
    %c192_101 = arith.constant 192 : index
    %94 = vector.load %arg17[%c0_100, %c192_101] : memref<64x576xbf16, #tpu.memory_space<vmem>>, vector<64x64xbf16>
    tpu.vector_store %arg17[%c0_100, %c192_101], %93 {strides = array<i32>} : memref<64x576xbf16, #tpu.memory_space<vmem>>, vector<64x64xbf16>,
    %c1_102 = arith.constant 1 : index
    %c1_103 = arith.constant 1 : index
    %c0_104 = arith.constant 0 : index
    %95 = vector.load %arg12[%c1_102, %c1_103, %c0_104] : memref<10x10x64xf32, #tpu.memory_space<vmem>>, vector<8x8x64xf32>
    %96 = vector.shape_cast %95 : vector<8x8x64xf32> to vector<64x64xf32>
    %97 = arith.truncf %96 : vector<64x64xf32> to vector<64x64xbf16>
    %c0_105 = arith.constant 0 : index
    %c256_106 = arith.constant 256 : index
    %98 = vector.load %arg17[%c0_105, %c256_106] : memref<64x576xbf16, #tpu.memory_space<vmem>>, vector<64x64xbf16>
    tpu.vector_store %arg17[%c0_105, %c256_106], %97 {strides = array<i32>} : memref<64x576xbf16, #tpu.memory_space<vmem>>, vector<64x64xbf16>,
    %c1_107 = arith.constant 1 : index
    %c2_108 = arith.constant 2 : index
    %c0_109 = arith.constant 0 : index
    %99 = vector.load %arg12[%c1_107, %c2_108, %c0_109] : memref<10x10x64xf32, #tpu.memory_space<vmem>>, vector<8x8x64xf32>
    %100 = vector.shape_cast %99 : vector<8x8x64xf32> to vector<64x64xf32>
    %101 = arith.truncf %100 : vector<64x64xf32> to vector<64x64xbf16>
    %c0_110 = arith.constant 0 : index
    %c320 = arith.constant 320 : index
    %102 = vector.load %arg17[%c0_110, %c320] : memref<64x576xbf16, #tpu.memory_space<vmem>>, vector<64x64xbf16>
    tpu.vector_store %arg17[%c0_110, %c320], %101 {strides = array<i32>} : memref<64x576xbf16, #tpu.memory_space<vmem>>, vector<64x64xbf16>,
    %c2_111 = arith.constant 2 : index
    %c0_112 = arith.constant 0 : index
    %c0_113 = arith.constant 0 : index
    %103 = vector.load %arg12[%c2_111, %c0_112, %c0_113] : memref<10x10x64xf32, #tpu.memory_space<vmem>>, vector<8x8x64xf32>
    %104 = vector.shape_cast %103 : vector<8x8x64xf32> to vector<64x64xf32>
    %105 = arith.truncf %104 : vector<64x64xf32> to vector<64x64xbf16>
    %c0_114 = arith.constant 0 : index
    %c384 = arith.constant 384 : index
    %106 = vector.load %arg17[%c0_114, %c384] : memref<64x576xbf16, #tpu.memory_space<vmem>>, vector<64x64xbf16>
    tpu.vector_store %arg17[%c0_114, %c384], %105 {strides = array<i32>} : memref<64x576xbf16, #tpu.memory_space<vmem>>, vector<64x64xbf16>,
    %c2_115 = arith.constant 2 : index
    %c1_116 = arith.constant 1 : index
    %c0_117 = arith.constant 0 : index
    %107 = vector.load %arg12[%c2_115, %c1_116, %c0_117] : memref<10x10x64xf32, #tpu.memory_space<vmem>>, vector<8x8x64xf32>
    %108 = vector.shape_cast %107 : vector<8x8x64xf32> to vector<64x64xf32>
    %109 = arith.truncf %108 : vector<64x64xf32> to vector<64x64xbf16>
    %c0_118 = arith.constant 0 : index
    %c448 = arith.constant 448 : index
    %110 = vector.load %arg17[%c0_118, %c448] : memref<64x576xbf16, #tpu.memory_space<vmem>>, vector<64x64xbf16>
    tpu.vector_store %arg17[%c0_118, %c448], %109 {strides = array<i32>} : memref<64x576xbf16, #tpu.memory_space<vmem>>, vector<64x64xbf16>,
    %c2_119 = arith.constant 2 : index
    %c2_120 = arith.constant 2 : index
    %c0_121 = arith.constant 0 : index
    %111 = vector.load %arg12[%c2_119, %c2_120, %c0_121] : memref<10x10x64xf32, #tpu.memory_space<vmem>>, vector<8x8x64xf32>
    %112 = vector.shape_cast %111 : vector<8x8x64xf32> to vector<64x64xf32>
    %113 = arith.truncf %112 : vector<64x64xf32> to vector<64x64xbf16>
    %c0_122 = arith.constant 0 : index
    %c512 = arith.constant 512 : index
    %114 = vector.load %arg17[%c0_122, %c512] : memref<64x576xbf16, #tpu.memory_space<vmem>>, vector<64x64xbf16>
    tpu.vector_store %arg17[%c0_122, %c512], %113 {strides = array<i32>} : memref<64x576xbf16, #tpu.memory_space<vmem>>, vector<64x64xbf16>,
    %c0_123 = arith.constant 0 : index
    %c0_124 = arith.constant 0 : index
    %115 = vector.load %arg17[%c0_123, %c0_124] : memref<64x576xbf16, #tpu.memory_space<vmem>>, vector<64x576xbf16>
    %c0_125 = arith.constant 0 : index
    %c0_126 = arith.constant 0 : index
    %116 = vector.load %arg6[%c0_125, %c0_126] : memref<576x32xbf16, #tpu.memory_space<vmem>>, vector<576x32xbf16>
    %cst_127 = arith.constant dense<0.000000e+00> : vector<64x32xf32>
    %117 = tpu.matmul %115, %116, %cst_127 {dimension_numbers = #tpu.dot_dimension_numbers<[1], [0], [0], [1], [0, 0, 1, 1], [], []>} : vector<64x576xbf16>, vector<576x32xbf16>, vector<64x32xf32> -> vector<64x32xf32>
    %c0_128 = arith.constant 0 : index
    %c0_129 = arith.constant 0 : index
    %118 = vector.load %arg7[%c0_128, %c0_129] : memref<1x32xf32, #tpu.memory_space<vmem>>, vector<1x32xf32>
    %119 = vector.broadcast %118 : vector<1x32xf32> to vector<64x32xf32>
    %120 = arith.addf %117, %119 : vector<64x32xf32>
    %cst_130 = arith.constant 0.000000e+00 : f32
    %121 = vector.broadcast %cst_130 : f32 to vector<64x32xf32>
    %122 = arith.maximumf %120, %121 : vector<64x32xf32>
    %cst_131 = arith.constant 0.000000e+00 : f32
    %123 = vector.broadcast %cst_131 : f32 to vector<10x10x32xf32>
    %c0_132 = arith.constant 0 : index
    %c0_133 = arith.constant 0 : index
    %c0_134 = arith.constant 0 : index
    %124 = vector.load %arg13[%c0_132, %c0_133, %c0_134] : memref<10x10x32xf32, #tpu.memory_space<vmem>>, vector<10x10x32xf32>
    tpu.vector_store %arg13[%c0_132, %c0_133, %c0_134], %123 {strides = array<i32>} : memref<10x10x32xf32, #tpu.memory_space<vmem>>, vector<10x10x32xf32>,
    %125 = vector.shape_cast %122 : vector<64x32xf32> to vector<8x8x32xf32>
    %c1_135 = arith.constant 1 : index
    %c1_136 = arith.constant 1 : index
    %c0_137 = arith.constant 0 : index
    %126 = vector.load %arg13[%c1_135, %c1_136, %c0_137] : memref<10x10x32xf32, #tpu.memory_space<vmem>>, vector<8x8x32xf32>
    tpu.vector_store %arg13[%c1_135, %c1_136, %c0_137], %125 {strides = array<i32>} : memref<10x10x32xf32, #tpu.memory_space<vmem>>, vector<8x8x32xf32>,
    %c0_138 = arith.constant 0 : index
    %c0_139 = arith.constant 0 : index
    %c0_140 = arith.constant 0 : index
    %127 = vector.load %arg13[%c0_138, %c0_139, %c0_140] : memref<10x10x32xf32, #tpu.memory_space<vmem>>, vector<8x8x32xf32>
    %128 = vector.shape_cast %127 : vector<8x8x32xf32> to vector<64x32xf32>
    %129 = arith.truncf %128 : vector<64x32xf32> to vector<64x32xbf16>
    %c0_141 = arith.constant 0 : index
    %c0_142 = arith.constant 0 : index
    %130 = vector.load %arg18[%c0_141, %c0_142] : memref<64x288xbf16, #tpu.memory_space<vmem>>, vector<64x32xbf16>
    tpu.vector_store %arg18[%c0_141, %c0_142], %129 {strides = array<i32>} : memref<64x288xbf16, #tpu.memory_space<vmem>>, vector<64x32xbf16>,
    %c0_143 = arith.constant 0 : index
    %c1_144 = arith.constant 1 : index
    %c0_145 = arith.constant 0 : index
    %131 = vector.load %arg13[%c0_143, %c1_144, %c0_145] : memref<10x10x32xf32, #tpu.memory_space<vmem>>, vector<8x8x32xf32>
    %132 = vector.shape_cast %131 : vector<8x8x32xf32> to vector<64x32xf32>
    %133 = arith.truncf %132 : vector<64x32xf32> to vector<64x32xbf16>
    %c0_146 = arith.constant 0 : index
    %c32_147 = arith.constant 32 : index
    %134 = vector.load %arg18[%c0_146, %c32_147] : memref<64x288xbf16, #tpu.memory_space<vmem>>, vector<64x32xbf16>
    tpu.vector_store %arg18[%c0_146, %c32_147], %133 {strides = array<i32>} : memref<64x288xbf16, #tpu.memory_space<vmem>>, vector<64x32xbf16>,
    %c0_148 = arith.constant 0 : index
    %c2_149 = arith.constant 2 : index
    %c0_150 = arith.constant 0 : index
    %135 = vector.load %arg13[%c0_148, %c2_149, %c0_150] : memref<10x10x32xf32, #tpu.memory_space<vmem>>, vector<8x8x32xf32>
    %136 = vector.shape_cast %135 : vector<8x8x32xf32> to vector<64x32xf32>
    %137 = arith.truncf %136 : vector<64x32xf32> to vector<64x32xbf16>
    %c0_151 = arith.constant 0 : index
    %c64_152 = arith.constant 64 : index
    %138 = vector.load %arg18[%c0_151, %c64_152] : memref<64x288xbf16, #tpu.memory_space<vmem>>, vector<64x32xbf16>
    tpu.vector_store %arg18[%c0_151, %c64_152], %137 {strides = array<i32>} : memref<64x288xbf16, #tpu.memory_space<vmem>>, vector<64x32xbf16>,
    %c1_153 = arith.constant 1 : index
    %c0_154 = arith.constant 0 : index
    %c0_155 = arith.constant 0 : index
    %139 = vector.load %arg13[%c1_153, %c0_154, %c0_155] : memref<10x10x32xf32, #tpu.memory_space<vmem>>, vector<8x8x32xf32>
    %140 = vector.shape_cast %139 : vector<8x8x32xf32> to vector<64x32xf32>
    %141 = arith.truncf %140 : vector<64x32xf32> to vector<64x32xbf16>
    %c0_156 = arith.constant 0 : index
    %c96_157 = arith.constant 96 : index
    %142 = vector.load %arg18[%c0_156, %c96_157] : memref<64x288xbf16, #tpu.memory_space<vmem>>, vector<64x32xbf16>
    tpu.vector_store %arg18[%c0_156, %c96_157], %141 {strides = array<i32>} : memref<64x288xbf16, #tpu.memory_space<vmem>>, vector<64x32xbf16>,
    %c1_158 = arith.constant 1 : index
    %c1_159 = arith.constant 1 : index
    %c0_160 = arith.constant 0 : index
    %143 = vector.load %arg13[%c1_158, %c1_159, %c0_160] : memref<10x10x32xf32, #tpu.memory_space<vmem>>, vector<8x8x32xf32>
    %144 = vector.shape_cast %143 : vector<8x8x32xf32> to vector<64x32xf32>
    %145 = arith.truncf %144 : vector<64x32xf32> to vector<64x32xbf16>
    %c0_161 = arith.constant 0 : index
    %c128_162 = arith.constant 128 : index
    %146 = vector.load %arg18[%c0_161, %c128_162] : memref<64x288xbf16, #tpu.memory_space<vmem>>, vector<64x32xbf16>
    tpu.vector_store %arg18[%c0_161, %c128_162], %145 {strides = array<i32>} : memref<64x288xbf16, #tpu.memory_space<vmem>>, vector<64x32xbf16>,
    %c1_163 = arith.constant 1 : index
    %c2_164 = arith.constant 2 : index
    %c0_165 = arith.constant 0 : index
    %147 = vector.load %arg13[%c1_163, %c2_164, %c0_165] : memref<10x10x32xf32, #tpu.memory_space<vmem>>, vector<8x8x32xf32>
    %148 = vector.shape_cast %147 : vector<8x8x32xf32> to vector<64x32xf32>
    %149 = arith.truncf %148 : vector<64x32xf32> to vector<64x32xbf16>
    %c0_166 = arith.constant 0 : index
    %c160_167 = arith.constant 160 : index
    %150 = vector.load %arg18[%c0_166, %c160_167] : memref<64x288xbf16, #tpu.memory_space<vmem>>, vector<64x32xbf16>
    tpu.vector_store %arg18[%c0_166, %c160_167], %149 {strides = array<i32>} : memref<64x288xbf16, #tpu.memory_space<vmem>>, vector<64x32xbf16>,
    %c2_168 = arith.constant 2 : index
    %c0_169 = arith.constant 0 : index
    %c0_170 = arith.constant 0 : index
    %151 = vector.load %arg13[%c2_168, %c0_169, %c0_170] : memref<10x10x32xf32, #tpu.memory_space<vmem>>, vector<8x8x32xf32>
    %152 = vector.shape_cast %151 : vector<8x8x32xf32> to vector<64x32xf32>
    %153 = arith.truncf %152 : vector<64x32xf32> to vector<64x32xbf16>
    %c0_171 = arith.constant 0 : index
    %c192_172 = arith.constant 192 : index
    %154 = vector.load %arg18[%c0_171, %c192_172] : memref<64x288xbf16, #tpu.memory_space<vmem>>, vector<64x32xbf16>
    tpu.vector_store %arg18[%c0_171, %c192_172], %153 {strides = array<i32>} : memref<64x288xbf16, #tpu.memory_space<vmem>>, vector<64x32xbf16>,
    %c2_173 = arith.constant 2 : index
    %c1_174 = arith.constant 1 : index
    %c0_175 = arith.constant 0 : index
    %155 = vector.load %arg13[%c2_173, %c1_174, %c0_175] : memref<10x10x32xf32, #tpu.memory_space<vmem>>, vector<8x8x32xf32>
    %156 = vector.shape_cast %155 : vector<8x8x32xf32> to vector<64x32xf32>
    %157 = arith.truncf %156 : vector<64x32xf32> to vector<64x32xbf16>
    %c0_176 = arith.constant 0 : index
    %c224_177 = arith.constant 224 : index
    %158 = vector.load %arg18[%c0_176, %c224_177] : memref<64x288xbf16, #tpu.memory_space<vmem>>, vector<64x32xbf16>
    tpu.vector_store %arg18[%c0_176, %c224_177], %157 {strides = array<i32>} : memref<64x288xbf16, #tpu.memory_space<vmem>>, vector<64x32xbf16>,
    %c2_178 = arith.constant 2 : index
    %c2_179 = arith.constant 2 : index
    %c0_180 = arith.constant 0 : index
    %159 = vector.load %arg13[%c2_178, %c2_179, %c0_180] : memref<10x10x32xf32, #tpu.memory_space<vmem>>, vector<8x8x32xf32>
    %160 = vector.shape_cast %159 : vector<8x8x32xf32> to vector<64x32xf32>
    %161 = arith.truncf %160 : vector<64x32xf32> to vector<64x32xbf16>
    %c0_181 = arith.constant 0 : index
    %c256_182 = arith.constant 256 : index
    %162 = vector.load %arg18[%c0_181, %c256_182] : memref<64x288xbf16, #tpu.memory_space<vmem>>, vector<64x32xbf16>
    tpu.vector_store %arg18[%c0_181, %c256_182], %161 {strides = array<i32>} : memref<64x288xbf16, #tpu.memory_space<vmem>>, vector<64x32xbf16>,
    %c0_183 = arith.constant 0 : index
    %c0_184 = arith.constant 0 : index
    %163 = vector.load %arg18[%c0_183, %c0_184] : memref<64x288xbf16, #tpu.memory_space<vmem>>, vector<64x288xbf16>
    %c0_185 = arith.constant 0 : index
    %c0_186 = arith.constant 0 : index
    %164 = vector.load %arg8[%c0_185, %c0_186] : memref<288x10xbf16, #tpu.memory_space<vmem>>, vector<288x10xbf16>
    %cst_187 = arith.constant dense<0.000000e+00> : vector<64x10xf32>
    %165 = tpu.matmul %163, %164, %cst_187 {dimension_numbers = #tpu.dot_dimension_numbers<[1], [0], [0], [1], [0, 0, 1, 1], [], []>} : vector<64x288xbf16>, vector<288x10xbf16>, vector<64x10xf32> -> vector<64x10xf32>
    %c0_188 = arith.constant 0 : index
    %c0_189 = arith.constant 0 : index
    %166 = vector.load %arg9[%c0_188, %c0_189] : memref<1x10xf32, #tpu.memory_space<vmem>>, vector<1x10xf32>
    %167 = vector.broadcast %166 : vector<1x10xf32> to vector<64x10xf32>
    %168 = arith.addf %165, %167 : vector<64x10xf32>
    %cst_190 = arith.constant 1.562500e-02 : f32
    %169 = vector.broadcast %cst_190 : f32 to vector<1x64xf32>
    %cst_191 = arith.constant dense<0.000000e+00> : vector<1x10xf32>
    %170 = tpu.matmul %169, %168, %cst_191 {dimension_numbers = #tpu.dot_dimension_numbers<[1], [0], [0], [1], [0, 0, 1, 1], [], []>} : vector<1x64xf32>, vector<64x10xf32>, vector<1x10xf32> -> vector<1x10xf32>
    %cst_192 = arith.constant dense<0xFF800000> : vector<1xf32>
    %171 = vector.multi_reduction <maximumf>, %170, %cst_192 [1] : vector<1x10xf32> to vector<1xf32>
    %172 = vector.shape_cast %171 : vector<1xf32> to vector<1x1xf32>
    %173 = vector.broadcast %172 : vector<1x1xf32> to vector<1x10xf32>
    %174 = arith.subf %170, %173 : vector<1x10xf32>
    %175 = math.exp %174 : vector<1x10xf32>
    %cst_193 = arith.constant dense<0.000000e+00> : vector<1xf32>
    %176 = vector.multi_reduction <add>, %175, %cst_193 [1] : vector<1x10xf32> to vector<1xf32>
    %177 = vector.shape_cast %176 : vector<1xf32> to vector<1x1xf32>
    %178 = vector.broadcast %177 : vector<1x1xf32> to vector<1x10xf32>
    %179 = arith.divf %175, %178 : vector<1x10xf32>
    %c0_194 = arith.constant 0 : index
    %c0_195 = arith.constant 0 : index
    %c0_196 = arith.constant 0 : index
    %180 = vector.load %arg10[%c0_194, %c0_195, %c0_196] : memref<1x1x10xf32, #tpu.memory_space<vmem>>, vector<1x1x10xf32>
    %181 = vector.shape_cast %180 : vector<1x1x10xf32> to vector<1x10xf32>
    %182 = vector.shape_cast %179 : vector<1x10xf32> to vector<1x1x10xf32>
    tpu.vector_store %arg10[%c0_194, %c0_195, %c0_196], %182 {strides = array<i32>} : memref<1x1x10xf32, #tpu.memory_space<vmem>>, vector<1x1x10xf32>,
    return
  }
  func.func @transform_0(%arg0: i32) -> (i32, i32, i32) {
    %c0_i32 = arith.constant 0 : i32
    %c0_i32_0 = arith.constant 0 : i32
    %c0_i32_1 = arith.constant 0 : i32
    return %arg0, %c0_i32, %c0_i32_0 : i32, i32, i32
  }
  func.func @transform_1(%arg0: i32) -> (i32, i32) {
    %c0_i32 = arith.constant 0 : i32
    %c0_i32_0 = arith.constant 0 : i32
    %c0_i32_1 = arith.constant 0 : i32
    return %c0_i32, %c0_i32_0 : i32, i32
  }
  func.func @transform_2(%arg0: i32) -> (i32, i32) {
    %c0_i32 = arith.constant 0 : i32
    %c0_i32_0 = arith.constant 0 : i32
    %c0_i32_1 = arith.constant 0 : i32
    return %c0_i32, %c0_i32_0 : i32, i32
  }
  func.func @transform_3(%arg0: i32) -> (i32, i32) {
    %c0_i32 = arith.constant 0 : i32
    %c0_i32_0 = arith.constant 0 : i32
    %c0_i32_1 = arith.constant 0 : i32
    return %c0_i32, %c0_i32_0 : i32, i32
  }
  func.func @transform_4(%arg0: i32) -> (i32, i32) {
    %c0_i32 = arith.constant 0 : i32
    %c0_i32_0 = arith.constant 0 : i32
    %c0_i32_1 = arith.constant 0 : i32
    return %c0_i32, %c0_i32_0 : i32, i32
  }
  func.func @transform_5(%arg0: i32) -> (i32, i32) {
    %c0_i32 = arith.constant 0 : i32
    %c0_i32_0 = arith.constant 0 : i32
    %c0_i32_1 = arith.constant 0 : i32
    return %c0_i32, %c0_i32_0 : i32, i32
  }
  func.func @transform_6(%arg0: i32) -> (i32, i32) {
    %c0_i32 = arith.constant 0 : i32
    %c0_i32_0 = arith.constant 0 : i32
    %c0_i32_1 = arith.constant 0 : i32
    return %c0_i32, %c0_i32_0 : i32, i32
  }
  func.func @transform_7(%arg0: i32) -> (i32, i32) {
    %c0_i32 = arith.constant 0 : i32
    %c0_i32_0 = arith.constant 0 : i32
    %c0_i32_1 = arith.constant 0 : i32
    return %c0_i32, %c0_i32_0 : i32, i32
  }
  func.func @transform_8(%arg0: i32) -> (i32, i32) {
    %c0_i32 = arith.constant 0 : i32
    %c0_i32_0 = arith.constant 0 : i32
    %c0_i32_1 = arith.constant 0 : i32
    return %c0_i32, %c0_i32_0 : i32, i32
  }
  func.func @transform_9(%arg0: i32) -> (i32, i32, i32) {
    %c0_i32 = arith.constant 0 : i32
    %c0_i32_0 = arith.constant 0 : i32
    %c0_i32_1 = arith.constant 0 : i32
    return %arg0, %c0_i32, %c0_i32_0 : i32, i32, i32
  }
}

</mosaic_0001>

<bundles_post_ra>
// kernel: net_forward.1
= control target key start
LH: loop header
LB: loop body
LE: loop exit
PB: predicated region body
PF: predicated region fallthrough
CT: control target
= control target key end

     0   :  { %14 = vsyncpa [#allocation11], 0  ;;  %s11657_s0 = inlined_call_operand.vmem [shape: bf16[2,1024,9], index: 0, kind: input, shape index: {}]   ;;  %s11658_s1 = inlined_call_operand.vmem [shape: bf16[9,32], index: 1, kind: input, shape index: {}]   ;;  %s11659_s2 = inlined_call_operand.vmem [shape: f32[1,32], index: 2, kind: input, shape index: {}]   ;;  %s11660_s3 = inlined_call_operand.vmem [shape: bf16[288,64], index: 3, kind: input, shape index: {}]   ;;  %s11661_s4 = inlined_call_operand.vmem [shape: f32[1,64], index: 4, kind: input, shape index: {}]   ;;  %s11662_s5 = inlined_call_operand.vmem [shape: bf16[576,32], index: 5, kind: input, shape index: {}]   ;;  %s11663_s6 = inlined_call_operand.vmem [shape: f32[1,32], index: 6, kind: input, shape index: {}]   ;;  %s11664_s7 = inlined_call_operand.vmem [shape: bf16[288,10], index: 7, kind: input, shape index: {}]   ;;  %s11665_s8 = inlined_call_operand.vmem [shape: f32[1,10], index: 8, kind: input, shape index: {}]   ;;  %s11666_s9 = inlined_call_operand.hbm [shape: f32[2,1,10], index: 9, kind: output, shape index: {}]  }
   0x1   :  { %16 = vsyncpa [#allocation11 + $0x1], 0  ;;  %s9482_s30 = smov 0   ;;  %s9484_s10 = smov 0  }
   0x2   :  { %s9486_s11 = smov 0   ;;  %s9488_s12 = smov 0  }
   0x3 LB: > { %s9503_s13 = sadd.s32 4294967295, %s9422_s12   ;;  %s7332_s14 = sadd.s32 4294967294, %s9422_s12   ;;  %s9422_s12 = sphi %s9488_s12, %s11672_s12   ;;  %s9418_s11 = sphi %s9486_s11, %s11671_s11   ;;  %s9414_s10 = sphi %s9484_s10, %s11670_s10   ;;  %s9410_s30 = sphi %s9482_s30, %s11669_s30  }
   0x4   : > { %s9507_s15 = sadd.s32 1, %s9422_s12   ;;  %s223_s16 = sadd.s32 1, %s9418_s11 }
   0x5   : > { %s220_s17 = ssub.s32 %s9422_s12, %s9507_s15  ;;  %p233_p0 = scmp.ne.s32.totalorder %s9418_s11, %s9414_s10 }
   0x6   : > { %p221_p1 = scmp.eq.s32.totalorder %s220_s17, 0  ;;  %p234_p2 = scmp.eq.s32.totalorder %s9503_s13, 1 }
   0x7   : > { %p239_p3 = scmp.ne.s32.totalorder %s9414_s10, %s9410_s30  ;;  %p240_p4 = scmp.eq.s32.totalorder %s7332_s14, 1 }
   0x8   : > { %s9518_s18 = scalar_select %p221_p1, %s9418_s11, %s223_s16  }
   0x9   : > { %p9520_p5 = por %p234_p2, %p233_p0  ;;  %p9524_p6 = por %p240_p4, %p239_p3 }
   0xa   : > { %p7335_p7 = scmp.ge.s32.totalorder %s9422_s12, 1  ;;  %p290_p8 = scmp.lt.s32.totalorder %s9422_s12, 3 }
   0xc   : > { %p291_p9 = pnand %p7335_p7, %p290_p8 }
   0xd   : > { %p325_p10 = scmp.lt.s32.totalorder (!%p291_p9), %s9503_s13, 1  ;;  %s9426_s28 = smov (!%p291_p9), 32  }
   0xe   : > { %294 = sbr.rel (%p291_p9) target bundleno = 2346 (0x92a), region = 56  ;;  %s9427_s29 = smov (!%p291_p9), 64  }
   0xf   : > { %s9428_s22 = smov (!%p291_p9), 96   ;;  %s8080_s17 = sshll.u32 (!%p291_p9), %s9503_s13, 4 }
  0x10   : > { %s7275_s26 = scalar_lea.hbm (!%p291_p9), %s11666_s9, %s8080_s17 }
  0x13   : > { %v9113_v0 = vld [vmem:[%s11658_s1] sm:$0x1f]   ;;  %vm986_vm0 = vcmask 1043456   ;;  %vm987_vm1 = vcmask 1044480   ;;  %v9424_v1 = vmov 65535   ;;  %s326_s23 = scalar_select %p325_p10, %s9503_s13, 1 }
  0x14   : > { %v988_v2 = vsel %vm986_vm0, 4294967295, %v9424_v1  ;;  %vm793_vm2 = vcmask 72704   ;;  %vm1730_vm3 = vcmask 261120   ;;  %v9425_v28 = vmov 0.0  }
  0x15   : > { %v989_v3 = vsel %vm987_vm1, %v988_v2, 0  ;;  %s8083_s24 = sshll.u32 %s326_s23, 9  ;;  %1954 = vst.msk [vmem:[#allocation2] sm:$0xff] %vm1730_vm3, %v9425_v28  ;;  %1955 = vst.msk [vmem:[#allocation2 + $0x8] sm:$0xff] %vm1730_vm3, %v9425_v28  ;;  %vm1956_vm4 = vcmask 254976   ;;  %vm2202_vm5 = vcmask 257024  }
  0x16   : > { %v991_v4 = vand.u32 %v9113_v0, %v989_v3  ;;  %s9538_s27 = scalar_lea.vmem %s11657_s0, %s8083_s24  ;;  %1958 = vst.msk [vmem:[#allocation2 + $0x18] sm:$0xff] %vm1730_vm3, %v9425_v28  ;;  %1959 = vst.msk [vmem:[#allocation2 + $0x20] sm:$0xff] %vm1730_vm3, %v9425_v28  ;;  %vm2459_vm6 = vcmask 519424   ;;  %vm2716_vm7 = vcmask 781824   ;;  %vm2973_vm8 = vcmask 1044224  }
  0x17   : > { %v9114_v5 = vld [vmem:[%s9538_s27] sm:$0xff]   ;;  %v9115_v6 = vld [vmem:[%s9538_s27 + $0x8] sm:$0xff]   ;;  %v9116_v7 = vld [vmem:[%s9538_s27 + $0x10] sm:$0xff]   ;;  %1961 = vst.msk [vmem:[#allocation2 + $0x30] sm:$0xff] %vm1730_vm3, %v9425_v28  ;;  %vm5032_vm9 = vcmask 523264   ;;  %vm5089_vm10 = vcmask 517120  }
  0x18   : > { %8854 = vmatprep.subr.bf16.mxu0 %v991_v4  ;;  %8856 = vmatprep.mubr.msk.bf16.mxu0 %vm793_vm2, %v9114_v5  ;;  %v9117_v8 = vld [vmem:[%s9538_s27 + $0x18] sm:$0xff]   ;;  %v9118_v9 = vld [vmem:[%s9538_s27 + $0x20] sm:$0xff]   ;;  %v9119_v10 = vld [vmem:[%s9538_s27 + $0x28] sm:$0xff]   ;;  %1962 = vst.msk [vmem:[#allocation2 + $0x38] sm:$0xff] %vm1730_vm3, %v9425_v28  ;;  %vm5158_vm11 = vcmask 519168   ;;  %vm5223_vm12 = vcmask 1043968  }
  0x19   : > { %8855 = vmatpush3.bf16.msra.mxu0 %v991_v4  ;;  %v9120_v11 = vld [vmem:[%s9538_s27 + $0x30] sm:$0xff]   ;;  %v9121_v12 = vld [vmem:[%s9538_s27 + $0x38] sm:$0xff]   ;;  %v9122_v13 = vld [vmem:[%s9538_s27 + $0x40] sm:$0xff]   ;;  %1964 = vst.msk [vmem:[#allocation2 + $0x48] sm:$0xff] %vm1730_vm3, %v9425_v28  ;;  %vm9429_vm13 = vmmov 0   ;;  %vm7251_vm14 = vcmask 73728  }
  0x1a   : > { %v9123_v14 = vld [vmem:[%s9538_s27 + $0x48] sm:$0xff]   ;;  %v9124_v15 = vld [vmem:[%s9538_s27 + $0x50] sm:$0xff]   ;;  %v9125_v16 = vld [vmem:[%s9538_s27 + $0x58] sm:$0xff]   ;;  %1965 = vst.msk [vmem:[#allocation2 + $0x50] sm:$0xff] %vm1730_vm3, %v9425_v28 }
  0x1b   : > { %v9126_v17 = vld [vmem:[%s9538_s27 + $0x60] sm:$0xff]   ;;  %v9127_v18 = vld [vmem:[%s9538_s27 + $0x68] sm:$0xff]   ;;  %v9128_v19 = vld [vmem:[%s9538_s27 + $0x70] sm:$0xff]   ;;  %1967 = vst.msk [vmem:[#allocation2 + $0x60] sm:$0xff] %vm1730_vm3, %v9425_v28 }
  0x1c   : > { %8857 = vmatmul.mubr.msk.bf16.vlgmr.msra.gmra.mxu0 %vm793_vm2, %v9115_v6  ;;  %v9129_v20 = vld [vmem:[%s9538_s27 + $0x78] sm:$0xff]   ;;  %v9130_v21 = vld [vmem:[%s9538_s27 + $0x80] sm:$0xff]   ;;  %v9131_v22 = vld [vmem:[%s9538_s27 + $0x88] sm:$0xff]   ;;  %1968 = vst.msk [vmem:[#allocation2 + $0x68] sm:$0xff] %vm1730_vm3, %v9425_v28 }
  0x1d   : > { %8860 = vmatprep.mubr.msk.bf16.mxu0 %vm793_vm2, %v9116_v7  ;;  %v9132_v23 = vld [vmem:[%s9538_s27 + $0x90] sm:$0xff]   ;;  %v9133_v24 = vld [vmem:[%s9538_s27 + $0x98] sm:$0xff]   ;;  %v9134_v25 = vld [vmem:[%s9538_s27 + $0xa0] sm:$0xff]   ;;  %1970 = vst.msk [vmem:[#allocation2 + $0x78] sm:$0xff] %vm1730_vm3, %v9425_v28 }
  0x1e   : > { %v9135_v26 = vld [vmem:[%s9538_s27 + $0xa8] sm:$0xff]   ;;  %v9136_v27 = vld [vmem:[%s9538_s27 + $0xb0] sm:$0xff]   ;;  %1971 = vst.msk [vmem:[#allocation2 + $0x80] sm:$0xff] %vm1730_vm3, %v9425_v28  ;;  %1973 = vst.msk [vmem:[#allocation2 + $0x90] sm:$0xff] %vm1730_vm3, %v9425_v28 }
  0x1f   : > { %1974 = vst.msk [vmem:[#allocation2 + $0x98] sm:$0xff] %vm1730_vm3, %v9425_v28  ;;  %1976 = vst.msk [vmem:[#allocation2 + $0xa8] sm:$0xff] %vm1730_vm3, %v9425_v28  ;;  %v9137_v29 = vld [vmem:[%s9538_s27 + $0xb8] sm:$0xff]   ;;  %v9138_v30 = vld [vmem:[%s9538_s27 + $0xc0] sm:$0xff]  }
  0x20   : > { %1977 = vst.msk [vmem:[#allocation2 + $0xb0] sm:$0xff] %vm1730_vm3, %v9425_v28  ;;  %1979 = vst.msk [vmem:[#allocation2 + $0xc0] sm:$0xff] %vm1730_vm3, %v9425_v28  ;;  %v2235_v31 = vld [vmem:[#allocation2 + $0x1] sm:$0xff]  ;;  %v9140_v36 = vld [vmem:[%s9538_s27 + $0xd0] sm:$0xff]  }
  0x21   : > { %1980 = vst.msk [vmem:[#allocation2 + $0xc8] sm:$0xff] %vm1730_vm3, %v9425_v28  ;;  %1982 = vst.msk [vmem:[#allocation2 + $0xd8] sm:$0xff] %vm1730_vm3, %v9425_v28  ;;  %v8116_v32 = vpack.c.bf16 %v2235_v31, %v2235_v31  ;;  %v9139_v34 = vld [vmem:[%s9538_s27 + $0xc8] sm:$0xff]   ;;  %v9141_v43 = vld [vmem:[%s9538_s27 + $0xd8] sm:$0xff]  }
  0x22   : > { %1983 = vst.msk [vmem:[#allocation2 + $0xe0] sm:$0xff] %vm1730_vm3, %v9425_v28  ;;  %1985 = vst.msk [vmem:[#allocation2 + $0xf0] sm:$0xff] %vm1730_vm3, %v9425_v28  ;;  %v2492_v37 = vld [vmem:[#allocation2 + $0x2] sm:$0xff]  ;;  %v9144_v46 = vld [vmem:[%s9538_s27 + $0xf0] sm:$0xff]  }
  0x23   : > { %1986 = vst.msk [vmem:[#allocation2 + $0xf8] sm:$0xff] %vm1730_vm3, %v9425_v28  ;;  %1988 = vst.msk [vmem:[#allocation2 + $0x108] sm:$0xff] %vm1730_vm3, %v9425_v28  ;;  %2363 = vrot.lane.b32.xlu0 %v8116_v32, %s9426_s28  ;;  %v8148_v38 = vpack.c.bf16 %v2492_v37, %v2492_v37  ;;  %v9142_v44 = vld [vmem:[%s9538_s27 + $0xe0] sm:$0xff]   ;;  %v9143_v45 = vld [vmem:[%s9538_s27 + $0xe8] sm:$0xff]  }
  0x24   : > { %8861 = vmatmul.mubr.msk.bf16.gmra.mxu0 %vm793_vm2, %v9117_v8  ;;  %1989 = vst.msk [vmem:[#allocation2 + $0x110] sm:$0xff] %vm1730_vm3, %v9425_v28  ;;  %1991 = vst.msk [vmem:[#allocation2 + $0x120] sm:$0xff] %vm1730_vm3, %v9425_v28  ;;  %v9145_v47 = vld [vmem:[%s9538_s27 + $0xf8] sm:$0xff]   ;;  %v9146_v48 = vld [vmem:[%s9538_s27 + $0x100] sm:$0xff]  }
  0x25   : > { %8864 = vmatprep.mubr.msk.bf16.mxu0 %vm793_vm2, %v9118_v9  ;;  %1992 = vst.msk [vmem:[#allocation2 + $0x128] sm:$0xff] %vm1730_vm3, %v9425_v28  ;;  %1994 = vst.msk [vmem:[#allocation2 + $0x138] sm:$0xff] %vm1730_vm3, %v9425_v28  ;;  %v9147_v49 = vld [vmem:[%s9538_s27 + $0x108] sm:$0xff]   ;;  %v9148_v50 = vld [vmem:[%s9538_s27 + $0x110] sm:$0xff]  }
  0x26   : > { %1995 = vst.msk [vmem:[#allocation2 + $0x140] sm:$0xff] %vm1730_vm3, %v9425_v28  ;;  %1997 = vst.msk [vmem:[#allocation2 + $0x150] sm:$0xff] %vm1730_vm3, %v9425_v28  ;;  %v9149_v51 = vld [vmem:[%s9538_s27 + $0x118] sm:$0xff]   ;;  %v9150_v52 = vld [vmem:[%s9538_s27 + $0x120] sm:$0xff]  }
  0x27   : > { %1998 = vst.msk [vmem:[#allocation2 + $0x158] sm:$0xff] %vm1730_vm3, %v9425_v28  ;;  %2000 = vst.msk [vmem:[#allocation2 + $0x168] sm:$0xff] %vm1730_vm3, %v9425_v28  ;;  %v9151_v53 = vld [vmem:[%s9538_s27 + $0x128] sm:$0xff]   ;;  %v9152_v54 = vld [vmem:[%s9538_s27 + $0x130] sm:$0xff]  }
  0x28   : > { %2001 = vst.msk [vmem:[#allocation2 + $0x170] sm:$0xff] %vm1730_vm3, %v9425_v28  ;;  %2003 = vst.msk [vmem:[#allocation2 + $0x180] sm:$0xff] %vm1730_vm3, %v9425_v28  ;;  %v9153_v55 = vld [vmem:[%s9538_s27 + $0x138] sm:$0xff]   ;;  %v9154_v56 = vld [vmem:[%s9538_s27 + $0x140] sm:$0xff]  }
  0x29   : > { %2004 = vst.msk [vmem:[#allocation2 + $0x188] sm:$0xff] %vm1730_vm3, %v9425_v28  ;;  %2006 = vst.msk [vmem:[#allocation2 + $0x198] sm:$0xff] %vm1730_vm3, %v9425_v28  ;;  %v9155_v57 = vld [vmem:[%s9538_s27 + $0x148] sm:$0xff]   ;;  %v9156_v58 = vld [vmem:[%s9538_s27 + $0x150] sm:$0xff]  }
  0x2a   : > { %2007 = vst.msk [vmem:[#allocation2 + $0x1a0] sm:$0xff] %vm1730_vm3, %v9425_v28  ;;  %6251 = vst.msk [vmem:[#allocation4] sm:$0xff] %vm1730_vm3, %v9425_v28  ;;  %v9157_v59 = vld [vmem:[%s9538_s27 + $0x158] sm:$0xff]   ;;  %v9158_v60 = vld [vmem:[%s9538_s27 + $0x160] sm:$0xff]  }
  0x2b   : > { %6253 = vst.msk [vmem:[#allocation4 + $0x10] sm:$0xff] %vm1730_vm3, %v9425_v28  ;;  %6255 = vst.msk [vmem:[#allocation4 + $0x20] sm:$0xff] %vm1730_vm3, %v9425_v28  ;;  %v9159_v61 = vld [vmem:[%s9538_s27 + $0x168] sm:$0xff]   ;;  %v9160_v62 = vld [vmem:[%s9538_s27 + $0x170] sm:$0xff]  }
  0x2c   : > { %8865 = vmatmul.mubr.msk.bf16.gmra.mxu0 %vm793_vm2, %v9119_v10  ;;  %6257 = vst.msk [vmem:[#allocation4 + $0x30] sm:$0xff] %vm1730_vm3, %v9425_v28  ;;  %6259 = vst.msk [vmem:[#allocation4 + $0x40] sm:$0xff] %vm1730_vm3, %v9425_v28  ;;  %v9161_v63 = vld [vmem:[%s9538_s27 + $0x178] sm:$0xff]   ;;  %v9162_v0 = vld [vmem:[%s9538_s27 + $0x180] sm:$0xff]  }
  0x2d   : > { %8868 = vmatprep.mubr.msk.bf16.mxu0 %vm793_vm2, %v9120_v11  ;;  %6261 = vst.msk [vmem:[#allocation4 + $0x50] sm:$0xff] %vm1730_vm3, %v9425_v28  ;;  %6263 = vst.msk [vmem:[#allocation4 + $0x60] sm:$0xff] %vm1730_vm3, %v9425_v28  ;;  %v9163_v1 = vld [vmem:[%s9538_s27 + $0x188] sm:$0xff]   ;;  %v9164_v2 = vld [vmem:[%s9538_s27 + $0x190] sm:$0xff]  }
  0x2e   : > { %6265 = vst.msk [vmem:[#allocation4 + $0x70] sm:$0xff] %vm1730_vm3, %v9425_v28  ;;  %6267 = vst.msk [vmem:[#allocation4 + $0x80] sm:$0xff] %vm1730_vm3, %v9425_v28  ;;  %v9798_v5 = vld [vmem:[%s11659_s2] ss:$0 sm:$0xff]  ;;  %v9165_v7 = vld [vmem:[%s9538_s27 + $0x198] sm:$0xff]  }
  0x2f   : > { %6269 = vst.msk [vmem:[#allocation4 + $0x90] sm:$0xff] %vm1730_vm3, %v9425_v28  ;;  %v9166_v8 = vld [vmem:[%s9538_s27 + $0x1a0] sm:$0xff]   ;;  %v2043_v31 = vld [vmem:[#allocation2 + $0x8] sm:$0xff] }
  0x30   : > { %1957 = vst.msk [vmem:[#allocation2 + $0x10] sm:$0x3] %vm1956_vm4, %v9425_v28  ;;  %1960 = vst.msk [vmem:[#allocation2 + $0x28] sm:$0x3] %vm1956_vm4, %v9425_v28  ;;  %v3485_v41 = vld [vmem:[#allocation2 + $0x198] sm:$0xff] }
  0x31   : > { %1963 = vst.msk [vmem:[#allocation2 + $0x40] sm:$0x3] %vm1956_vm4, %v9425_v28  ;;  %1966 = vst.msk [vmem:[#allocation2 + $0x58] sm:$0x3] %vm1956_vm4, %v9425_v28  ;;  %v8306_v42 = vpack.c.bf16 %v3485_v41, %v3485_v41 }
  0x32   : > { %1969 = vst.msk [vmem:[#allocation2 + $0x70] sm:$0x3] %vm1956_vm4, %v9425_v28  ;;  %1972 = vst.msk [vmem:[#allocation2 + $0x88] sm:$0x3] %vm1956_vm4, %v9425_v28 }
  0x33   : > { %1975 = vst.msk [vmem:[#allocation2 + $0xa0] sm:$0x3] %vm1956_vm4, %v9425_v28  ;;  %1978 = vst.msk [vmem:[#allocation2 + $0xb8] sm:$0x3] %vm1956_vm4, %v9425_v28 }
  0x34   : > { %8869 = vmatmul.mubr.msk.bf16.gmra.mxu0 %vm793_vm2, %v9121_v12  ;;  %1981 = vst.msk [vmem:[#allocation2 + $0xd0] sm:$0x3] %vm1956_vm4, %v9425_v28  ;;  %1984 = vst.msk [vmem:[#allocation2 + $0xe8] sm:$0x3] %vm1956_vm4, %v9425_v28 }
  0x35   : > { %8872 = vmatprep.mubr.msk.bf16.mxu0 %vm793_vm2, %v9122_v13  ;;  %1987 = vst.msk [vmem:[#allocation2 + $0x100] sm:$0x3] %vm1956_vm4, %v9425_v28  ;;  %1990 = vst.msk [vmem:[#allocation2 + $0x118] sm:$0x3] %vm1956_vm4, %v9425_v28 }
  0x36   : > { %1993 = vst.msk [vmem:[#allocation2 + $0x130] sm:$0x3] %vm1956_vm4, %v9425_v28  ;;  %1996 = vst.msk [vmem:[#allocation2 + $0x148] sm:$0x3] %vm1956_vm4, %v9425_v28 }
  0x37   : > { %1999 = vst.msk [vmem:[#allocation2 + $0x160] sm:$0x3] %vm1956_vm4, %v9425_v28  ;;  %2002 = vst.msk [vmem:[#allocation2 + $0x178] sm:$0x3] %vm1956_vm4, %v9425_v28  ;;  %v2236_v33 = vld [vmem:[#allocation2 + $0x9] sm:$0xff] }
  0x38   : > { %2005 = vst.msk [vmem:[#allocation2 + $0x190] sm:$0x3] %vm1956_vm4, %v9425_v28  ;;  %2008 = vst.msk [vmem:[#allocation2 + $0x1a8] sm:$0x3] %vm1956_vm4, %v9425_v28  ;;  %v8117_v35 = vpack.c.bf16 %v2236_v33, %v2236_v33  ;;  %v2493_v39 = vld [vmem:[#allocation2 + $0xa] sm:$0xff]  ;;  %v8085_v33 = vpack.c.bf16 %v2043_v31, %v2043_v31 }
  0x39   : > { %6252 = vst.msk [vmem:[#allocation4 + $0x8] sm:$0x3] %vm1956_vm4, %v9425_v28  ;;  %6254 = vst.msk [vmem:[#allocation4 + $0x18] sm:$0x3] %vm1956_vm4, %v9425_v28  ;;  %v8149_v40 = vpack.c.bf16 %v2493_v39, %v2493_v39 }
  0x3a   : > { %6256 = vst.msk [vmem:[#allocation4 + $0x28] sm:$0x3] %vm1956_vm4, %v9425_v28  ;;  %6258 = vst.msk [vmem:[#allocation4 + $0x38] sm:$0x3] %vm1956_vm4, %v9425_v28  ;;  %2365 = vrot.lane.b32.xlu0 %v8117_v35, %s9426_s28 }
  0x3b   : > { %6260 = vst.msk [vmem:[#allocation4 + $0x48] sm:$0x3] %vm1956_vm4, %v9425_v28  ;;  %6262 = vst.msk [vmem:[#allocation4 + $0x58] sm:$0x3] %vm1956_vm4, %v9425_v28  ;;  %2622 = vrot.lane.b32.xlu1 %v8149_v40, %s9427_s29 }
  0x3c   : > { %8873 = vmatmul.mubr.msk.bf16.gmra.mxu0 %vm793_vm2, %v9123_v14  ;;  %6264 = vst.msk [vmem:[#allocation4 + $0x68] sm:$0x3] %vm1956_vm4, %v9425_v28  ;;  %6266 = vst.msk [vmem:[#allocation4 + $0x78] sm:$0x3] %vm1956_vm4, %v9425_v28  ;;  %v2042_v14 = vld [vmem:[#allocation2] sm:$0xff] }
  0x3d   : > { %8876 = vmatprep.mubr.msk.bf16.mxu0 %vm793_vm2, %v9124_v15  ;;  %6268 = vst.msk [vmem:[#allocation4 + $0x88] sm:$0x3] %vm1956_vm4, %v9425_v28  ;;  %6270 = vst.msk [vmem:[#allocation4 + $0x98] sm:$0x3] %vm1956_vm4, %v9425_v28 }
  0x3e   : > { %2620 = vrot.lane.b32.xlu0 %v8148_v38, %s9427_s29  ;;  %2204 = vst.msk [vmem:[#allocation7 + $0xc] sm:$0xf] %vm2202_vm5, %v8085_v33 }
  0x3f   : > { %5088 = vst.msk [vmem:[#allocation3] sm:$0xff] %vm5032_vm9, %v9425_v28  ;;  %5091 = vst.msk [vmem:[#allocation3 + $0x10] sm:$0xff] %vm5032_vm9, %v9425_v28 }
  0x40   : > { %5093 = vst.msk [vmem:[#allocation3 + $0x20] sm:$0xff] %vm5032_vm9, %v9425_v28  ;;  %5095 = vst.msk [vmem:[#allocation3 + $0x30] sm:$0xff] %vm5032_vm9, %v9425_v28 }
  0x41   : > { %5097 = vst.msk [vmem:[#allocation3 + $0x40] sm:$0xff] %vm5032_vm9, %v9425_v28  ;;  %5099 = vst.msk [vmem:[#allocation3 + $0x50] sm:$0xff] %vm5032_vm9, %v9425_v28 }
  0x42   : > { %3643 = vrot.lane.b32.xlu0 %v8306_v42, %s9427_s29  ;;  %5101 = vst.msk [vmem:[#allocation3 + $0x60] sm:$0xff] %vm5032_vm9, %v9425_v28  ;;  %5103 = vst.msk [vmem:[#allocation3 + $0x70] sm:$0xff] %vm5032_vm9, %v9425_v28 }
  0x43   : > { %5105 = vst.msk [vmem:[#allocation3 + $0x80] sm:$0xff] %vm5032_vm9, %v9425_v28  ;;  %5107 = vst.msk [vmem:[#allocation3 + $0x90] sm:$0xff] %vm5032_vm9, %v9425_v28 }
  0x44   : > { %8877 = vmatmul.mubr.msk.bf16.gmra.mxu0 %vm793_vm2, %v9125_v16  ;;  %v8084_v16 = vpack.c.bf16 %v2042_v14, %v2042_v14  ;;  %5090 = vst.msk [vmem:[#allocation3 + $0x8] sm:$0x3] %vm5089_vm10, %v9425_v28  ;;  %5092 = vst.msk [vmem:[#allocation3 + $0x18] sm:$0x3] %vm5089_vm10, %v9425_v28 }
  0x45   : > { %8880 = vmatprep.mubr.msk.bf16.mxu0 %vm793_vm2, %v9126_v17  ;;  %5094 = vst.msk [vmem:[#allocation3 + $0x28] sm:$0x3] %vm5089_vm10, %v9425_v28  ;;  %5096 = vst.msk [vmem:[#allocation3 + $0x38] sm:$0x3] %vm5089_vm10, %v9425_v28 }
  0x46   : > { %2203 = vst.msk [vmem:[#allocation7] sm:$0xf] %vm2202_vm5, %v8084_v16 }
  0x47   : > { %5098 = vst.msk [vmem:[#allocation3 + $0x48] sm:$0x3] %vm5089_vm10, %v9425_v28  ;;  %5100 = vst.msk [vmem:[#allocation3 + $0x58] sm:$0x3] %vm5089_vm10, %v9425_v28 }
  0x48   : > { %5102 = vst.msk [vmem:[#allocation3 + $0x68] sm:$0x3] %vm5089_vm10, %v9425_v28  ;;  %5104 = vst.msk [vmem:[#allocation3 + $0x78] sm:$0x3] %vm5089_vm10, %v9425_v28 }
  0x49   : > { %5106 = vst.msk [vmem:[#allocation3 + $0x88] sm:$0x3] %vm5089_vm10, %v9425_v28  ;;  %5108 = vst.msk [vmem:[#allocation3 + $0x98] sm:$0x3] %vm5089_vm10, %v9425_v28 }
  0x4c   : > { %8881 = vmatmul.mubr.msk.bf16.gmra.mxu0 %vm793_vm2, %v9127_v18 }
  0x4d   : > { %8884 = vmatprep.mubr.msk.bf16.mxu0 %vm793_vm2, %v9128_v19 }
  0x54   : > { %8885 = vmatmul.mubr.msk.bf16.gmra.mxu0 %vm793_vm2, %v9129_v20 }
  0x55   : > { %8888 = vmatprep.mubr.msk.bf16.mxu0 %vm793_vm2, %v9130_v21 }
  0x5c   : > { %8889 = vmatmul.mubr.msk.bf16.gmra.mxu0 %vm793_vm2, %v9131_v22 }
  0x5d   : > { %8892 = vmatprep.mubr.msk.bf16.mxu0 %vm793_vm2, %v9132_v23 }
  0x64   : > { %8893 = vmatmul.mubr.msk.bf16.gmra.mxu0 %vm793_vm2, %v9133_v24  ;;  %v9167_v24 = vld [vmem:[%s9538_s27 + $0x1a8] sm:$0xff]  }
  0x65   : > { %8896 = vmatprep.mubr.msk.bf16.mxu0 %vm793_vm2, %v9134_v25 }
  0x6c   : > { %8897 = vmatmul.mubr.msk.bf16.gmra.mxu0 %vm793_vm2, %v9135_v26 }
  0x6d   : > { %8900 = vmatprep.mubr.msk.bf16.mxu0 %vm793_vm2, %v9136_v27 }
  0x74   : > { %8901 = vmatmul.mubr.msk.bf16.gmra.mxu0 %vm793_vm2, %v9137_v29 }
  0x75   : > { %8904 = vmatprep.mubr.msk.bf16.mxu0 %vm793_vm2, %v9138_v30  ;;  %v9168_v30 = vld [vmem:[%s9538_s27 + $0x1b0] sm:$0xff]  }
  0x7c   : > { %8905 = vmatmul.mubr.msk.bf16.gmra.mxu0 %vm793_vm2, %v9139_v34 }
  0x7d   : > { %8908 = vmatprep.mubr.msk.bf16.mxu0 %vm793_vm2, %v9140_v36 }
  0x84   : > { %8909 = vmatmul.mubr.msk.bf16.gmra.mxu0 %vm793_vm2, %v9141_v43 }
  0x85   : > { %8912 = vmatprep.mubr.msk.bf16.mxu0 %vm793_vm2, %v9142_v44 }
  0x8c   : > { %8913 = vmatmul.mubr.msk.bf16.gmra.mxu0 %vm793_vm2, %v9143_v45 }
  0x8d   : > { %8916 = vmatprep.mubr.msk.bf16.mxu0 %vm793_vm2, %v9144_v46 }
  0x94   : > { %8917 = vmatmul.mubr.msk.bf16.gmra.mxu0 %vm793_vm2, %v9145_v47  ;;  %v9169_v47 = vld [vmem:[%s9538_s27 + $0x1b8] sm:$0xff]  }
  0x95   : > { %8920 = vmatprep.mubr.msk.bf16.mxu0 %vm793_vm2, %v9146_v48  ;;  %v2364_v21 = vpop.permute.xlu0 %2363  ;;  %v9170_v48 = vld [vmem:[%s9538_s27 + $0x1c0] sm:$0xff]  }
  0x96   : > { %2460 = vst.msk [vmem:[#allocation7] sm:$0xf] %vm2459_vm6, %v2364_v21 }
  0x9c   : > { %8921 = vmatmul.mubr.msk.bf16.gmra.mxu0 %vm793_vm2, %v9147_v49 }
  0x9d   : > { %8924 = vmatprep.mubr.msk.bf16.mxu0 %vm793_vm2, %v9148_v50 }
  0xa4   : > { %8925 = vmatmul.mubr.msk.bf16.gmra.mxu0 %vm793_vm2, %v9149_v51 }
  0xa5   : > { %8928 = vmatprep.mubr.msk.bf16.mxu0 %vm793_vm2, %v9150_v52 }
  0xac   : > { %8929 = vmatmul.mubr.msk.bf16.gmra.mxu0 %vm793_vm2, %v9151_v53  ;;  %v2366_v38 = vpop.permute.xlu0 %2365 }
  0xad   : > { %8932 = vmatprep.mubr.msk.bf16.mxu0 %vm793_vm2, %v9152_v54  ;;  %2461 = vst.msk [vmem:[#allocation7 + $0xc] sm:$0xf] %vm2459_vm6, %v2366_v38  ;;  %v2623_v49 = vpop.permute.xlu1 %2622 }
  0xae   : > { %2718 = vst.msk [vmem:[#allocation7 + $0xc] sm:$0xf] %vm2716_vm7, %v2623_v49 }
  0xb0   : > { %v2621_v45 = vpop.permute.xlu0 %2620 }
  0xb1   : > { %2717 = vst.msk [vmem:[#allocation7] sm:$0xf] %vm2716_vm7, %v2621_v45 }
  0xb4   : > { %8933 = vmatmul.mubr.msk.bf16.gmra.mxu0 %vm793_vm2, %v9153_v55 }
  0xb5   : > { %8936 = vmatprep.mubr.msk.bf16.mxu0 %vm793_vm2, %v9154_v56 }
  0xbc   : > { %8937 = vmatmul.mubr.msk.bf16.gmra.mxu0 %vm793_vm2, %v9155_v57 }
  0xbd   : > { %8940 = vmatprep.mubr.msk.bf16.mxu0 %vm793_vm2, %v9156_v58 }
  0xc4   : > { %8941 = vmatmul.mubr.msk.bf16.gmra.mxu0 %vm793_vm2, %v9157_v59 }
  0xc5   : > { %8944 = vmatprep.mubr.msk.bf16.mxu0 %vm793_vm2, %v9158_v60 }
  0xcc   : > { %8945 = vmatmul.mubr.msk.bf16.gmra.mxu0 %vm793_vm2, %v9159_v61 }
  0xcd   : > { %8948 = vmatprep.mubr.msk.bf16.mxu0 %vm793_vm2, %v9160_v62 }
  0xd4   : > { %8949 = vmatmul.mubr.msk.bf16.gmra.mxu0 %vm793_vm2, %v9161_v63 }
  0xd5   : > { %8952 = vmatprep.mubr.msk.bf16.mxu0 %vm793_vm2, %v9162_v0 }
  0xdc   : > { %v8858_v3 = vpop.f32.mrf.mxu0  ;;  %8953 = vmatmul.mubr.msk.bf16.gmra.mxu0 %vm793_vm2, %v9163_v1 }
  0xdd   : > { %8956 = vmatprep.mubr.msk.bf16.mxu0 %vm793_vm2, %v9164_v2  ;;  %v1036_v10 = vadd.f32 %v8858_v3, %v9798_v5 }
  0xde   : > { %v1027_v4 = vpop.f32.mrf.mxu0 }
  0xdf   : > { %v1028_v11 = vadd.f32 %v9798_v5, %v1027_v4  ;;  %v1540_v17 = vmax.f32 %v1036_v10, 0.0  ;;  %v9171_v4 = vld [vmem:[%s9538_s27 + $0x1c8] sm:$0xff]   ;;  %v9172_v10 = vld [vmem:[%s9538_s27 + $0x1d0] sm:$0xff]  }
  0xe0   : > { %v8859_v6 = vpop.f32.mrf.mxu0 }
  0xe1   : > { %v1039_v18 = vadd.f32 %v8859_v6, %v9798_v5  ;;  %v1538_v22 = vmax.f32 %v1028_v11, 0.0 }
  0xe2   : > { %v1030_v9 = vpop.f32.mrf.mxu0 }
  0xe3   : > { %v1031_v25 = vadd.f32 %v9798_v5, %v1030_v9  ;;  %v1541_v34 = vmax.f32 %v1039_v18, 0.0 }
  0xe4   : > { %v8862_v12 = vpop.f32.mrf.mxu0  ;;  %8957 = vmatmul.mubr.msk.bf16.gmra.mxu0 %vm793_vm2, %v9165_v7 }
  0xe5   : > { %v1052_v13 = vadd.f32 %v8862_v12, %v9798_v5  ;;  %8960 = vmatprep.mubr.msk.bf16.mxu0 %vm793_vm2, %v9166_v8  ;;  %v1539_v40 = vmax.f32 %v1031_v25, 0.0  ;;  %v9173_v25 = vld [vmem:[%s9538_s27 + $0x1d8] sm:$0xff]  }
  0xe6   : > { %v1043_v15 = vpop.f32.mrf.mxu0 }
  0xe7   : > { %v1544_v19 = vmax.f32 %v1052_v13, 0.0  ;;  %v1044_v20 = vadd.f32 %v9798_v5, %v1043_v15 }
  0xe8   : > { %v8863_v23 = vpop.f32.mrf.mxu0 }
  0xe9   : > { %v1668_v26 = vmax.f32 %v1540_v17, %v1544_v19  ;;  %v1542_v27 = vmax.f32 %v1044_v20, 0.0  ;;  %v1055_v29 = vadd.f32 %v8863_v23, %v9798_v5 }
  0xea   : > { %v1046_v32 = vpop.f32.mrf.mxu0 }
  0xeb   : > { %1733 = vst.msk [vmem:[#allocation5 + $0x10] sm:$0xff] %vm1730_vm3, %v1668_v26  ;;  %v1666_v35 = vmax.f32 %v1538_v22, %v1542_v27  ;;  %v1545_v36 = vmax.f32 %v1055_v29, 0.0  ;;  %v1047_v37 = vadd.f32 %v9798_v5, %v1046_v32 }
  0xec   : > { %v8866_v39 = vpop.f32.mrf.mxu0  ;;  %8961 = vmatmul.mubr.msk.bf16.gmra.mxu0 %vm793_vm2, %v9167_v24 }
  0xed   : > { %1731 = vst.msk [vmem:[#allocation5] sm:$0xff] %vm1730_vm3, %v1666_v35  ;;  %v1669_v41 = vmax.f32 %v1541_v34, %v1545_v36  ;;  %v1543_v42 = vmax.f32 %v1047_v37, 0.0  ;;  %8964 = vmatprep.mubr.msk.bf16.mxu0 %vm793_vm2, %v9168_v30  ;;  %v1068_v50 = vadd.f32 %v8866_v39, %v9798_v5  ;;  %v9174_v30 = vld [vmem:[%s9538_s27 + $0x1e0] sm:$0xff]  }
  0xee   : > { %v1059_v43 = vpop.f32.mrf.mxu0 }
  0xef   : > { %1734 = vst.msk [vmem:[#allocation5 + $0x18] sm:$0xff] %vm1730_vm3, %v1669_v41  ;;  %v1667_v44 = vmax.f32 %v1539_v40, %v1543_v42  ;;  %v1060_v52 = vadd.f32 %v9798_v5, %v1059_v43  ;;  %v1548_v57 = vmax.f32 %v1068_v50, 0.0  ;;  %v9178_v41 = vld [vmem:[%s11660_s3 + $0x78] sm:$0xff]  }
  0xf0   : > { %v8867_v46 = vpop.f32.mrf.mxu0  ;;  %8581 = vmatprep.subr.bf16.mxu1 %v9178_v41 }
  0xf1   : > { %1732 = vst.msk [vmem:[#allocation5 + $0x8] sm:$0xff] %vm1730_vm3, %v1667_v44  ;;  %v1071_v60 = vadd.f32 %v8867_v46, %v9798_v5  ;;  %v1546_v1 = vmax.f32 %v1060_v52, 0.0  ;;  %v9179_v44 = vld [vmem:[%s11660_s3 + $0x38] sm:$0xff]  }
  0xf2   : > { %v1062_v51 = vpop.f32.mrf.mxu0  ;;  %8582 = vmatpush3.bf16.msra.mxu1 %v9179_v44 }
  0xf3   : > { %v1063_v2 = vadd.f32 %v9798_v5, %v1062_v51  ;;  %v1549_v12 = vmax.f32 %v1071_v60, 0.0 }
  0xf4   : > { %v8870_v53 = vpop.f32.mrf.mxu0  ;;  %8965 = vmatmul.mubr.msk.bf16.gmra.mxu0 %vm793_vm2, %v9169_v47 }
  0xf5   : > { %v1084_v54 = vadd.f32 %v8870_v53, %v9798_v5  ;;  %8968 = vmatprep.mubr.msk.bf16.mxu0 %vm793_vm2, %v9170_v48  ;;  %v1547_v17 = vmax.f32 %v1063_v2, 0.0  ;;  %v9175_v53 = vld [vmem:[%s9538_s27 + $0x1e8] sm:$0xff]  }
  0xf6   : > { %v1797_v55 = vld [vmem:[#allocation5 + $0x10] ss:$2 sm:$0xff]  ;;  %v1861_v56 = vld [vmem:[#allocation5 + $0x11] ss:$2 sm:$0xff]  ;;  %v1075_v58 = vpop.f32.mrf.mxu0 }
  0xf7   : > { %v1923_v59 = vmax.f32 %v1797_v55, %v1861_v56  ;;  %v1552_v61 = vmax.f32 %v1084_v54, 0.0  ;;  %v1076_v62 = vadd.f32 %v9798_v5, %v1075_v58 }
  0xf8   : > { %v1795_v63 = vld [vmem:[#allocation5] ss:$2 sm:$0xff]  ;;  %v1859_v0 = vld [vmem:[#allocation5 + $0x1] ss:$2 sm:$0xff]  ;;  %v8871_v3 = vpop.f32.mrf.mxu0 }
  0xf9   : > { %v1922_v6 = vmax.f32 %v1795_v63, %v1859_v0  ;;  %v1672_v7 = vmax.f32 %v1548_v57, %v1552_v61  ;;  %v1550_v8 = vmax.f32 %v1076_v62, 0.0  ;;  %v1087_v9 = vadd.f32 %v8871_v3, %v9798_v5  ;;  %2011 = vst.msk [vmem:[#allocation2 + $0x21] sm:$0xff] %vm1730_vm3, %v1923_v59  ;;  %v9180_v59 = vld [vmem:[%s11660_s3 + $0x70] sm:$0xff]  }
  0xfa   : > { %v1078_v11 = vpop.f32.mrf.mxu0  ;;  %v9176_v0 = vld [vmem:[%s9538_s27 + $0x1f0] sm:$0xff]   ;;  %8583 = vmatprep.subr.bf16.mxu1 %v9180_v59 }
  0xfb   : > { %1737 = vst.msk [vmem:[#allocation5 + $0x30] sm:$0xff] %vm1730_vm3, %v1672_v7  ;;  %v1670_v13 = vmax.f32 %v1546_v1, %v1550_v8  ;;  %2010 = vst.msk [vmem:[#allocation2 + $0x19] sm:$0xff] %vm1730_vm3, %v1922_v6  ;;  %v1553_v14 = vmax.f32 %v1087_v9, 0.0  ;;  %v1079_v15 = vadd.f32 %v9798_v5, %v1078_v11  ;;  %v9181_v1 = vld [vmem:[%s11660_s3 + $0x30] sm:$0xff]   ;;  %v9182_v9 = vld [vmem:[%s11660_s3 + $0x68] sm:$0xff]  }
  0xfc   : > { %v8874_v16 = vpop.f32.mrf.mxu0  ;;  %8969 = vmatmul.mubr.msk.bf16.gmra.mxu0 %vm793_vm2, %v9171_v4  ;;  %8584 = vmatpush3.bf16.msra.mxu1 %v9181_v1 }
  0xfd   : > { %1735 = vst.msk [vmem:[#allocation5 + $0x20] sm:$0xff] %vm1730_vm3, %v1670_v13  ;;  %v1673_v18 = vmax.f32 %v1549_v12, %v1553_v14  ;;  %v1551_v19 = vmax.f32 %v1079_v15, 0.0  ;;  %8972 = vmatprep.mubr.msk.bf16.mxu0 %vm793_vm2, %v9172_v10  ;;  %v1100_v26 = vadd.f32 %v8874_v16, %v9798_v5  ;;  %v9183_v13 = vld [vmem:[%s11660_s3 + $0x28] sm:$0xff]   ;;  %8585 = vmatprep.subr.bf16.mxu1 %v9182_v9 }
  0xfe   : > { %v1091_v20 = vpop.f32.mrf.mxu0 }
  0xff   : > { %1738 = vst.msk [vmem:[#allocation5 + $0x38] sm:$0xff] %vm1730_vm3, %v1673_v18  ;;  %v1671_v21 = vmax.f32 %v1547_v17, %v1551_v19  ;;  %v1092_v34 = vadd.f32 %v9798_v5, %v1091_v20  ;;  %v1556_v42 = vmax.f32 %v1100_v26, 0.0  ;;  %v9177_v18 = vld [vmem:[%s9538_s27 + $0x1f8] sm:$0xff]   ;;  %v9184_v20 = vld [vmem:[%s11660_s3 + $0x60] sm:$0xff]   ;;  %s9431_s27 = smov [#allocation10]  }
 0x100   : > { %v8875_v22 = vpop.f32.mrf.mxu0  ;;  %v3199_v23 = vld [vmem:[#allocation2 + $0x22] sm:$0xff]  ;;  %8586 = vmatpush3.bf16.msra.mxu1 %v9183_v13 }
 0x101   : > { %v2238_v24 = vld [vmem:[#allocation2 + $0x21] sm:$0xff]  ;;  %1736 = vst.msk [vmem:[#allocation5 + $0x28] sm:$0xff] %vm1730_vm3, %v1671_v21  ;;  %v8245_v27 = vpack.c.bf16 %v3199_v23, %v3199_v23  ;;  %v1103_v38 = vadd.f32 %v8875_v22, %v9798_v5  ;;  %v1554_v49 = vmax.f32 %v1092_v34, 0.0  ;;  %8587 = vmatprep.subr.bf16.mxu1 %v9184_v20 }
 0x102   : > { %v8119_v29 = vpack.c.bf16 %v2238_v24, %v2238_v24  ;;  %v1094_v31 = vpop.f32.mrf.mxu0  ;;  %v2749_v32 = vld [vmem:[#allocation2 + $0x18] sm:$0xff]  ;;  %v2750_v37 = vld [vmem:[#allocation2 + $0x20] sm:$0xff] }
 0x103   : > { %v2237_v33 = vld [vmem:[#allocation2 + $0x19] sm:$0xff]  ;;  %3328 = vrot.lane.b32.xlu1 %v8245_v27, %s9426_s28  ;;  %v8180_v35 = vpack.c.bf16 %v2749_v32, %v2749_v32  ;;  %v9855_v40 = vpack.c.bf16 %v2750_v37, %v2750_v37  ;;  %v1557_v56 = vmax.f32 %v1103_v38, 0.0  ;;  %v1095_v57 = vadd.f32 %v9798_v5, %v1094_v31 }
 0x104   : > { %v8118_v36 = vpack.c.bf16 %v2237_v33, %v2237_v33  ;;  %3167 = vst.msk [vmem:[#allocation7 + $0x10] sm:$0xf] %vm2202_vm5, %v8119_v29  ;;  %v8878_v39 = vpop.f32.mrf.mxu0  ;;  %8973 = vmatmul.mubr.msk.bf16.gmra.mxu0 %vm793_vm2, %v9173_v25  ;;  %v2494_v52 = vld [vmem:[#allocation2 + $0x1a] sm:$0xff] }
 0x105   : > { %v1116_v43 = vadd.f32 %v8878_v39, %v9798_v5  ;;  %2877 = vrot.lane.b32.xlu0 %v8180_v35, %s9428_s22  ;;  %8976 = vmatprep.mubr.msk.bf16.mxu0 %vm793_vm2, %v9174_v30  ;;  %2205 = vst.msk [vmem:[#allocation7 + $0x18] sm:$0xf] %vm2202_vm5, %v8180_v35  ;;  %2206 = vst.msk [vmem:[#allocation7 + $0x24] sm:$0xf] %vm2202_vm5, %v9855_v40  ;;  %v8150_v7 = vpack.c.bf16 %v2494_v52, %v2494_v52  ;;  %v1555_v10 = vmax.f32 %v1095_v57, 0.0  ;;  %v9185_v21 = vld [vmem:[%s11660_s3 + $0x20] sm:$0xff]  }
 0x106   : > { %3166 = vst.msk [vmem:[#allocation7 + $0x4] sm:$0xf] %vm2202_vm5, %v8118_v36  ;;  %v1801_v45 = vld [vmem:[#allocation5 + $0x30] ss:$2 sm:$0xff]  ;;  %v1865_v46 = vld [vmem:[#allocation5 + $0x31] ss:$2 sm:$0xff]  ;;  %v1107_v47 = vpop.f32.mrf.mxu0  ;;  %8588 = vmatpush3.bf16.msra.mxu1 %v9185_v21 }
 0x107   : > { %v1925_v48 = vmax.f32 %v1801_v45, %v1865_v46  ;;  %v1560_v50 = vmax.f32 %v1116_v43, 0.0  ;;  %v1108_v51 = vadd.f32 %v9798_v5, %v1107_v47  ;;  %2369 = vrot.lane.b32.xlu1 %v8119_v29, %s9426_s28  ;;  %v9187_v45 = vld [vmem:[%s11660_s3 + $0x18] sm:$0xff]  }
 0x108   : > { %v1799_v54 = vld [vmem:[#allocation5 + $0x20] ss:$2 sm:$0xff]  ;;  %v1863_v55 = vld [vmem:[#allocation5 + $0x21] ss:$2 sm:$0xff]  ;;  %v8879_v58 = vpop.f32.mrf.mxu0 }
 0x109   : > { %2013 = vst.msk [vmem:[#allocation2 + $0x39] sm:$0xff] %vm1730_vm3, %v1925_v48  ;;  %v1924_v60 = vmax.f32 %v1799_v54, %v1863_v55  ;;  %v1676_v61 = vmax.f32 %v1556_v42, %v1560_v50  ;;  %v1558_v62 = vmax.f32 %v1108_v51, 0.0  ;;  %v1119_v63 = vadd.f32 %v8879_v58, %v9798_v5  ;;  %2367 = vrot.lane.b32.xlu0 %v8118_v36, %s9426_s28 }
 0x10a   : > { %v1110_v2 = vpop.f32.mrf.mxu0 }
 0x10b   : > { %2012 = vst.msk [vmem:[#allocation2 + $0x31] sm:$0xff] %vm1730_vm3, %v1924_v60  ;;  %1741 = vst.msk [vmem:[#allocation5 + $0x50] sm:$0xff] %vm1730_vm3, %v1676_v61  ;;  %v1674_v3 = vmax.f32 %v1554_v49, %v1558_v62  ;;  %v1561_v4 = vmax.f32 %v1119_v63, 0.0  ;;  %v1111_v6 = vadd.f32 %v9798_v5, %v1110_v2  ;;  %2626 = vrot.lane.b32.xlu1 %v8245_v27, %s9427_s29 }
 0x10c   : > { %v8882_v8 = vpop.f32.mrf.mxu0  ;;  %8977 = vmatmul.mubr.msk.bf16.gmra.mxu0 %vm793_vm2, %v9175_v53 }
 0x10d   : > { %1739 = vst.msk [vmem:[#allocation5 + $0x40] sm:$0xff] %vm1730_vm3, %v1674_v3  ;;  %v1677_v11 = vmax.f32 %v1557_v56, %v1561_v4  ;;  %v1559_v12 = vmax.f32 %v1111_v6, 0.0  ;;  %2624 = vrot.lane.b32.xlu0 %v8150_v7, %s9427_s29  ;;  %8980 = vmatprep.mubr.msk.bf16.mxu0 %vm793_vm2, %v9176_v0  ;;  %v9902_v16 = vadd.f32 %v8882_v8, %v9798_v5  ;;  %v9188_v3 = vld [vmem:[%s11660_s3 + $0x50] sm:$0xff]  }
 0x10e   : > { %v1123_v14 = vpop.f32.mrf.mxu0 }
 0x10f   : > { %1742 = vst.msk [vmem:[#allocation5 + $0x58] sm:$0xff] %vm1730_vm3, %v1677_v11  ;;  %v1675_v15 = vmax.f32 %v1555_v10, %v1559_v12  ;;  %3326 = vrot.lane.b32.xlu1 %v8150_v7, %s9426_s28  ;;  %v9913_v23 = vadd.f32 %v9798_v5, %v1123_v14  ;;  %v1564_v34 = vmax.f32 %v9902_v16, 0.0  ;;  %v9189_v7 = vld [vmem:[%s11660_s3 + $0x10] sm:$0xff]  }
 0x110   : > { %v8883_v17 = vpop.f32.mrf.mxu0  ;;  %v3009_v19 = vld [vmem:[#allocation2 + $0x39] sm:$0xff] }
 0x111   : > { %1740 = vst.msk [vmem:[#allocation5 + $0x48] sm:$0xff] %vm1730_vm3, %v1675_v15  ;;  %v3968_v22 = vld [vmem:[#allocation2 + $0x3a] sm:$0xff]  ;;  %v8215_v27 = vpack.c.bf16 %v3009_v19, %v3009_v19  ;;  %v9921_v35 = vadd.f32 %v8883_v17, %v9798_v5  ;;  %v1562_v50 = vmax.f32 %v9913_v23, 0.0  ;;  %v9190_v15 = vld [vmem:[%s11660_s3 + $0x48] sm:$0xff]  }
 0x112   : > { %v3455_v24 = vld [vmem:[#allocation2 + $0x30] sm:$0xff]  ;;  %v3712_v25 = vld [vmem:[#allocation2 + $0x39] sm:$0xff]  ;;  %v1126_v26 = vpop.f32.mrf.mxu0  ;;  %v8341_v29 = vpack.c.bf16 %v3968_v22, %v3968_v22  ;;  %v9191_v17 = vld [vmem:[%s11660_s3 + $0x8] sm:$0xff]  }
 0x113   : > { %2879 = vrot.lane.b32.xlu1 %v9855_v40, %s9428_s22  ;;  %v9917_v30 = vpack.c.bf16 %v3455_v24, %v3455_v24  ;;  %v3456_v31 = vld [vmem:[#allocation2 + $0x38] sm:$0xff]  ;;  %v2046_v33 = vld [vmem:[#allocation2 + $0x30] sm:$0xff]  ;;  %3169 = vst.msk [vmem:[#allocation7 + $0x28] sm:$0xf] %vm2202_vm5, %v8215_v27  ;;  %v8309_v42 = vpack.c.bf16 %v3712_v25, %v3712_v25  ;;  %v1127_v51 = vadd.f32 %v9798_v5, %v1126_v26  ;;  %v1565_v60 = vmax.f32 %v9921_v35, 0.0  ;;  %v9192_v22 = vld [vmem:[%s11660_s3 + $0x40] sm:$0xff]  }
 0x114   : > { %v3008_v32 = vld [vmem:[#allocation2 + $0x31] sm:$0xff]  ;;  %v8886_v37 = vpop.f32.mrf.mxu0  ;;  %v9923_v38 = vpack.c.bf16 %v3456_v31, %v3456_v31  ;;  %8981 = vmatmul.mubr.msk.bf16.gmra.mxu0 %vm793_vm2, %v9177_v18  ;;  %4128 = vst.msk [vmem:[#allocation7 + $0x14] sm:$0xf] %vm2202_vm5, %v8341_v29  ;;  %v3201_v44 = vld [vmem:[#allocation2 + $0x3a] sm:$0xff]  ;;  %v8088_v46 = vpack.c.bf16 %v2046_v33, %v2046_v33 }
 0x115   : > { %v3711_v36 = vld [vmem:[#allocation2 + $0x31] sm:$0xff]  ;;  %v8214_v39 = vpack.c.bf16 %v3008_v32, %v3008_v32  ;;  %3583 = vrot.lane.b32.xlu0 %v9917_v30, %s9427_s29  ;;  %v1148_v43 = vadd.f32 %v8886_v37, %v9798_v5  ;;  %v8247_v61 = vpack.c.bf16 %v3201_v44, %v3201_v44  ;;  %v1563_v8 = vmax.f32 %v1127_v51, 0.0  ;;  %v9193_v23 = vld [vmem:[%s11660_s3] sm:$0xff]  }
 0x116   : > { %v9186_v40 = vld [vmem:[%s11660_s3 + $0x58] sm:$0xff]   ;;  %v1805_v48 = vld [vmem:[#allocation5 + $0x50] ss:$2 sm:$0xff]  ;;  %v1869_v49 = vld [vmem:[#allocation5 + $0x51] ss:$2 sm:$0xff]  ;;  %v1139_v52 = vpop.f32.mrf.mxu0  ;;  %v9943_v54 = vpack.c.bf16 %v3711_v36, %v3711_v36 }
 0x117   : > { %v3967_v41 = vld [vmem:[#allocation2 + $0x32] sm:$0xff]  ;;  %3168 = vst.msk [vmem:[#allocation7 + $0x1c] sm:$0xf] %vm2202_vm5, %v8214_v39  ;;  %2208 = vst.msk [vmem:[#allocation7 + $0x3c] sm:$0xf] %vm2202_vm5, %v9923_v38  ;;  %8589 = vmatprep.subr.bf16.mxu1 %v9186_v40  ;;  %v1927_v53 = vmax.f32 %v1805_v48, %v1869_v49  ;;  %3841 = vrot.lane.b32.xlu1 %v8309_v42, %s9428_s22  ;;  %v1568_v55 = vmax.f32 %v1148_v43, 0.0  ;;  %v1140_v56 = vadd.f32 %v9798_v5, %v1139_v52 }
 0x118   : > { %v8340_v47 = vpack.c.bf16 %v3967_v41, %v3967_v41  ;;  %v3200_v57 = vld [vmem:[#allocation2 + $0x32] sm:$0xff]  ;;  %2207 = vst.msk [vmem:[#allocation7 + $0x30] sm:$0xf] %vm2202_vm5, %v8088_v46  ;;  %v8887_v62 = vpop.f32.mrf.mxu0  ;;  %8590 = vmatpush3.bf16.msra.mxu1 %v9187_v45 }
 0x119   : > { %v1803_v58 = vld [vmem:[#allocation5 + $0x40] ss:$2 sm:$0xff]  ;;  %v1867_v59 = vld [vmem:[#allocation5 + $0x41] ss:$2 sm:$0xff]  ;;  %2015 = vst.msk [vmem:[#allocation2 + $0x51] sm:$0xff] %vm1730_vm3, %v1927_v53  ;;  %3839 = vrot.lane.b32.xlu0 %v9943_v54, %s9428_s22  ;;  %v1680_v0 = vmax.f32 %v1564_v34, %v1568_v55  ;;  %v1566_v1 = vmax.f32 %v1140_v56, 0.0  ;;  %v1151_v2 = vadd.f32 %v8887_v62, %v9798_v5  ;;  %v9956_v4 = vpack.c.bf16 %v3200_v57, %v3200_v57 }
 0x11a   : > { %4127 = vst.msk [vmem:[#allocation7 + $0x8] sm:$0xf] %vm2202_vm5, %v8340_v47  ;;  %v1926_v63 = vmax.f32 %v1803_v58, %v1867_v59  ;;  %v1142_v6 = vpop.f32.mrf.mxu0  ;;  %8591 = vmatprep.subr.bf16.mxu1 %v9188_v3 }
 0x11b   : > { %1745 = vst.msk [vmem:[#allocation5 + $0x70] sm:$0xff] %vm1730_vm3, %v1680_v0  ;;  %3332 = vrot.lane.b32.xlu1 %v8247_v61, %s9426_s28  ;;  %v1678_v9 = vmax.f32 %v1562_v50, %v1566_v1  ;;  %v1569_v10 = vmax.f32 %v1151_v2, 0.0  ;;  %v1143_v11 = vadd.f32 %v9798_v5, %v1142_v6 }
 0x11c   : > { %2014 = vst.msk [vmem:[#allocation2 + $0x49] sm:$0xff] %vm1730_vm3, %v1926_v63  ;;  %v8890_v12 = vpop.f32.mrf.mxu0  ;;  %8592 = vmatpush3.bf16.msra.mxu1 %v9189_v7 }
 0x11d   : > { %1743 = vst.msk [vmem:[#allocation5 + $0x60] sm:$0xff] %vm1730_vm3, %v1678_v9  ;;  %3330 = vrot.lane.b32.xlu0 %v9956_v4, %s9426_s28  ;;  %v1681_v13 = vmax.f32 %v1565_v60, %v1569_v10  ;;  %v1567_v14 = vmax.f32 %v1143_v11, 0.0  ;;  %8593 = vmatprep.subr.bf16.mxu1 %v9190_v15  ;;  %v1164_v21 = vadd.f32 %v8890_v12, %v9798_v5 }
 0x11e   : > { %v1155_v16 = vpop.f32.mrf.mxu0 }
 0x11f   : > { %1746 = vst.msk [vmem:[#allocation5 + $0x78] sm:$0xff] %vm1730_vm3, %v1681_v13  ;;  %2373 = vrot.lane.b32.xlu1 %v8309_v42, %s9426_s28  ;;  %v1679_v18 = vmax.f32 %v1563_v8, %v1567_v14  ;;  %v1156_v25 = vadd.f32 %v9798_v5, %v1155_v16  ;;  %v1572_v39 = vmax.f32 %v1164_v21, 0.0 }
 0x120   : > { %v8891_v19 = vpop.f32.mrf.mxu0  ;;  %8594 = vmatpush3.bf16.msra.mxu1 %v9191_v17  ;;  %v3011_v20 = vld [vmem:[#allocation2 + $0x51] sm:$0xff] }
 0x121   : > { %1744 = vst.msk [vmem:[#allocation5 + $0x68] sm:$0xff] %vm1730_vm3, %v1679_v18  ;;  %2881 = vrot.lane.b32.xlu0 %v9917_v30, %s9428_s22  ;;  %v3970_v24 = vld [vmem:[#allocation2 + $0x52] sm:$0xff]  ;;  %v8217_v27 = vpack.c.bf16 %v3011_v20, %v3011_v20  ;;  %8595 = vmatprep.subr.bf16.mxu1 %v9192_v22  ;;  %v1167_v32 = vadd.f32 %v8891_v19, %v9798_v5  ;;  %v1570_v45 = vmax.f32 %v1156_v25, 0.0 }
 0x122   : > { %v1158_v26 = vpop.f32.mrf.mxu0  ;;  %v8343_v29 = vpack.c.bf16 %v3970_v24, %v3970_v24  ;;  %v3203_v9 = vld [vmem:[#allocation2 + $0x52] sm:$0xff] }
 0x123   : > { %2630 = vrot.lane.b32.xlu1 %v8247_v61, %s9427_s29  ;;  %v3010_v30 = vld [vmem:[#allocation2 + $0x49] sm:$0xff]  ;;  %3171 = vst.msk [vmem:[#allocation7 + $0x40] sm:$0xf] %vm2202_vm5, %v8217_v27  ;;  %v1159_v49 = vadd.f32 %v9798_v5, %v1158_v26  ;;  %v3714_v61 = vld [vmem:[#allocation2 + $0x51] sm:$0xff]  ;;  %v8249_v15 = vpack.c.bf16 %v3203_v9, %v3203_v9 }
 0x124   : > { %v2049_v31 = vld [vmem:[#allocation2 + $0x50] sm:$0xff]  ;;  %v8894_v33 = vpop.f32.mrf.mxu0  ;;  %8596 = vmatpush3.bf16.msra.mxu1 %v9193_v23  ;;  %v8216_v34 = vpack.c.bf16 %v3010_v30, %v3010_v30  ;;  %v2048_v36 = vld [vmem:[#allocation2 + $0x48] sm:$0xff]  ;;  %4130 = vst.msk [vmem:[#allocation7 + $0x2c] sm:$0xf] %vm2202_vm5, %v8343_v29  ;;  %v8311_v6 = vpack.c.bf16 %v3714_v61, %v3714_v61 }
 0x125   : > { %v8091_v35 = vpack.c.bf16 %v2049_v31, %v2049_v31  ;;  %v3969_v37 = vld [vmem:[#allocation2 + $0x4a] sm:$0xff]  ;;  %2371 = vrot.lane.b32.xlu0 %v9943_v54, %s9426_s28  ;;  %v1180_v40 = vadd.f32 %v8894_v33, %v9798_v5  ;;  %v8090_v41 = vpack.c.bf16 %v2048_v36, %v2048_v36  ;;  %v1573_v54 = vmax.f32 %v1167_v32, 0.0 }
 0x126   : > { %v8342_v42 = vpack.c.bf16 %v3969_v37, %v3969_v37  ;;  %v1809_v43 = vld [vmem:[#allocation5 + $0x70] ss:$2 sm:$0xff]  ;;  %v1873_v44 = vld [vmem:[#allocation5 + $0x71] ss:$2 sm:$0xff]  ;;  %v1171_v46 = vpop.f32.mrf.mxu0  ;;  %3170 = vst.msk [vmem:[#allocation7 + $0x34] sm:$0xf] %vm2202_vm5, %v8216_v34 }
 0x127   : > { %2210 = vst.msk [vmem:[#allocation7 + $0x54] sm:$0xf] %vm2202_vm5, %v8091_v35  ;;  %v1929_v47 = vmax.f32 %v1809_v43, %v1873_v44  ;;  %3585 = vrot.lane.b32.xlu1 %v9923_v38, %s9427_s29  ;;  %v3457_v48 = vld [vmem:[#allocation2 + $0x48] sm:$0xff]  ;;  %v1576_v50 = vmax.f32 %v1180_v40, 0.0  ;;  %v1172_v51 = vadd.f32 %v9798_v5, %v1171_v46  ;;  %2209 = vst.msk [vmem:[#allocation7 + $0x48] sm:$0xf] %vm2202_vm5, %v8090_v41 }
 0x128   : > { %4129 = vst.msk [vmem:[#allocation7 + $0x20] sm:$0xf] %vm2202_vm5, %v8342_v42  ;;  %v1807_v52 = vld [vmem:[#allocation5 + $0x60] ss:$2 sm:$0xff]  ;;  %v1871_v53 = vld [vmem:[#allocation5 + $0x61] ss:$2 sm:$0xff]  ;;  %v8895_v55 = vpop.f32.mrf.mxu0  ;;  %v10006_v60 = vpack.c.bf16 %v3457_v48, %v3457_v48 }
 0x129   : > { %2017 = vst.msk [vmem:[#allocation2 + $0x69] sm:$0xff] %vm1730_vm3, %v1929_v47  ;;  %v1928_v56 = vmax.f32 %v1807_v52, %v1871_v53  ;;  %2628 = vrot.lane.b32.xlu0 %v9956_v4, %s9427_s29  ;;  %v1684_v57 = vmax.f32 %v1572_v39, %v1576_v50  ;;  %v1574_v58 = vmax.f32 %v1172_v51, 0.0  ;;  %v1183_v59 = vadd.f32 %v8895_v55, %v9798_v5  ;;  %v3713_v3 = vld [vmem:[#allocation2 + $0x49] sm:$0xff] }
 0x12a   : > { %v1174_v62 = vpop.f32.mrf.mxu0  ;;  %v1571_v63 = vmax.f32 %v1159_v49, 0.0  ;;  %v3202_v12 = vld [vmem:[#allocation2 + $0x4a] sm:$0xff] }
 0x12b   : > { %2016 = vst.msk [vmem:[#allocation2 + $0x61] sm:$0xff] %vm1730_vm3, %v1928_v56  ;;  %2883 = vrot.lane.b32.xlu1 %v9923_v38, %s9428_s22  ;;  %1749 = vst.msk [vmem:[#allocation5 + $0x90] sm:$0xff] %vm1730_vm3, %v1684_v57  ;;  %v1682_v0 = vmax.f32 %v1570_v45, %v1574_v58  ;;  %v1577_v1 = vmax.f32 %v1183_v59, 0.0  ;;  %v1175_v2 = vadd.f32 %v9798_v5, %v1174_v62  ;;  %v3458_v53 = vld [vmem:[#allocation2 + $0x50] sm:$0xff] }
 0x12c   : > { %v8898_v4 = vpop.f32.mrf.mxu0  ;;  %v10017_v38 = vpack.c.bf16 %v3713_v3, %v3713_v3  ;;  %v8248_v22 = vpack.c.bf16 %v3202_v12, %v3202_v12 }
 0x12d   : > { %3587 = vrot.lane.b32.xlu0 %v10006_v60, %s9427_s29  ;;  %1747 = vst.msk [vmem:[#allocation5 + $0x80] sm:$0xff] %vm1730_vm3, %v1682_v0  ;;  %v1685_v7 = vmax.f32 %v1573_v54, %v1577_v1  ;;  %v1575_v8 = vmax.f32 %v1175_v2, 0.0  ;;  %v1196_v16 = vadd.f32 %v8898_v4, %v9798_v5 }
 0x12e   : > { %v1187_v10 = vpop.f32.mrf.mxu0 }
 0x12f   : > { %3845 = vrot.lane.b32.xlu1 %v8311_v6, %s9428_s22  ;;  %1750 = vst.msk [vmem:[#allocation5 + $0x98] sm:$0xff] %vm1730_vm3, %v1685_v7  ;;  %v1683_v11 = vmax.f32 %v1571_v63, %v1575_v8  ;;  %v1188_v18 = vadd.f32 %v9798_v5, %v1187_v10  ;;  %v1580_v32 = vmax.f32 %v1196_v16, 0.0 }
 0x130   : > { %v8899_v13 = vpop.f32.mrf.mxu0  ;;  %v3013_v14 = vld [vmem:[#allocation2 + $0x69] sm:$0xff] }
 0x131   : > { %3843 = vrot.lane.b32.xlu0 %v10017_v38, %s9428_s22  ;;  %1748 = vst.msk [vmem:[#allocation5 + $0x88] sm:$0xff] %vm1730_vm3, %v1683_v11  ;;  %v3972_v17 = vld [vmem:[#allocation2 + $0x6a] sm:$0xff]  ;;  %v8219_v20 = vpack.c.bf16 %v3013_v14, %v3013_v14  ;;  %v1199_v25 = vadd.f32 %v8899_v13, %v9798_v5  ;;  %v1578_v39 = vmax.f32 %v1188_v18, 0.0 }
 0x132   : > { %v1190_v19 = vpop.f32.mrf.mxu0  ;;  %v8345_v21 = vpack.c.bf16 %v3972_v17, %v3972_v17  ;;  %v3012_v23 = vld [vmem:[#allocation2 + $0x61] sm:$0xff]  ;;  %v3716_v4 = vld [vmem:[#allocation2 + $0x69] sm:$0xff] }
 0x133   : > { %3336 = vrot.lane.b32.xlu1 %v8249_v15, %s9426_s28  ;;  %v2051_v24 = vld [vmem:[#allocation2 + $0x68] sm:$0xff]  ;;  %3173 = vst.msk [vmem:[#allocation7 + $0x58] sm:$0xf] %vm2202_vm5, %v8219_v20  ;;  %v8218_v27 = vpack.c.bf16 %v3012_v23, %v3012_v23  ;;  %v2050_v30 = vld [vmem:[#allocation2 + $0x60] sm:$0xff]  ;;  %v1191_v42 = vadd.f32 %v9798_v5, %v1190_v19  ;;  %v1581_v47 = vmax.f32 %v1199_v25, 0.0 }
 0x134   : > { %v8902_v26 = vpop.f32.mrf.mxu0  ;;  %v8093_v29 = vpack.c.bf16 %v2051_v24, %v2051_v24  ;;  %v3971_v31 = vld [vmem:[#allocation2 + $0x62] sm:$0xff]  ;;  %4132 = vst.msk [vmem:[#allocation7 + $0x44] sm:$0xf] %vm2202_vm5, %v8345_v21  ;;  %v8092_v34 = vpack.c.bf16 %v2050_v30, %v2050_v30 }
 0x135   : > { %3334 = vrot.lane.b32.xlu0 %v8248_v22, %s9426_s28  ;;  %v1212_v33 = vadd.f32 %v8902_v26, %v9798_v5  ;;  %v8344_v35 = vpack.c.bf16 %v3971_v31, %v3971_v31  ;;  %3172 = vst.msk [vmem:[#allocation7 + $0x4c] sm:$0xf] %vm2202_vm5, %v8218_v27  ;;  %v1579_v55 = vmax.f32 %v1191_v42, 0.0  ;;  %v3459_v1 = vld [vmem:[#allocation2 + $0x60] sm:$0xff] }
 0x136   : > { %v1813_v36 = vld [vmem:[#allocation5 + $0x90] ss:$2 sm:$0xff]  ;;  %v1877_v37 = vld [vmem:[#allocation5 + $0x91] ss:$2 sm:$0xff]  ;;  %v1203_v40 = vpop.f32.mrf.mxu0  ;;  %2212 = vst.msk [vmem:[#allocation7 + $0x6c] sm:$0xf] %vm2202_vm5, %v8093_v29  ;;  %v10056_v11 = vpack.c.bf16 %v3459_v1, %v3459_v1 }
 0x137   : > { %v1931_v41 = vmax.f32 %v1813_v36, %v1877_v37  ;;  %2377 = vrot.lane.b32.xlu1 %v8311_v6, %s9426_s28  ;;  %v1584_v43 = vmax.f32 %v1212_v33, 0.0  ;;  %v1204_v44 = vadd.f32 %v9798_v5, %v1203_v40  ;;  %2211 = vst.msk [vmem:[#allocation7 + $0x60] sm:$0xf] %vm2202_vm5, %v8092_v34  ;;  %4131 = vst.msk [vmem:[#allocation7 + $0x38] sm:$0xf] %vm2202_vm5, %v8344_v35  ;;  %v3715_v12 = vld [vmem:[#allocation2 + $0x61] sm:$0xff] }
 0x138   : > { %v1811_v45 = vld [vmem:[#allocation5 + $0x80] ss:$2 sm:$0xff]  ;;  %v1875_v46 = vld [vmem:[#allocation5 + $0x81] ss:$2 sm:$0xff]  ;;  %v8903_v48 = vpop.f32.mrf.mxu0  ;;  %v10064_v27 = vpack.c.bf16 %v3715_v12, %v3715_v12  ;;  %v3204_v33 = vld [vmem:[#allocation2 + $0x62] sm:$0xff] }
 0x139   : > { %2019 = vst.msk [vmem:[#allocation2 + $0x81] sm:$0xff] %vm1730_vm3, %v1931_v41  ;;  %v1930_v49 = vmax.f32 %v1811_v45, %v1875_v46  ;;  %2885 = vrot.lane.b32.xlu0 %v10006_v60, %s9428_s22  ;;  %v1688_v50 = vmax.f32 %v1580_v32, %v1584_v43  ;;  %v1582_v51 = vmax.f32 %v1204_v44, 0.0  ;;  %v1215_v52 = vadd.f32 %v8903_v48, %v9798_v5 }
 0x13a   : > { %v1206_v54 = vpop.f32.mrf.mxu0  ;;  %v8279_v60 = vpack.c.bf16 %v3458_v53, %v3458_v53  ;;  %v10077_v48 = vpack.c.bf16 %v3204_v33, %v3204_v33 }
 0x13b   : > { %2018 = vst.msk [vmem:[#allocation2 + $0x79] sm:$0xff] %vm1730_vm3, %v1930_v49  ;;  %2634 = vrot.lane.b32.xlu1 %v8249_v15, %s9427_s29  ;;  %1753 = vst.msk [vmem:[#allocation5 + $0xb0] sm:$0xff] %vm1730_vm3, %v1688_v50  ;;  %v1686_v56 = vmax.f32 %v1578_v39, %v1582_v51  ;;  %v1585_v57 = vmax.f32 %v1215_v52, 0.0  ;;  %v1207_v58 = vadd.f32 %v9798_v5, %v1206_v54 }
 0x13c   : > { %v8906_v59 = vpop.f32.mrf.mxu0  ;;  %v8313_v15 = vpack.c.bf16 %v3716_v4, %v3716_v4 }
 0x13d   : > { %2375 = vrot.lane.b32.xlu0 %v10017_v38, %s9426_s28  ;;  %1751 = vst.msk [vmem:[#allocation5 + $0xa0] sm:$0xff] %vm1730_vm3, %v1686_v56  ;;  %v1689_v61 = vmax.f32 %v1581_v47, %v1585_v57  ;;  %v1583_v62 = vmax.f32 %v1207_v58, 0.0  ;;  %v1228_v6 = vadd.f32 %v8906_v59, %v9798_v5 }
 0x13e   : > { %v1219_v63 = vpop.f32.mrf.mxu0 }
 0x13f   : > { %3589 = vrot.lane.b32.xlu1 %v8279_v60, %s9427_s29  ;;  %1754 = vst.msk [vmem:[#allocation5 + $0xb8] sm:$0xff] %vm1730_vm3, %v1689_v61  ;;  %v1687_v0 = vmax.f32 %v1579_v55, %v1583_v62  ;;  %v1220_v8 = vadd.f32 %v9798_v5, %v1219_v63  ;;  %v1588_v23 = vmax.f32 %v1228_v6, 0.0  ;;  %v10094_v61 = vld [vmem:[%s11659_s2] ss:$0 sm:$0xff] }
 0x140   : > { %v8907_v2 = vpop.f32.mrf.mxu0  ;;  %v3015_v3 = vld [vmem:[#allocation2 + $0x81] sm:$0xff] }
 0x141   : > { %2632 = vrot.lane.b32.xlu0 %v8248_v22, %s9427_s29  ;;  %1752 = vst.msk [vmem:[#allocation5 + $0xa8] sm:$0xff] %vm1730_vm3, %v1687_v0  ;;  %v3974_v7 = vld [vmem:[#allocation2 + $0x82] sm:$0xff]  ;;  %v8221_v10 = vpack.c.bf16 %v3015_v3, %v3015_v3  ;;  %v1231_v16 = vadd.f32 %v8907_v2, %v9798_v5  ;;  %v3205_v22 = vld [vmem:[#allocation2 + $0x6a] sm:$0xff]  ;;  %v1586_v31 = vmax.f32 %v1220_v8, 0.0 }
 0x142   : > { %v1222_v9 = vpop.f32.mrf.mxu0  ;;  %v8347_v38 = vpack.c.bf16 %v3974_v7, %v3974_v7  ;;  %v3014_v13 = vld [vmem:[#allocation2 + $0x79] sm:$0xff]  ;;  %v8251_v39 = vpack.c.bf16 %v3205_v22, %v3205_v22 }
 0x143   : > { %2887 = vrot.lane.b32.xlu1 %v8279_v60, %s9428_s22  ;;  %v2053_v14 = vld [vmem:[#allocation2 + $0x80] sm:$0xff]  ;;  %3175 = vst.msk [vmem:[#allocation7 + $0x70] sm:$0xf] %vm2202_vm5, %v8221_v10  ;;  %v8220_v18 = vpack.c.bf16 %v3014_v13, %v3014_v13  ;;  %v2052_v20 = vld [vmem:[#allocation2 + $0x78] sm:$0xff]  ;;  %v1223_v35 = vadd.f32 %v9798_v5, %v1222_v9  ;;  %v1589_v42 = vmax.f32 %v1231_v16, 0.0 }
 0x144   : > { %v8910_v17 = vpop.f32.mrf.mxu0  ;;  %v8095_v19 = vpack.c.bf16 %v2053_v14, %v2053_v14  ;;  %v3973_v21 = vld [vmem:[#allocation2 + $0x7a] sm:$0xff]  ;;  %4134 = vst.msk [vmem:[#allocation7 + $0x5c] sm:$0xf] %vm2202_vm5, %v8347_v38  ;;  %v8094_v25 = vpack.c.bf16 %v2052_v20, %v2052_v20 }
 0x145   : > { %3591 = vrot.lane.b32.xlu0 %v10056_v11, %s9427_s29  ;;  %v1244_v24 = vadd.f32 %v8910_v17, %v9798_v5  ;;  %v8346_v26 = vpack.c.bf16 %v3973_v21, %v3973_v21  ;;  %3174 = vst.msk [vmem:[#allocation7 + $0x64] sm:$0xf] %vm2202_vm5, %v8220_v18  ;;  %v1587_v50 = vmax.f32 %v1223_v35, 0.0  ;;  %v3461_v21 = vld [vmem:[#allocation2 + $0x78] sm:$0xff] }
 0x146   : > { %v1817_v29 = vld [vmem:[#allocation5 + $0xb0] ss:$2 sm:$0xff]  ;;  %v1881_v30 = vld [vmem:[#allocation5 + $0xb1] ss:$2 sm:$0xff]  ;;  %v1235_v32 = vpop.f32.mrf.mxu0  ;;  %2214 = vst.msk [vmem:[#allocation7 + $0x84] sm:$0xf] %vm2202_vm5, %v8095_v19  ;;  %v10116_v35 = vpack.c.bf16 %v3461_v21, %v3461_v21 }
 0x147   : > { %3849 = vrot.lane.b32.xlu1 %v8313_v15, %s9428_s22  ;;  %v1933_v34 = vmax.f32 %v1817_v29, %v1881_v30  ;;  %v1592_v36 = vmax.f32 %v1244_v24, 0.0  ;;  %v1236_v37 = vadd.f32 %v9798_v5, %v1235_v32  ;;  %2213 = vst.msk [vmem:[#allocation7 + $0x78] sm:$0xf] %vm2202_vm5, %v8094_v25  ;;  %4133 = vst.msk [vmem:[#allocation7 + $0x50] sm:$0xf] %vm2202_vm5, %v8346_v26 }
 0x148   : > { %v1815_v40 = vld [vmem:[#allocation5 + $0xa0] ss:$2 sm:$0xff]  ;;  %v1879_v41 = vld [vmem:[#allocation5 + $0xa1] ss:$2 sm:$0xff]  ;;  %v8911_v43 = vpop.f32.mrf.mxu0 }
 0x149   : > { %3847 = vrot.lane.b32.xlu0 %v10064_v27, %s9428_s22  ;;  %2021 = vst.msk [vmem:[#allocation2 + $0x99] sm:$0xff] %vm1730_vm3, %v1933_v34  ;;  %v1932_v44 = vmax.f32 %v1815_v40, %v1879_v41  ;;  %v1692_v45 = vmax.f32 %v1588_v23, %v1592_v36  ;;  %v1590_v46 = vmax.f32 %v1236_v37, 0.0  ;;  %v1247_v47 = vadd.f32 %v8911_v43, %v9798_v5  ;;  %v3718_v36 = vld [vmem:[#allocation2 + $0x81] sm:$0xff]  ;;  %v3717_v43 = vld [vmem:[#allocation2 + $0x79] sm:$0xff] }
 0x14a   : > { %v1238_v49 = vpop.f32.mrf.mxu0 }
 0x14b   : > { %3340 = vrot.lane.b32.xlu1 %v8251_v39, %s9426_s28  ;;  %2020 = vst.msk [vmem:[#allocation2 + $0x91] sm:$0xff] %vm1730_vm3, %v1932_v44  ;;  %1757 = vst.msk [vmem:[#allocation5 + $0xd0] sm:$0xff] %vm1730_vm3, %v1692_v45  ;;  %v1690_v51 = vmax.f32 %v1586_v31, %v1590_v46  ;;  %v1593_v52 = vmax.f32 %v1247_v47, 0.0  ;;  %v1239_v53 = vadd.f32 %v9798_v5, %v1238_v49  ;;  %v3460_v5 = vld [vmem:[#allocation2 + $0x68] sm:$0xff] }
 0x14c   : > { %v8914_v54 = vpop.f32.mrf.mxu0  ;;  %v8281_v7 = vpack.c.bf16 %v3460_v5, %v3460_v5  ;;  %v8315_v45 = vpack.c.bf16 %v3718_v36, %v3718_v36 }
 0x14d   : > { %3338 = vrot.lane.b32.xlu0 %v10077_v48, %s9426_s28  ;;  %1755 = vst.msk [vmem:[#allocation5 + $0xc0] sm:$0xff] %vm1730_vm3, %v1690_v51  ;;  %v1693_v55 = vmax.f32 %v1589_v42, %v1593_v52  ;;  %v1591_v56 = vmax.f32 %v1239_v53, 0.0  ;;  %v1260_v62 = vadd.f32 %v10094_v61, %v8914_v54  ;;  %v3206_v52 = vld [vmem:[#allocation2 + $0x7a] sm:$0xff] }
 0x14e   : > { %v1251_v57 = vpop.f32.mrf.mxu0 }
 0x14f   : > { %2381 = vrot.lane.b32.xlu1 %v8313_v15, %s9426_s28  ;;  %1758 = vst.msk [vmem:[#allocation5 + $0xd8] sm:$0xff] %vm1730_vm3, %v1693_v55  ;;  %v1691_v58 = vmax.f32 %v1587_v50, %v1591_v56  ;;  %v1252_v0 = vadd.f32 %v10094_v61, %v1251_v57  ;;  %v1596_v13 = vmax.f32 %v1260_v62, 0.0  ;;  %v10126_v50 = vpack.c.bf16 %v3717_v43, %v3717_v43 }
 0x150   : > { %v8915_v59 = vpop.f32.mrf.mxu0  ;;  %v3017_v60 = vld [vmem:[#allocation2 + $0x99] sm:$0xff]  ;;  %v8252_v62 = vpack.c.bf16 %v3206_v52, %v3206_v52 }
 0x151   : > { %2889 = vrot.lane.b32.xlu0 %v10056_v11, %s9428_s22  ;;  %1756 = vst.msk [vmem:[#allocation5 + $0xc8] sm:$0xff] %vm1730_vm3, %v1691_v58  ;;  %v3976_v63 = vld [vmem:[#allocation2 + $0x9a] sm:$0xff]  ;;  %v8223_v2 = vpack.c.bf16 %v3017_v60, %v3017_v60  ;;  %v1263_v8 = vadd.f32 %v10094_v61, %v8915_v59  ;;  %v1594_v19 = vmax.f32 %v1252_v0, 0.0 }
 0x152   : > { %v1254_v1 = vpop.f32.mrf.mxu0  ;;  %v8349_v3 = vpack.c.bf16 %v3976_v63, %v3976_v63  ;;  %v3016_v4 = vld [vmem:[#allocation2 + $0x91] sm:$0xff] }
 0x153   : > { %2638 = vrot.lane.b32.xlu1 %v8251_v39, %s9427_s29  ;;  %v2055_v6 = vld [vmem:[#allocation2 + $0x98] sm:$0xff]  ;;  %3177 = vst.msk [vmem:[#allocation7 + $0x88] sm:$0xf] %vm2202_vm5, %v8223_v2  ;;  %v8222_v10 = vpack.c.bf16 %v3016_v4, %v3016_v4  ;;  %v2054_v11 = vld [vmem:[#allocation2 + $0x90] sm:$0xff]  ;;  %v1255_v23 = vadd.f32 %v10094_v61, %v1254_v1  ;;  %v1597_v29 = vmax.f32 %v1263_v8, 0.0 }
 0x154   : > { %v8918_v9 = vpop.f32.mrf.mxu0  ;;  %v8097_v38 = vpack.c.bf16 %v2055_v6, %v2055_v6  ;;  %v3975_v12 = vld [vmem:[#allocation2 + $0x92] sm:$0xff]  ;;  %4136 = vst.msk [vmem:[#allocation7 + $0x74] sm:$0xf] %vm2202_vm5, %v8349_v3  ;;  %v8096_v15 = vpack.c.bf16 %v2054_v11, %v2054_v11 }
 0x155   : > { %2379 = vrot.lane.b32.xlu0 %v10064_v27, %s9426_s28  ;;  %v1276_v14 = vadd.f32 %v10094_v61, %v8918_v9  ;;  %v8348_v16 = vpack.c.bf16 %v3975_v12, %v3975_v12  ;;  %3176 = vst.msk [vmem:[#allocation7 + $0x7c] sm:$0xf] %vm2202_vm5, %v8222_v10  ;;  %v1595_v39 = vmax.f32 %v1255_v23, 0.0 }
 0x156   : > { %v1821_v17 = vld [vmem:[#allocation5 + $0xd0] ss:$2 sm:$0xff]  ;;  %v1885_v18 = vld [vmem:[#allocation5 + $0xd1] ss:$2 sm:$0xff]  ;;  %v1267_v20 = vpop.f32.mrf.mxu0  ;;  %2216 = vst.msk [vmem:[#allocation7 + $0x9c] sm:$0xf] %vm2202_vm5, %v8097_v38 }
 0x157   : > { %3593 = vrot.lane.b32.xlu1 %v8281_v7, %s9427_s29  ;;  %v1935_v22 = vmax.f32 %v1821_v17, %v1885_v18  ;;  %v1600_v24 = vmax.f32 %v1276_v14, 0.0  ;;  %v1268_v25 = vadd.f32 %v10094_v61, %v1267_v20  ;;  %2215 = vst.msk [vmem:[#allocation7 + $0x90] sm:$0xf] %vm2202_vm5, %v8096_v15  ;;  %4135 = vst.msk [vmem:[#allocation7 + $0x68] sm:$0xf] %vm2202_vm5, %v8348_v16 }
 0x158   : > { %v1819_v26 = vld [vmem:[#allocation5 + $0xc0] ss:$2 sm:$0xff]  ;;  %v1883_v27 = vld [vmem:[#allocation5 + $0xc1] ss:$2 sm:$0xff]  ;;  %v8919_v30 = vpop.f32.mrf.mxu0 }
 0x159   : > { %2636 = vrot.lane.b32.xlu0 %v10077_v48, %s9427_s29  ;;  %2023 = vst.msk [vmem:[#allocation2 + $0xb1] sm:$0xff] %vm1730_vm3, %v1935_v22  ;;  %v1934_v31 = vmax.f32 %v1819_v26, %v1883_v27  ;;  %v1696_v32 = vmax.f32 %v1596_v13, %v1600_v24  ;;  %v1598_v33 = vmax.f32 %v1268_v25, 0.0  ;;  %v1279_v34 = vadd.f32 %v10094_v61, %v8919_v30  ;;  %v3207_v48 = vld [vmem:[#allocation2 + $0x82] sm:$0xff] }
 0x15a   : > { %v1270_v37 = vpop.f32.mrf.mxu0  ;;  %v8253_v55 = vpack.c.bf16 %v3207_v48, %v3207_v48  ;;  %v3462_v27 = vld [vmem:[#allocation2 + $0x80] sm:$0xff] }
 0x15b   : > { %2891 = vrot.lane.b32.xlu1 %v8281_v7, %s9428_s22  ;;  %2022 = vst.msk [vmem:[#allocation2 + $0xa9] sm:$0xff] %vm1730_vm3, %v1934_v31  ;;  %1761 = vst.msk [vmem:[#allocation5 + $0xf0] sm:$0xff] %vm1730_vm3, %v1696_v32  ;;  %v1694_v40 = vmax.f32 %v1594_v19, %v1598_v33  ;;  %v1601_v41 = vmax.f32 %v1279_v34, 0.0  ;;  %v1271_v42 = vadd.f32 %v10094_v61, %v1270_v37 }
 0x15c   : > { %v8922_v44 = vpop.f32.mrf.mxu0 }
 0x15d   : > { %3595 = vrot.lane.b32.xlu0 %v10116_v35, %s9427_s29  ;;  %1759 = vst.msk [vmem:[#allocation5 + $0xe0] sm:$0xff] %vm1730_vm3, %v1694_v40  ;;  %v1697_v46 = vmax.f32 %v1597_v29, %v1601_v41  ;;  %v1599_v47 = vmax.f32 %v1271_v42, 0.0  ;;  %v1292_v56 = vadd.f32 %v10094_v61, %v8922_v44  ;;  %v3463_v41 = vld [vmem:[#allocation2 + $0x90] sm:$0xff]  ;;  %v10161_v44 = vpop.permute.xlu0 %3643 }
 0x15e   : > { %v1283_v49 = vpop.f32.mrf.mxu0  ;;  %v10169_v52 = vpack.c.bf16 %v3463_v41, %v3463_v41 }
 0x15f   : > { %3853 = vrot.lane.b32.xlu1 %v8315_v45, %s9428_s22  ;;  %1762 = vst.msk [vmem:[#allocation5 + $0xf8] sm:$0xff] %vm1730_vm3, %v1697_v46  ;;  %v1695_v51 = vmax.f32 %v1595_v39, %v1599_v47  ;;  %v1284_v58 = vadd.f32 %v10094_v61, %v1283_v49  ;;  %v1604_v8 = vmax.f32 %v1292_v56, 0.0 }
 0x160   : > { %v8923_v53 = vpop.f32.mrf.mxu0  ;;  %v3019_v54 = vld [vmem:[#allocation2 + $0xb1] sm:$0xff] }
 0x161   : > { %3851 = vrot.lane.b32.xlu0 %v10126_v50, %s9428_s22  ;;  %1760 = vst.msk [vmem:[#allocation5 + $0xe8] sm:$0xff] %vm1730_vm3, %v1695_v51  ;;  %v3978_v57 = vld [vmem:[#allocation2 + $0xb2] sm:$0xff]  ;;  %v8225_v60 = vpack.c.bf16 %v3019_v54, %v3019_v54  ;;  %v1295_v1 = vadd.f32 %v10094_v61, %v8923_v53  ;;  %v1602_v13 = vmax.f32 %v1284_v58, 0.0 }
 0x162   : > { %v1286_v59 = vpop.f32.mrf.mxu0  ;;  %v8351_v5 = vpack.c.bf16 %v3978_v57, %v3978_v57  ;;  %v3018_v63 = vld [vmem:[#allocation2 + $0xa9] sm:$0xff]  ;;  %v3719_v53 = vld [vmem:[#allocation2 + $0x91] sm:$0xff] }
 0x163   : > { %3344 = vrot.lane.b32.xlu1 %v8253_v55, %s9426_s28  ;;  %v2057_v0 = vld [vmem:[#allocation2 + $0xb0] sm:$0xff]  ;;  %3179 = vst.msk [vmem:[#allocation7 + $0xa0] sm:$0xf] %vm2202_vm5, %v8225_v60  ;;  %v8224_v3 = vpack.c.bf16 %v3018_v63, %v3018_v63  ;;  %v2056_v6 = vld [vmem:[#allocation2 + $0xa8] sm:$0xff]  ;;  %v1287_v16 = vadd.f32 %v10094_v61, %v1286_v59  ;;  %v1605_v21 = vmax.f32 %v1295_v1, 0.0 }
 0x164   : > { %v8926_v2 = vpop.f32.mrf.mxu0  ;;  %v8099_v4 = vpack.c.bf16 %v2057_v0, %v2057_v0  ;;  %v3977_v7 = vld [vmem:[#allocation2 + $0xaa] sm:$0xff]  ;;  %4138 = vst.msk [vmem:[#allocation7 + $0x8c] sm:$0xf] %vm2202_vm5, %v8351_v5  ;;  %v8098_v10 = vpack.c.bf16 %v2056_v6, %v2056_v6  ;;  %v3209_v0 = vld [vmem:[#allocation2 + $0x9a] sm:$0xff]  ;;  %v10180_v6 = vpack.c.bf16 %v3719_v53, %v3719_v53 }
 0x165   : > { %3342 = vrot.lane.b32.xlu0 %v8252_v62, %s9426_s28  ;;  %v1308_v9 = vadd.f32 %v10094_v61, %v8926_v2  ;;  %v8350_v38 = vpack.c.bf16 %v3977_v7, %v3977_v7  ;;  %3178 = vst.msk [vmem:[#allocation7 + $0x94] sm:$0xf] %vm2202_vm5, %v8224_v3  ;;  %v1603_v30 = vmax.f32 %v1287_v16, 0.0  ;;  %v8255_v16 = vpack.c.bf16 %v3209_v0, %v3209_v0 }
 0x166   : > { %v1825_v11 = vld [vmem:[#allocation5 + $0xf0] ss:$2 sm:$0xff]  ;;  %v1889_v12 = vld [vmem:[#allocation5 + $0xf1] ss:$2 sm:$0xff]  ;;  %v1299_v14 = vpop.f32.mrf.mxu0  ;;  %2218 = vst.msk [vmem:[#allocation7 + $0xb4] sm:$0xf] %vm2202_vm5, %v8099_v4 }
 0x167   : > { %2385 = vrot.lane.b32.xlu1 %v8315_v45, %s9426_s28  ;;  %v1937_v15 = vmax.f32 %v1825_v11, %v1889_v12  ;;  %v1608_v17 = vmax.f32 %v1308_v9, 0.0  ;;  %v1300_v18 = vadd.f32 %v10094_v61, %v1299_v14  ;;  %2217 = vst.msk [vmem:[#allocation7 + $0xa8] sm:$0xf] %vm2202_vm5, %v8098_v10  ;;  %4137 = vst.msk [vmem:[#allocation7 + $0x80] sm:$0xf] %vm2202_vm5, %v8350_v38  ;;  %v3720_v45 = vld [vmem:[#allocation2 + $0x99] sm:$0xff] }
 0x168   : > { %v1823_v19 = vld [vmem:[#allocation5 + $0xe0] ss:$2 sm:$0xff]  ;;  %v1887_v20 = vld [vmem:[#allocation5 + $0xe1] ss:$2 sm:$0xff]  ;;  %v8927_v22 = vpop.f32.mrf.mxu0  ;;  %v10171_v56 = vpack.c.bf16 %v3720_v45, %v3720_v45 }
 0x169   : > { %2893 = vrot.lane.b32.xlu0 %v10116_v35, %s9428_s22  ;;  %2025 = vst.msk [vmem:[#allocation2 + $0xc9] sm:$0xff] %vm1730_vm3, %v1937_v15  ;;  %v1936_v23 = vmax.f32 %v1823_v19, %v1887_v20  ;;  %v1700_v24 = vmax.f32 %v1604_v8, %v1608_v17  ;;  %v1606_v25 = vmax.f32 %v1300_v18, 0.0  ;;  %v1311_v26 = vadd.f32 %v10094_v61, %v8927_v22  ;;  %v3208_v11 = vld [vmem:[#allocation2 + $0x92] sm:$0xff] }
 0x16a   : > { %v1302_v29 = vpop.f32.mrf.mxu0  ;;  %v8283_v35 = vpack.c.bf16 %v3462_v27, %v3462_v27 }
 0x16b   : > { %2642 = vrot.lane.b32.xlu1 %v8253_v55, %s9427_s29  ;;  %2024 = vst.msk [vmem:[#allocation2 + $0xc1] sm:$0xff] %vm1730_vm3, %v1936_v23  ;;  %1765 = vst.msk [vmem:[#allocation5 + $0x110] sm:$0xff] %vm1730_vm3, %v1700_v24  ;;  %v1698_v31 = vmax.f32 %v1602_v13, %v1606_v25  ;;  %v1609_v32 = vmax.f32 %v1311_v26, 0.0  ;;  %v1303_v33 = vadd.f32 %v10094_v61, %v1302_v29 }
 0x16c   : > { %v8930_v34 = vpop.f32.mrf.mxu0  ;;  %v10197_v26 = vpack.c.bf16 %v3208_v11, %v3208_v11 }
 0x16d   : > { %2383 = vrot.lane.b32.xlu0 %v10126_v50, %s9426_s28  ;;  %1763 = vst.msk [vmem:[#allocation5 + $0x100] sm:$0xff] %vm1730_vm3, %v1698_v31  ;;  %v1701_v36 = vmax.f32 %v1605_v21, %v1609_v32  ;;  %v1607_v37 = vmax.f32 %v1303_v33, 0.0  ;;  %v1324_v46 = vadd.f32 %v10094_v61, %v8930_v34 }
 0x16e   : > { %v1315_v39 = vpop.f32.mrf.mxu0 }
 0x16f   : > { %3597 = vrot.lane.b32.xlu1 %v8283_v35, %s9427_s29  ;;  %1766 = vst.msk [vmem:[#allocation5 + $0x118] sm:$0xff] %vm1730_vm3, %v1701_v36  ;;  %v1699_v40 = vmax.f32 %v1603_v30, %v1607_v37  ;;  %v10166_v48 = vadd.f32 %v10094_v61, %v1315_v39  ;;  %v1612_v1 = vmax.f32 %v1324_v46, 0.0  ;;  %v3464_v46 = vld [vmem:[#allocation2 + $0x98] sm:$0xff] }
 0x170   : > { %v8931_v42 = vpop.f32.mrf.mxu0  ;;  %v3021_v43 = vld [vmem:[#allocation2 + $0xc9] sm:$0xff] }
 0x171   : > { %2640 = vrot.lane.b32.xlu0 %v8252_v62, %s9427_s29  ;;  %1764 = vst.msk [vmem:[#allocation5 + $0x108] sm:$0xff] %vm1730_vm3, %v1699_v40  ;;  %v3980_v47 = vld [vmem:[#allocation2 + $0xca] sm:$0xff]  ;;  %v8227_v50 = vpack.c.bf16 %v3021_v43, %v3021_v43  ;;  %v1327_v57 = vadd.f32 %v10094_v61, %v8931_v42  ;;  %v1610_v9 = vmax.f32 %v10166_v48, 0.0 }
 0x172   : > { %v1318_v49 = vpop.f32.mrf.mxu0  ;;  %v8353_v51 = vpack.c.bf16 %v3980_v47, %v3980_v47  ;;  %v3020_v54 = vld [vmem:[#allocation2 + $0xc1] sm:$0xff] }
 0x173   : > { %2895 = vrot.lane.b32.xlu1 %v8283_v35, %s9428_s22  ;;  %v2059_v55 = vld [vmem:[#allocation2 + $0xc8] sm:$0xff]  ;;  %3181 = vst.msk [vmem:[#allocation7 + $0xb8] sm:$0xf] %vm2202_vm5, %v8227_v50  ;;  %v8226_v59 = vpack.c.bf16 %v3020_v54, %v3020_v54  ;;  %v2058_v5 = vld [vmem:[#allocation2 + $0xc0] sm:$0xff]  ;;  %v1319_v13 = vadd.f32 %v10094_v61, %v1318_v49  ;;  %v1613_v19 = vmax.f32 %v1327_v57, 0.0 }
 0x174   : > { %v8934_v58 = vpop.f32.mrf.mxu0  ;;  %v8101_v60 = vpack.c.bf16 %v2059_v55, %v2059_v55  ;;  %v3979_v62 = vld [vmem:[#allocation2 + $0xc2] sm:$0xff]  ;;  %4140 = vst.msk [vmem:[#allocation7 + $0xa4] sm:$0xf] %vm2202_vm5, %v8353_v51  ;;  %v8100_v3 = vpack.c.bf16 %v2058_v5, %v2058_v5 }
 0x175   : > { %v3329_v63 = vpop.permute.xlu1 %3328  ;;  %3599 = vrot.lane.b32.xlu0 %v10169_v52, %s9427_s29  ;;  %v1340_v2 = vadd.f32 %v10094_v61, %v8934_v58  ;;  %v8352_v4 = vpack.c.bf16 %v3979_v62, %v3979_v62  ;;  %3180 = vst.msk [vmem:[#allocation7 + $0xac] sm:$0xf] %vm2202_vm5, %v8226_v59  ;;  %v1611_v30 = vmax.f32 %v1319_v13, 0.0 }
 0x176   : > { %3423 = vst.msk [vmem:[#allocation7 + $0x10] sm:$0xf] %vm2459_vm6, %v3329_v63  ;;  %v1829_v7 = vld [vmem:[#allocation5 + $0x110] ss:$2 sm:$0xff]  ;;  %v1893_v8 = vld [vmem:[#allocation5 + $0x111] ss:$2 sm:$0xff]  ;;  %v1331_v10 = vpop.f32.mrf.mxu0 }
 0x177   : > { %2220 = vst.msk [vmem:[#allocation7 + $0xcc] sm:$0xf] %vm2202_vm5, %v8101_v60  ;;  %3857 = vrot.lane.b32.xlu1 %v10171_v56, %s9428_s22  ;;  %v2878_v38 = vpop.permute.xlu0 %2877  ;;  %v1939_v12 = vmax.f32 %v1829_v7, %v1893_v8  ;;  %v1616_v14 = vmax.f32 %v1340_v2, 0.0  ;;  %v1332_v15 = vadd.f32 %v10094_v61, %v1331_v10  ;;  %2219 = vst.msk [vmem:[#allocation7 + $0xc0] sm:$0xf] %vm2202_vm5, %v8100_v3  ;;  %v3465_v10 = vld [vmem:[#allocation2 + $0xa8] sm:$0xff] }
 0x178   : > { %4139 = vst.msk [vmem:[#allocation7 + $0x98] sm:$0xf] %vm2202_vm5, %v8352_v4  ;;  %v1827_v17 = vld [vmem:[#allocation5 + $0x100] ss:$2 sm:$0xff]  ;;  %v1891_v18 = vld [vmem:[#allocation5 + $0x101] ss:$2 sm:$0xff]  ;;  %v8935_v20 = vpop.f32.mrf.mxu0 }
 0x179   : > { %2974 = vst.msk [vmem:[#allocation7] sm:$0xf] %vm2973_vm8, %v2878_v38  ;;  %v2370_v21 = vpop.permute.xlu1 %2369  ;;  %3855 = vrot.lane.b32.xlu0 %v10180_v6, %s9428_s22  ;;  %v1938_v22 = vmax.f32 %v1827_v17, %v1891_v18  ;;  %v1704_v23 = vmax.f32 %v1612_v1, %v1616_v14  ;;  %v1614_v24 = vmax.f32 %v1332_v15, 0.0  ;;  %v1343_v25 = vadd.f32 %v10094_v61, %v8935_v20 }
 0x17a   : > { %2027 = vst.msk [vmem:[#allocation2 + $0xe1] sm:$0xff] %vm1730_vm3, %v1939_v12  ;;  %v1334_v27 = vpop.f32.mrf.mxu0 }
 0x17b   : > { %2463 = vst.msk [vmem:[#allocation7 + $0x24] sm:$0xf] %vm2459_vm6, %v2370_v21  ;;  %3348 = vrot.lane.b32.xlu1 %v8255_v16, %s9426_s28  ;;  %v2368_v29 = vpop.permute.xlu0 %2367  ;;  %v1702_v31 = vmax.f32 %v1610_v9, %v1614_v24  ;;  %v1617_v32 = vmax.f32 %v1343_v25, 0.0  ;;  %v1335_v33 = vadd.f32 %v10094_v61, %v1334_v27 }
 0x17c   : > { %2026 = vst.msk [vmem:[#allocation2 + $0xd9] sm:$0xff] %vm1730_vm3, %v1938_v22  ;;  %1769 = vst.msk [vmem:[#allocation5 + $0x130] sm:$0xff] %vm1730_vm3, %v1704_v23  ;;  %v8938_v34 = vpop.f32.mrf.mxu0  ;;  %v10240_v22 = vpack.c.bf16 %v3465_v10, %v3465_v10  ;;  %v3722_v23 = vld [vmem:[#allocation2 + $0xb1] sm:$0xff] }
 0x17d   : > { %2462 = vst.msk [vmem:[#allocation7 + $0x18] sm:$0xf] %vm2459_vm6, %v2368_v29  ;;  %v2627_v35 = vpop.permute.xlu1 %2626  ;;  %3346 = vrot.lane.b32.xlu0 %v10197_v26, %s9426_s28  ;;  %v1705_v36 = vmax.f32 %v1613_v19, %v1617_v32  ;;  %v1615_v37 = vmax.f32 %v1335_v33, 0.0  ;;  %v1356_v47 = vadd.f32 %v10094_v61, %v8938_v34  ;;  %v8319_v34 = vpack.c.bf16 %v3722_v23, %v3722_v23 }
 0x17e   : > { %1767 = vst.msk [vmem:[#allocation5 + $0x120] sm:$0xff] %vm1730_vm3, %v1702_v31  ;;  %v1347_v39 = vpop.f32.mrf.mxu0  ;;  %v3721_v31 = vld [vmem:[#allocation2 + $0xa9] sm:$0xff] }
 0x17f   : > { %2720 = vst.msk [vmem:[#allocation7 + $0x24] sm:$0xf] %vm2716_vm7, %v2627_v35  ;;  %2389 = vrot.lane.b32.xlu1 %v10171_v56, %s9426_s28  ;;  %v2625_v40 = vpop.permute.xlu0 %2624  ;;  %v1703_v41 = vmax.f32 %v1611_v30, %v1615_v37  ;;  %v1348_v49 = vadd.f32 %v10094_v61, %v1347_v39  ;;  %v8285_v56 = vpack.c.bf16 %v3464_v46, %v3464_v46  ;;  %v1620_v63 = vmax.f32 %v1356_v47, 0.0  ;;  %v3211_v37 = vld [vmem:[#allocation2 + $0xb2] sm:$0xff] }
 0x180   : > { %1770 = vst.msk [vmem:[#allocation5 + $0x138] sm:$0xff] %vm1730_vm3, %v1705_v36  ;;  %v8939_v42 = vpop.f32.mrf.mxu0 }
 0x181   : > { %2719 = vst.msk [vmem:[#allocation7 + $0x18] sm:$0xf] %vm2716_vm7, %v2625_v40  ;;  %v3023_v43 = vld [vmem:[#allocation2 + $0xe1] sm:$0xff]  ;;  %v3327_v45 = vpop.permute.xlu1 %3326  ;;  %2897 = vrot.lane.b32.xlu0 %v10169_v52, %s9428_s22  ;;  %v1359_v52 = vadd.f32 %v10094_v61, %v8939_v42  ;;  %v1618_v7 = vmax.f32 %v1348_v49, 0.0 }
 0x182   : > { %1768 = vst.msk [vmem:[#allocation5 + $0x128] sm:$0xff] %vm1730_vm3, %v1703_v41  ;;  %v3982_v48 = vld [vmem:[#allocation2 + $0xe2] sm:$0xff]  ;;  %v1350_v50 = vpop.f32.mrf.mxu0  ;;  %v8229_v51 = vpack.c.bf16 %v3023_v43, %v3023_v43  ;;  %v10252_v41 = vpack.c.bf16 %v3721_v31, %v3721_v31  ;;  %v3210_v43 = vld [vmem:[#allocation2 + $0xaa] sm:$0xff] }
 0x183   : > { %3422 = vst.msk [vmem:[#allocation7 + $0x4] sm:$0xf] %vm2459_vm6, %v3327_v45  ;;  %v8355_v53 = vpack.c.bf16 %v3982_v48, %v3982_v48  ;;  %2646 = vrot.lane.b32.xlu1 %v8255_v16, %s9427_s29  ;;  %v3022_v54 = vld [vmem:[#allocation2 + $0xd9] sm:$0xff]  ;;  %v1351_v38 = vadd.f32 %v10094_v61, %v1350_v50  ;;  %v1621_v15 = vmax.f32 %v1359_v52, 0.0  ;;  %v8257_v48 = vpack.c.bf16 %v3211_v37, %v3211_v37 }
 0x184   : > { %v2061_v55 = vld [vmem:[#allocation2 + $0xe0] sm:$0xff]  ;;  %v8942_v57 = vpop.f32.mrf.mxu0  ;;  %3183 = vst.msk [vmem:[#allocation7 + $0xd0] sm:$0xf] %vm2202_vm5, %v8229_v51  ;;  %v8228_v58 = vpack.c.bf16 %v3022_v54, %v3022_v54  ;;  %v2060_v60 = vld [vmem:[#allocation2 + $0xd8] sm:$0xff]  ;;  %v10263_v52 = vpack.c.bf16 %v3210_v43, %v3210_v43 }
 0x185   : > { %v8103_v59 = vpack.c.bf16 %v2061_v55, %v2061_v55  ;;  %v3981_v5 = vld [vmem:[#allocation2 + $0xda] sm:$0xff]  ;;  %4142 = vst.msk [vmem:[#allocation7 + $0xbc] sm:$0xf] %vm2202_vm5, %v8355_v53  ;;  %v2880_v62 = vpop.permute.xlu1 %2879  ;;  %2387 = vrot.lane.b32.xlu0 %v10180_v6, %s9426_s28  ;;  %v1372_v0 = vadd.f32 %v10094_v61, %v8942_v57  ;;  %v8102_v1 = vpack.c.bf16 %v2060_v60, %v2060_v60  ;;  %v1619_v27 = vmax.f32 %v1351_v38, 0.0 }
 0x186   : > { %v8354_v2 = vpack.c.bf16 %v3981_v5, %v3981_v5  ;;  %2975 = vst.msk [vmem:[#allocation7 + $0xc] sm:$0xf] %vm2973_vm8, %v2880_v62  ;;  %v1363_v8 = vpop.f32.mrf.mxu0 }
 0x187   : > { %v1833_v3 = vld [vmem:[#allocation5 + $0x130] ss:$2 sm:$0xff]  ;;  %v1897_v4 = vld [vmem:[#allocation5 + $0x131] ss:$2 sm:$0xff]  ;;  %3182 = vst.msk [vmem:[#allocation7 + $0xc4] sm:$0xf] %vm2202_vm5, %v8228_v58  ;;  %3601 = vrot.lane.b32.xlu1 %v8285_v56, %s9427_s29  ;;  %v3584_v9 = vpop.permute.xlu0 %3583  ;;  %v1364_v12 = vadd.f32 %v10094_v61, %v1363_v8 }
 0x188   : > { %2222 = vst.msk [vmem:[#allocation7 + $0xe4] sm:$0xf] %vm2202_vm5, %v8103_v59  ;;  %v1941_v6 = vmax.f32 %v1833_v3, %v1897_v4  ;;  %v1624_v11 = vmax.f32 %v1372_v0, 0.0  ;;  %2221 = vst.msk [vmem:[#allocation7 + $0xd8] sm:$0xf] %vm2202_vm5, %v8102_v1  ;;  %v8943_v16 = vpop.f32.mrf.mxu0 }
 0x189   : > { %4141 = vst.msk [vmem:[#allocation7 + $0xb0] sm:$0xf] %vm2202_vm5, %v8354_v2  ;;  %v1831_v13 = vld [vmem:[#allocation5 + $0x120] ss:$2 sm:$0xff]  ;;  %v1895_v14 = vld [vmem:[#allocation5 + $0x121] ss:$2 sm:$0xff]  ;;  %v10234_v17 = vpop.permute.xlu1 %3841  ;;  %2644 = vrot.lane.b32.xlu0 %v10197_v26, %s9427_s29  ;;  %v1375_v21 = vadd.f32 %v10094_v61, %v8943_v16 }
 0x18a   : > { %3679 = vst.msk [vmem:[#allocation7 + $0x4] sm:$0xf] %vm2716_vm7, %v3584_v9  ;;  %v1940_v18 = vmax.f32 %v1831_v13, %v1895_v14  ;;  %v1708_v19 = vmax.f32 %v1620_v63, %v1624_v11  ;;  %v1622_v20 = vmax.f32 %v1364_v12, 0.0  ;;  %v1366_v24 = vpop.f32.mrf.mxu0 }
 0x18b   : > { %2029 = vst.msk [vmem:[#allocation2 + $0xf9] sm:$0xff] %vm1730_vm3, %v1941_v6  ;;  %2899 = vrot.lane.b32.xlu1 %v8285_v56, %s9428_s22  ;;  %v3840_v25 = vpop.permute.xlu0 %3839  ;;  %v1625_v29 = vmax.f32 %v1375_v21, 0.0  ;;  %v1367_v30 = vadd.f32 %v10094_v61, %v1366_v24 }
 0x18c   : > { %2028 = vst.msk [vmem:[#allocation2 + $0xf1] sm:$0xff] %vm1730_vm3, %v1940_v18  ;;  %1773 = vst.msk [vmem:[#allocation5 + $0x150] sm:$0xff] %vm1730_vm3, %v1708_v19  ;;  %v1706_v26 = vmax.f32 %v1618_v7, %v1622_v20  ;;  %v8946_v32 = vpop.f32.mrf.mxu0 }
 0x18d   : > { %3935 = vst.msk [vmem:[#allocation7 + $0x4] sm:$0xf] %vm2973_vm8, %v3840_v25  ;;  %v3333_v33 = vpop.permute.xlu1 %3332  ;;  %3603 = vrot.lane.b32.xlu0 %v10240_v22, %s9427_s29  ;;  %v1709_v35 = vmax.f32 %v1621_v15, %v1625_v29  ;;  %v1623_v36 = vmax.f32 %v1367_v30, 0.0  ;;  %v1388_v49 = vadd.f32 %v10094_v61, %v8946_v32 }
 0x18e   : > { %1771 = vst.msk [vmem:[#allocation5 + $0x140] sm:$0xff] %vm1730_vm3, %v1706_v26  ;;  %v1379_v39 = vpop.f32.mrf.mxu0 }
 0x18f   : > { %3425 = vst.msk [vmem:[#allocation7 + $0x28] sm:$0xf] %vm2459_vm6, %v3333_v33  ;;  %3861 = vrot.lane.b32.xlu1 %v8319_v34, %s9428_s22  ;;  %v3331_v40 = vpop.permute.xlu0 %3330  ;;  %v1707_v42 = vmax.f32 %v1619_v27, %v1623_v36  ;;  %v1380_v51 = vadd.f32 %v10094_v61, %v1379_v39  ;;  %v1628_v2 = vmax.f32 %v1388_v49, 0.0  ;;  %v3466_v27 = vld [vmem:[#allocation2 + $0xb0] sm:$0xff] }
 0x190   : > { %1774 = vst.msk [vmem:[#allocation5 + $0x158] sm:$0xff] %vm1730_vm3, %v1709_v35  ;;  %v8947_v45 = vpop.f32.mrf.mxu0  ;;  %v9194_v49 = vld [vmem:[#allocation7] ss:$12 sps:$4 sm:$0xff]  }
 0x191   : > { %3424 = vst.msk [vmem:[#allocation7 + $0x1c] sm:$0xf] %vm2459_vm6, %v3331_v40  ;;  %v2374_v47 = vpop.permute.xlu1 %2373  ;;  %3859 = vrot.lane.b32.xlu0 %v10252_v41, %s9428_s22  ;;  %v1391_v59 = vadd.f32 %v10094_v61, %v8947_v45  ;;  %v1626_v10 = vmax.f32 %v1380_v51, 0.0 }
 0x192   : > { %v3025_v46 = vld [vmem:[#allocation2 + $0xf9] sm:$0xff]  ;;  %1772 = vst.msk [vmem:[#allocation5 + $0x148] sm:$0xff] %vm1730_vm3, %v1707_v42  ;;  %v1382_v53 = vpop.f32.mrf.mxu0 }
 0x193   : > { %v3984_v50 = vld [vmem:[#allocation2 + $0xfa] sm:$0xff]  ;;  %2465 = vst.msk [vmem:[#allocation7 + $0x3c] sm:$0xf] %vm2459_vm6, %v2374_v47  ;;  %v8231_v54 = vpack.c.bf16 %v3025_v46, %v3025_v46  ;;  %3352 = vrot.lane.b32.xlu1 %v8257_v48, %s9426_s28  ;;  %v2882_v56 = vpop.permute.xlu0 %2881  ;;  %v3024_v58 = vld [vmem:[#allocation2 + $0xf1] sm:$0xff]  ;;  %v1383_v12 = vadd.f32 %v10094_v61, %v1382_v53  ;;  %v1629_v18 = vmax.f32 %v1391_v59, 0.0  ;;  %v3724_v46 = vld [vmem:[#allocation2 + $0xc9] sm:$0xff] }
 0x194   : > { %v8357_v55 = vpack.c.bf16 %v3984_v50, %v3984_v50  ;;  %v3472_v57 = vld [vmem:[#allocation2 + $0xf8] sm:$0xff]  ;;  %2976 = vst.msk [vmem:[#allocation7 + $0x18] sm:$0xf] %vm2973_vm8, %v2882_v56  ;;  %v8950_v60 = vpop.f32.mrf.mxu0  ;;  %v8230_v62 = vpack.c.bf16 %v3024_v58, %v3024_v58  ;;  %v2062_v63 = vld [vmem:[#allocation2 + $0xf0] sm:$0xff]  ;;  %v3467_v42 = vld [vmem:[#allocation2 + $0xc0] sm:$0xff]  ;;  %v10316_v58 = vpack.c.bf16 %v3724_v46, %v3724_v46 }
 0x195   : > { %v10267_v5 = vpack.c.bf16 %v3472_v57, %v3472_v57  ;;  %3185 = vst.msk [vmem:[#allocation7 + $0xe8] sm:$0xf] %vm2202_vm5, %v8231_v54  ;;  %v3983_v0 = vld [vmem:[#allocation2 + $0xf2] sm:$0xff]  ;;  %v2631_v1 = vpop.permute.xlu1 %2630  ;;  %3350 = vrot.lane.b32.xlu0 %v10263_v52, %s9426_s28  ;;  %v1404_v3 = vadd.f32 %v10094_v61, %v8950_v60  ;;  %v8104_v4 = vpack.c.bf16 %v2062_v63, %v2062_v63 }
 0x196   : > { %4144 = vst.msk [vmem:[#allocation7 + $0xd4] sm:$0xf] %vm2202_vm5, %v8357_v55  ;;  %v8356_v7 = vpack.c.bf16 %v3983_v0, %v3983_v0  ;;  %v1395_v6 = vpop.f32.mrf.mxu0  ;;  %3184 = vst.msk [vmem:[#allocation7 + $0xdc] sm:$0xf] %vm2202_vm5, %v8230_v62  ;;  %v10313_v57 = vpack.c.bf16 %v3467_v42, %v3467_v42 }
 0x197   : > { %2722 = vst.msk [vmem:[#allocation7 + $0x3c] sm:$0xf] %vm2716_vm7, %v2631_v1  ;;  %v1837_v8 = vld [vmem:[#allocation5 + $0x150] ss:$2 sm:$0xff]  ;;  %v1901_v9 = vld [vmem:[#allocation5 + $0x151] ss:$2 sm:$0xff]  ;;  %2393 = vrot.lane.b32.xlu1 %v8319_v34, %s9426_s28  ;;  %v2372_v38 = vpop.permute.xlu0 %2371  ;;  %v1396_v14 = vadd.f32 %v10094_v61, %v1395_v6 }
 0x198   : > { %2224 = vst.msk [vmem:[#allocation7 + $0xfc] sm:$0xf] %vm2202_vm5, %v10267_v5  ;;  %v1943_v11 = vmax.f32 %v1837_v8, %v1901_v9  ;;  %v1632_v13 = vmax.f32 %v1404_v3, 0.0  ;;  %2223 = vst.msk [vmem:[#allocation7 + $0xf0] sm:$0xf] %vm2202_vm5, %v8104_v4  ;;  %v8951_v19 = vpop.f32.mrf.mxu0 }
 0x199   : > { %4143 = vst.msk [vmem:[#allocation7 + $0xc8] sm:$0xf] %vm2202_vm5, %v8356_v7  ;;  %v1835_v15 = vld [vmem:[#allocation5 + $0x140] ss:$2 sm:$0xff]  ;;  %v1899_v16 = vld [vmem:[#allocation5 + $0x141] ss:$2 sm:$0xff]  ;;  %v3586_v20 = vpop.permute.xlu1 %3585  ;;  %2901 = vrot.lane.b32.xlu0 %v10240_v22, %s9428_s22  ;;  %v1407_v25 = vadd.f32 %v10094_v61, %v8951_v19 }
 0x19a   : > { %2464 = vst.msk [vmem:[#allocation7 + $0x30] sm:$0xf] %vm2459_vm6, %v2372_v38  ;;  %v1942_v21 = vmax.f32 %v1835_v15, %v1899_v16  ;;  %v1712_v23 = vmax.f32 %v1628_v2, %v1632_v13  ;;  %v1630_v24 = vmax.f32 %v1396_v14, 0.0  ;;  %v1398_v26 = vpop.f32.mrf.mxu0  ;;  %v1627_v22 = vmax.f32 %v1383_v12, 0.0  ;;  %v3213_v2 = vld [vmem:[#allocation2 + $0xca] sm:$0xff]  ;;  %v3212_v16 = vld [vmem:[#allocation2 + $0xc2] sm:$0xff] }
 0x19b   : > { %2031 = vst.msk [vmem:[#allocation2 + $0x111] sm:$0xff] %vm1730_vm3, %v1943_v11  ;;  %2650 = vrot.lane.b32.xlu1 %v8257_v48, %s9427_s29  ;;  %v2629_v29 = vpop.permute.xlu0 %2628  ;;  %v1633_v31 = vmax.f32 %v1407_v25, 0.0  ;;  %v1399_v32 = vadd.f32 %v10094_v61, %v1398_v26 }
 0x19c   : > { %3680 = vst.msk [vmem:[#allocation7 + $0x10] sm:$0xf] %vm2716_vm7, %v3586_v20  ;;  %v1710_v30 = vmax.f32 %v1626_v10, %v1630_v24  ;;  %2721 = vst.msk [vmem:[#allocation7 + $0x30] sm:$0xf] %vm2716_vm7, %v2629_v29  ;;  %v8954_v33 = vpop.f32.mrf.mxu0 }
 0x19d   : > { %3936 = vst.msk [vmem:[#allocation7 + $0x10] sm:$0xf] %vm2973_vm8, %v10234_v17  ;;  %v2884_v34 = vpop.permute.xlu1 %2883  ;;  %2391 = vrot.lane.b32.xlu0 %v10252_v41, %s9426_s28  ;;  %v8287_v17 = vpack.c.bf16 %v3466_v27, %v3466_v27  ;;  %v1713_v35 = vmax.f32 %v1629_v18, %v1633_v31  ;;  %v1631_v36 = vmax.f32 %v1399_v32, 0.0  ;;  %v1420_v47 = vadd.f32 %v10094_v61, %v8954_v33 }
 0x19e   : > { %2030 = vst.msk [vmem:[#allocation2 + $0x109] sm:$0xff] %vm1730_vm3, %v1942_v21  ;;  %1777 = vst.msk [vmem:[#allocation5 + $0x170] sm:$0xff] %vm1730_vm3, %v1712_v23  ;;  %v1411_v37 = vpop.f32.mrf.mxu0  ;;  %v8259_v23 = vpack.c.bf16 %v3213_v2, %v3213_v2  ;;  %v10348_v33 = vpack.c.bf16 %v3212_v16, %v3212_v16  ;;  %v3469_v16 = vld [vmem:[#allocation2 + $0xd8] sm:$0xff] }
 0x19f   : > { %1775 = vst.msk [vmem:[#allocation5 + $0x160] sm:$0xff] %vm1730_vm3, %v1710_v30  ;;  %3605 = vrot.lane.b32.xlu1 %v8287_v17, %s9427_s29  ;;  %v3588_v39 = vpop.permute.xlu0 %3587  ;;  %1778 = vst.msk [vmem:[#allocation5 + $0x178] sm:$0xff] %vm1730_vm3, %v1713_v35  ;;  %v1711_v40 = vmax.f32 %v1627_v22, %v1631_v36  ;;  %v10310_v51 = vadd.f32 %v10094_v61, %v1411_v37  ;;  %v1636_v3 = vmax.f32 %v1420_v47, 0.0 }
 0x1a0   : > { %2977 = vst.msk [vmem:[#allocation7 + $0x24] sm:$0xf] %vm2973_vm8, %v2884_v34  ;;  %v8955_v43 = vpop.f32.mrf.mxu0 }
 0x1a1   : > { %3681 = vst.msk [vmem:[#allocation7 + $0x1c] sm:$0xf] %vm2716_vm7, %v3588_v39  ;;  %v10303_v41 = vpop.permute.xlu1 %3845  ;;  %2648 = vrot.lane.b32.xlu0 %v10263_v52, %s9427_s29  ;;  %v3723_v52 = vld [vmem:[#allocation2 + $0xc1] sm:$0xff]  ;;  %v10319_v59 = vadd.f32 %v10094_v61, %v8955_v43  ;;  %v1634_v11 = vmax.f32 %v10310_v51, 0.0 }
 0x1a2   : > { %v3027_v45 = vld [vmem:[#allocation2 + $0x111] sm:$0xff]  ;;  %1776 = vst.msk [vmem:[#allocation5 + $0x168] sm:$0xff] %vm1730_vm3, %v1711_v40  ;;  %v1414_v53 = vpop.f32.mrf.mxu0  ;;  %v10329_v10 = vpack.c.bf16 %v3723_v52, %v3723_v52 }
 0x1a3   : > { %v3986_v48 = vld [vmem:[#allocation2 + $0x112] sm:$0xff]  ;;  %v8233_v54 = vpack.c.bf16 %v3027_v45, %v3027_v45  ;;  %2903 = vrot.lane.b32.xlu1 %v8287_v17, %s9428_s22  ;;  %v3844_v56 = vpop.permute.xlu0 %3843  ;;  %v1415_v19 = vadd.f32 %v10094_v61, %v1414_v53  ;;  %v1637_v27 = vmax.f32 %v10319_v59, 0.0  ;;  %v10369_v53 = vld [vmem:[%s11659_s2] ss:$0 sm:$0xff] }
 0x1a4   : > { %v9196_v50 = vld [vmem:[#allocation7 + $0x4] ss:$12 sps:$4 sm:$0xff]   ;;  %v8359_v55 = vpack.c.bf16 %v3986_v48, %v3986_v48  ;;  %3937 = vst.msk [vmem:[#allocation7 + $0x1c] sm:$0xf] %vm2973_vm8, %v3844_v56  ;;  %v8958_v60 = vpop.f32.mrf.mxu0  ;;  %v3468_v56 = vld [vmem:[#allocation2 + $0xc8] sm:$0xff] }
 0x1a5   : > { %4694 = vmatprep.mubr.bf16.mxu1 %v9196_v50  ;;  %v3474_v62 = vld [vmem:[#allocation2 + $0x110] sm:$0xff]  ;;  %3187 = vst.msk [vmem:[#allocation7 + $0x100] sm:$0xf] %vm2202_vm5, %v8233_v54  ;;  %v2064_v0 = vld [vmem:[#allocation2 + $0x108] sm:$0xff]  ;;  %v3337_v1 = vpop.permute.xlu1 %3336  ;;  %3607 = vrot.lane.b32.xlu0 %v10313_v57, %s9427_s29  ;;  %v1436_v4 = vadd.f32 %v10094_v61, %v8958_v60  ;;  %v1635_v35 = vmax.f32 %v1415_v19, 0.0 }
 0x1a6   : > { %v3026_v63 = vld [vmem:[#allocation2 + $0x109] sm:$0xff]  ;;  %4146 = vst.msk [vmem:[#allocation7 + $0xec] sm:$0xf] %vm2202_vm5, %v8359_v55  ;;  %4695 = vmatmul.mubr.bf16.vlgmr.msra.gmra.mxu1 %v9194_v49  ;;  %v10326_v7 = vpack.c.bf16 %v3474_v62, %v3474_v62  ;;  %v1427_v12 = vpop.f32.mrf.mxu0  ;;  %v8106_v13 = vpack.c.bf16 %v2064_v0, %v2064_v0 }
 0x1a7   : > { %v8232_v8 = vpack.c.bf16 %v3026_v63, %v3026_v63  ;;  %v3985_v9 = vld [vmem:[#allocation2 + $0x10a] sm:$0xff]  ;;  %3427 = vst.msk [vmem:[#allocation7 + $0x40] sm:$0xf] %vm2459_vm6, %v3337_v1  ;;  %3865 = vrot.lane.b32.xlu1 %v10316_v58, %s9428_s22  ;;  %v3335_v15 = vpop.permute.xlu0 %3334  ;;  %v1640_v20 = vmax.f32 %v1436_v4, 0.0  ;;  %v1428_v21 = vadd.f32 %v10094_v61, %v1427_v12 }
 0x1a8   : > { %v1841_v6 = vld [vmem:[#allocation5 + $0x170] ss:$2 sm:$0xff]  ;;  %v1905_v38 = vld [vmem:[#allocation5 + $0x171] ss:$2 sm:$0xff]  ;;  %v8358_v14 = vpack.c.bf16 %v3985_v9, %v3985_v9  ;;  %2226 = vst.msk [vmem:[#allocation7 + $0x114] sm:$0xf] %vm2202_vm5, %v10326_v7  ;;  %v8959_v26 = vpop.f32.mrf.mxu0 }
 0x1a9   : > { %v1945_v18 = vmax.f32 %v1841_v6, %v1905_v38  ;;  %3186 = vst.msk [vmem:[#allocation7 + $0xf4] sm:$0xf] %vm2202_vm5, %v8232_v8  ;;  %v1839_v24 = vld [vmem:[#allocation5 + $0x160] ss:$2 sm:$0xff]  ;;  %v1903_v25 = vld [vmem:[#allocation5 + $0x161] ss:$2 sm:$0xff]  ;;  %v2378_v29 = vpop.permute.xlu1 %2377  ;;  %3863 = vrot.lane.b32.xlu0 %v10329_v10, %s9428_s22  ;;  %v1716_v30 = vmax.f32 %v1636_v3, %v1640_v20  ;;  %v1439_v32 = vadd.f32 %v10094_v61, %v8959_v26 }
 0x1aa   : > { %3426 = vst.msk [vmem:[#allocation7 + $0x34] sm:$0xf] %vm2459_vm6, %v3335_v15  ;;  %v1944_v22 = vmax.f32 %v1839_v24, %v1903_v25  ;;  %v1638_v31 = vmax.f32 %v1428_v21, 0.0  ;;  %2467 = vst.msk [vmem:[#allocation7 + $0x54] sm:$0xf] %vm2459_vm6, %v2378_v29  ;;  %v1430_v34 = vpop.f32.mrf.mxu0  ;;  %v8289_v6 = vpack.c.bf16 %v3468_v56, %v3468_v56  ;;  %v3726_v29 = vld [vmem:[#allocation2 + $0xe1] sm:$0xff] }
 0x1ab   : > { %2225 = vst.msk [vmem:[#allocation7 + $0x108] sm:$0xf] %vm2202_vm5, %v8106_v13  ;;  %4145 = vst.msk [vmem:[#allocation7 + $0xe0] sm:$0xf] %vm2202_vm5, %v8358_v14  ;;  %3356 = vrot.lane.b32.xlu1 %v8259_v23, %s9426_s28  ;;  %v2886_v17 = vpop.permute.xlu0 %2885  ;;  %v1641_v37 = vmax.f32 %v1439_v32, 0.0  ;;  %v1431_v39 = vadd.f32 %v10094_v61, %v1430_v34  ;;  %v10411_v34 = vpack.c.bf16 %v3469_v16, %v3469_v16 }
 0x1ac   : > { %2033 = vst.msk [vmem:[#allocation2 + $0x129] sm:$0xff] %vm1730_vm3, %v1945_v18  ;;  %2032 = vst.msk [vmem:[#allocation2 + $0x121] sm:$0xff] %vm1730_vm3, %v1944_v22  ;;  %v1714_v36 = vmax.f32 %v1634_v11, %v1638_v31  ;;  %v8962_v40 = vpop.f32.mrf.mxu0 }
 0x1ad   : > { %1781 = vst.msk [vmem:[#allocation5 + $0x190] sm:$0xff] %vm1730_vm3, %v1716_v30  ;;  %v2635_v42 = vpop.permute.xlu1 %2634  ;;  %3354 = vrot.lane.b32.xlu0 %v10348_v33, %s9426_s28  ;;  %v1717_v43 = vmax.f32 %v1637_v27, %v1641_v37  ;;  %v1639_v45 = vmax.f32 %v1431_v39, 0.0  ;;  %v1452_v54 = vadd.f32 %v10369_v53, %v8962_v40 }
 0x1ae   : > { %2978 = vst.msk [vmem:[#allocation7 + $0x30] sm:$0xf] %vm2973_vm8, %v2886_v17  ;;  %v1443_v46 = vpop.f32.mrf.mxu0 }
 0x1af   : > { %1779 = vst.msk [vmem:[#allocation5 + $0x180] sm:$0xff] %vm1730_vm3, %v1714_v36  ;;  %2397 = vrot.lane.b32.xlu1 %v10316_v58, %s9426_s28  ;;  %v2376_v47 = vpop.permute.xlu0 %2375  ;;  %1782 = vst.msk [vmem:[#allocation5 + $0x198] sm:$0xff] %vm1730_vm3, %v1717_v43  ;;  %v1715_v61 = vmax.f32 %v1635_v35, %v1639_v45  ;;  %v10376_v52 = vadd.f32 %v10369_v53, %v1443_v46  ;;  %v1644_v38 = vmax.f32 %v1452_v54, 0.0  ;;  %v9199_v35 = vld [vmem:[#allocation7 + $0x18] ss:$12 sps:$4 sm:$0xff]   ;;  %v3725_v43 = vld [vmem:[#allocation2 + $0xd9] sm:$0xff] }
 0x1b0   : > { %2724 = vst.msk [vmem:[#allocation7 + $0x54] sm:$0xf] %vm2716_vm7, %v2635_v42  ;;  %v8963_v48 = vpop.f32.mrf.mxu0  ;;  %v10423_v54 = vpack.c.bf16 %v3725_v43, %v3725_v43 }
 0x1b1   : > { %2466 = vst.msk [vmem:[#allocation7 + $0x48] sm:$0xf] %vm2459_vm6, %v2376_v47  ;;  %v3590_v51 = vpop.permute.xlu1 %3589  ;;  %2905 = vrot.lane.b32.xlu0 %v10313_v57, %s9428_s22  ;;  %v1455_v2 = vadd.f32 %v10369_v53, %v8963_v48  ;;  %v1642_v14 = vmax.f32 %v10376_v52, 0.0  ;;  %v8323_v47 = vpack.c.bf16 %v3726_v29, %v3726_v29  ;;  %v3214_v52 = vld [vmem:[#allocation2 + $0xda] sm:$0xff] }
 0x1b2   : > { %1780 = vst.msk [vmem:[#allocation5 + $0x188] sm:$0xff] %vm1730_vm3, %v1715_v61  ;;  %v1446_v58 = vpop.f32.mrf.mxu0 }
 0x1b3   : > { %v3732_v49 = vld [vmem:[#allocation2 + $0x129] sm:$0xff]  ;;  %3682 = vst.msk [vmem:[#allocation7 + $0x28] sm:$0xf] %vm2716_vm7, %v3590_v51  ;;  %v3731_v59 = vld [vmem:[#allocation2 + $0x121] sm:$0xff]  ;;  %2654 = vrot.lane.b32.xlu1 %v8259_v23, %s9427_s29  ;;  %v2633_v60 = vpop.permute.xlu0 %2632  ;;  %v1447_v19 = vadd.f32 %v10369_v53, %v1446_v58  ;;  %v1645_v25 = vmax.f32 %v1455_v2, 0.0 }
 0x1b4   : > { %v3988_v50 = vld [vmem:[#allocation2 + $0x12a] sm:$0xff]  ;;  %v10372_v55 = vpack.c.bf16 %v3732_v49, %v3732_v49  ;;  %3938 = vst.msk [vmem:[#allocation7 + $0x28] sm:$0xf] %vm2973_vm8, %v10303_v41  ;;  %v10381_v62 = vpack.c.bf16 %v3731_v59, %v3731_v59  ;;  %v2066_v0 = vld [vmem:[#allocation2 + $0x120] sm:$0xff]  ;;  %v8966_v3 = vpop.f32.mrf.mxu0 }
 0x1b5   : > { %v8361_v57 = vpack.c.bf16 %v3988_v50, %v3988_v50  ;;  %v3476_v63 = vld [vmem:[#allocation2 + $0x128] sm:$0xff]  ;;  %2723 = vst.msk [vmem:[#allocation7 + $0x48] sm:$0xf] %vm2716_vm7, %v2633_v60  ;;  %v8108_v8 = vpack.c.bf16 %v2066_v0, %v2066_v0  ;;  %v2888_v9 = vpop.permute.xlu1 %2887  ;;  %2395 = vrot.lane.b32.xlu0 %v10329_v10, %s9426_s28  ;;  %v1468_v11 = vadd.f32 %v10369_v53, %v8966_v3  ;;  %v1643_v39 = vmax.f32 %v1447_v19, 0.0 }
 0x1b6   : > { %3189 = vst.msk [vmem:[#allocation7 + $0x118] sm:$0xf] %vm2202_vm5, %v10372_v55  ;;  %v3987_v1 = vld [vmem:[#allocation2 + $0x122] sm:$0xff]  ;;  %v10387_v4 = vpack.c.bf16 %v3476_v63, %v3476_v63  ;;  %3188 = vst.msk [vmem:[#allocation7 + $0x10c] sm:$0xf] %vm2202_vm5, %v10381_v62  ;;  %v1459_v15 = vpop.f32.mrf.mxu0 }
 0x1b7   : > { %v8360_v41 = vpack.c.bf16 %v3987_v1, %v3987_v1  ;;  %4148 = vst.msk [vmem:[#allocation7 + $0x104] sm:$0xf] %vm2202_vm5, %v8361_v57  ;;  %v1845_v12 = vld [vmem:[#allocation5 + $0x190] ss:$2 sm:$0xff]  ;;  %v1909_v13 = vld [vmem:[#allocation5 + $0x191] ss:$2 sm:$0xff]  ;;  %3609 = vrot.lane.b32.xlu1 %v8289_v6, %s9427_s29  ;;  %v3592_v10 = vpop.permute.xlu0 %3591  ;;  %v1460_v21 = vadd.f32 %v10369_v53, %v1459_v15 }
 0x1b8   : > { %2979 = vst.msk [vmem:[#allocation7 + $0x3c] sm:$0xf] %vm2973_vm8, %v2888_v9  ;;  %v1947_v18 = vmax.f32 %v1845_v12, %v1909_v13  ;;  %v1648_v20 = vmax.f32 %v1468_v11, 0.0  ;;  %v8967_v27 = vpop.f32.mrf.mxu0  ;;  %v3215_v49 = vld [vmem:[#allocation2 + $0xe2] sm:$0xff] }
 0x1b9   : > { %2228 = vst.msk [vmem:[#allocation7 + $0x12c] sm:$0xf] %vm2202_vm5, %v10387_v4  ;;  %2227 = vst.msk [vmem:[#allocation7 + $0x120] sm:$0xf] %vm2202_vm5, %v8108_v8  ;;  %v1843_v23 = vld [vmem:[#allocation5 + $0x180] ss:$2 sm:$0xff]  ;;  %v10405_v26 = vpop.permute.xlu1 %3849  ;;  %2652 = vrot.lane.b32.xlu0 %v10348_v33, %s9427_s29  ;;  %v1471_v32 = vadd.f32 %v10369_v53, %v8967_v27  ;;  %v8261_v63 = vpack.c.bf16 %v3215_v49, %v3215_v49 }
 0x1ba   : > { %4147 = vst.msk [vmem:[#allocation7 + $0xf8] sm:$0xf] %vm2202_vm5, %v8360_v41  ;;  %v1907_v24 = vld [vmem:[#allocation5 + $0x181] ss:$2 sm:$0xff]  ;;  %v1720_v30 = vmax.f32 %v1644_v38, %v1648_v20  ;;  %v1646_v31 = vmax.f32 %v1460_v21, 0.0  ;;  %v1462_v36 = vpop.f32.mrf.mxu0  ;;  %v10436_v38 = vpack.c.bf16 %v3214_v52, %v3214_v52 }
 0x1bb   : > { %3683 = vst.msk [vmem:[#allocation7 + $0x34] sm:$0xf] %vm2716_vm7, %v3592_v10  ;;  %v1946_v22 = vmax.f32 %v1843_v23, %v1907_v24  ;;  %v9197_v17 = vld [vmem:[#allocation7 + $0x1c] ss:$12 sps:$4 sm:$0xff]   ;;  %2907 = vrot.lane.b32.xlu1 %v8289_v6, %s9428_s22  ;;  %v3848_v37 = vpop.permute.xlu0 %3847  ;;  %v1649_v40 = vmax.f32 %v1471_v32, 0.0  ;;  %v1463_v42 = vadd.f32 %v10369_v53, %v1462_v36 }
 0x1bc   : > { %2035 = vst.msk [vmem:[#allocation2 + $0x141] sm:$0xff] %vm1730_vm3, %v1947_v18  ;;  %1785 = vst.msk [vmem:[#allocation5 + $0x1b0] sm:$0xff] %vm1730_vm3, %v1720_v30  ;;  %v1718_v33 = vmax.f32 %v1642_v14, %v1646_v31  ;;  %4702 = vmatprep.mubr.bf16.mxu1 %v9197_v17  ;;  %v8970_v45 = vpop.f32.mrf.mxu0 }
 0x1bd   : > { %2034 = vst.msk [vmem:[#allocation2 + $0x139] sm:$0xff] %vm1730_vm3, %v1946_v22  ;;  %v3341_v46 = vpop.permute.xlu1 %3340  ;;  %3611 = vrot.lane.b32.xlu0 %v10411_v34, %s9427_s29  ;;  %4703 = vmatmul.mubr.bf16.gmra.mxu1 %v9199_v35  ;;  %v1721_v61 = vmax.f32 %v1645_v25, %v1649_v40  ;;  %v1647_v48 = vmax.f32 %v1463_v42, 0.0  ;;  %v1484_v0 = vadd.f32 %v10369_v53, %v8970_v45  ;;  %v3470_v45 = vld [vmem:[#allocation2 + $0xe0] sm:$0xff] }
 0x1be   : > { %3939 = vst.msk [vmem:[#allocation7 + $0x34] sm:$0xf] %vm2973_vm8, %v3848_v37  ;;  %v1475_v50 = vpop.f32.mrf.mxu0 }
 0x1bf   : > { %1783 = vst.msk [vmem:[#allocation5 + $0x1a0] sm:$0xff] %vm1730_vm3, %v1718_v33  ;;  %3869 = vrot.lane.b32.xlu1 %v8323_v47, %s9428_s22  ;;  %v3339_v51 = vpop.permute.xlu0 %3338  ;;  %1786 = vst.msk [vmem:[#allocation5 + $0x1b8] sm:$0xff] %vm1730_vm3, %v1721_v61  ;;  %v1719_v56 = vmax.f32 %v1643_v39, %v1647_v48  ;;  %v1476_v2 = vadd.f32 %v10369_v53, %v1475_v50  ;;  %v1652_v20 = vmax.f32 %v1484_v0, 0.0 }
 0x1c0   : > { %3429 = vst.msk [vmem:[#allocation7 + $0x58] sm:$0xf] %vm2459_vm6, %v3341_v46  ;;  %3428 = vst.msk [vmem:[#allocation7 + $0x4c] sm:$0xf] %vm2459_vm6, %v3339_v51  ;;  %v8971_v58 = vpop.f32.mrf.mxu0 }
 0x1c1   : > { %v2382_v60 = vpop.permute.xlu1 %2381  ;;  %3867 = vrot.lane.b32.xlu0 %v10423_v54, %s9428_s22  ;;  %1784 = vst.msk [vmem:[#allocation5 + $0x1a8] sm:$0xff] %vm1730_vm3, %v1719_v56  ;;  %v1487_v15 = vadd.f32 %v10369_v53, %v8971_v58  ;;  %v1650_v25 = vmax.f32 %v1476_v2, 0.0 }
 0x1c2   : > { %2469 = vst.msk [vmem:[#allocation7 + $0x6c] sm:$0xf] %vm2459_vm6, %v2382_v60  ;;  %v1478_v8 = vpop.f32.mrf.mxu0  ;;  %v3471_v60 = vld [vmem:[#allocation2 + $0xf0] sm:$0xff] }
 0x1c3   : > { %v3734_v59 = vld [vmem:[#allocation2 + $0x141] sm:$0xff]  ;;  %3360 = vrot.lane.b32.xlu1 %v8261_v63, %s9426_s28  ;;  %v2890_v6 = vpop.permute.xlu0 %2889  ;;  %v1479_v30 = vadd.f32 %v10369_v53, %v1478_v8  ;;  %v1653_v36 = vmax.f32 %v1487_v15, 0.0 }
 0x1c4   : > { %v3990_v57 = vld [vmem:[#allocation2 + $0x142] sm:$0xff]  ;;  %v10431_v1 = vpack.c.bf16 %v3734_v59, %v3734_v59  ;;  %v3477_v3 = vld [vmem:[#allocation2 + $0x138] sm:$0xff]  ;;  %2980 = vst.msk [vmem:[#allocation7 + $0x48] sm:$0xf] %vm2973_vm8, %v2890_v6  ;;  %v8974_v10 = vpop.f32.mrf.mxu0 }
 0x1c5   : > { %v3733_v41 = vld [vmem:[#allocation2 + $0x139] sm:$0xff]  ;;  %v8363_v9 = vpack.c.bf16 %v3990_v57, %v3990_v57  ;;  %v10438_v11 = vpack.c.bf16 %v3477_v3, %v3477_v3  ;;  %v2639_v19 = vpop.permute.xlu1 %2638  ;;  %3358 = vrot.lane.b32.xlu0 %v10436_v38, %s9426_s28  ;;  %v1500_v21 = vadd.f32 %v10369_v53, %v8974_v10 }
 0x1c6   : > { %v10440_v12 = vpack.c.bf16 %v3733_v41, %v3733_v41  ;;  %v3478_v13 = vld [vmem:[#allocation2 + $0x140] sm:$0xff]  ;;  %3191 = vst.msk [vmem:[#allocation7 + $0x130] sm:$0xf] %vm2202_vm5, %v10431_v1  ;;  %v1491_v27 = vpop.f32.mrf.mxu0 }
 0x1c7   : > { %v3989_v14 = vld [vmem:[#allocation2 + $0x13a] sm:$0xff]  ;;  %v10446_v16 = vpack.c.bf16 %v3478_v13, %v3478_v13  ;;  %4150 = vst.msk [vmem:[#allocation7 + $0x11c] sm:$0xf] %vm2202_vm5, %v8363_v9  ;;  %2229 = vst.msk [vmem:[#allocation7 + $0x138] sm:$0xf] %vm2202_vm5, %v10438_v11  ;;  %2401 = vrot.lane.b32.xlu1 %v8323_v47, %s9426_s28  ;;  %v2380_v29 = vpop.permute.xlu0 %2379  ;;  %v1656_v31 = vmax.f32 %v1500_v21, 0.0  ;;  %v1492_v32 = vadd.f32 %v10369_v53, %v1491_v27 }
 0x1c8   : > { %v8362_v18 = vpack.c.bf16 %v3989_v14, %v3989_v14  ;;  %3190 = vst.msk [vmem:[#allocation7 + $0x124] sm:$0xf] %vm2202_vm5, %v10440_v12  ;;  %v1849_v23 = vld [vmem:[#allocation5 + $0x1b0] ss:$2 sm:$0xff]  ;;  %v1913_v24 = vld [vmem:[#allocation5 + $0x1b1] ss:$2 sm:$0xff]  ;;  %v8975_v37 = vpop.f32.mrf.mxu0 }
 0x1c9   : > { %2726 = vst.msk [vmem:[#allocation7 + $0x6c] sm:$0xf] %vm2716_vm7, %v2639_v19  ;;  %v1949_v22 = vmax.f32 %v1849_v23, %v1913_v24  ;;  %v1847_v17 = vld [vmem:[#allocation5 + $0x1a0] ss:$2 sm:$0xff]  ;;  %v1911_v35 = vld [vmem:[#allocation5 + $0x1a1] ss:$2 sm:$0xff]  ;;  %v3594_v39 = vpop.permute.xlu1 %3593  ;;  %2909 = vrot.lane.b32.xlu0 %v10411_v34, %s9428_s22  ;;  %v1724_v40 = vmax.f32 %v1652_v20, %v1656_v31  ;;  %v1503_v43 = vadd.f32 %v10369_v53, %v8975_v37 }
 0x1ca   : > { %2230 = vst.msk [vmem:[#allocation7 + $0x144] sm:$0xf] %vm2202_vm5, %v10446_v16  ;;  %4149 = vst.msk [vmem:[#allocation7 + $0x110] sm:$0xf] %vm2202_vm5, %v8362_v18  ;;  %v1948_v33 = vmax.f32 %v1847_v17, %v1911_v35  ;;  %v1654_v42 = vmax.f32 %v1492_v32, 0.0  ;;  %v1494_v46 = vpop.f32.mrf.mxu0  ;;  %v1651_v34 = vmax.f32 %v1479_v30, 0.0  ;;  %v10495_v18 = vpack.c.bf16 %v3471_v60, %v3471_v60 }
 0x1cb   : > { %2468 = vst.msk [vmem:[#allocation7 + $0x60] sm:$0xf] %vm2459_vm6, %v2380_v29  ;;  %2658 = vrot.lane.b32.xlu1 %v8261_v63, %s9427_s29  ;;  %v2637_v47 = vpop.permute.xlu0 %2636  ;;  %v1657_v48 = vmax.f32 %v1503_v43, 0.0  ;;  %v1495_v49 = vadd.f32 %v10369_v53, %v1494_v46  ;;  %v3728_v3 = vld [vmem:[#allocation2 + $0xf9] sm:$0xff] }
 0x1cc   : > { %2037 = vst.msk [vmem:[#allocation2 + $0x159] sm:$0xff] %vm1730_vm3, %v1949_v22  ;;  %2036 = vst.msk [vmem:[#allocation2 + $0x151] sm:$0xff] %vm1730_vm3, %v1948_v33  ;;  %v1722_v61 = vmax.f32 %v1650_v25, %v1654_v42  ;;  %v8978_v50 = vpop.f32.mrf.mxu0  ;;  %v9202_v6 = vld [vmem:[#allocation7 + $0x30] ss:$12 sps:$4 sm:$0xff]   ;;  %v10500_v21 = vpack.c.bf16 %v3728_v3, %v3728_v3 }
 0x1cd   : > { %3684 = vst.msk [vmem:[#allocation7 + $0x40] sm:$0xf] %vm2716_vm7, %v3594_v39  ;;  %2725 = vst.msk [vmem:[#allocation7 + $0x60] sm:$0xf] %vm2716_vm7, %v2637_v47  ;;  %v2892_v51 = vpop.permute.xlu1 %2891  ;;  %2399 = vrot.lane.b32.xlu0 %v10423_v54, %s9426_s28  ;;  %v1725_v56 = vmax.f32 %v1653_v36, %v1657_v48  ;;  %v1655_v52 = vmax.f32 %v1495_v49, 0.0  ;;  %v1516_v8 = vadd.f32 %v10369_v53, %v8978_v50  ;;  %v3217_v31 = vld [vmem:[#allocation2 + $0xfa] sm:$0xff] }
 0x1ce   : > { %3940 = vst.msk [vmem:[#allocation7 + $0x40] sm:$0xf] %vm2973_vm8, %v10405_v26  ;;  %v8291_v26 = vpack.c.bf16 %v3470_v45, %v3470_v45  ;;  %2981 = vst.msk [vmem:[#allocation7 + $0x54] sm:$0xf] %vm2973_vm8, %v2892_v51  ;;  %v1507_v58 = vpop.f32.mrf.mxu0  ;;  %v3216_v45 = vld [vmem:[#allocation2 + $0xf2] sm:$0xff]  ;;  %v8263_v48 = vpack.c.bf16 %v3217_v31, %v3217_v31 }
 0x1cf   : > { %1789 = vst.msk [vmem:[#allocation5 + $0x1d0] sm:$0xff] %vm1730_vm3, %v1724_v40  ;;  %1787 = vst.msk [vmem:[#allocation5 + $0x1c0] sm:$0xff] %vm1730_vm3, %v1722_v61  ;;  %v3596_v59 = vpop.permute.xlu0 %3595  ;;  %v1723_v57 = vmax.f32 %v1651_v34, %v1655_v52  ;;  %v10492_v13 = vadd.f32 %v10369_v53, %v1507_v58  ;;  %v1660_v32 = vmax.f32 %v1516_v8, 0.0  ;;  %v8262_v60 = vpack.c.bf16 %v3216_v45, %v3216_v45 }
 0x1d0   : > { %3613 = vrot.lane.b32.xlu1 %v8291_v26, %s9427_s29  ;;  %1790 = vst.msk [vmem:[#allocation5 + $0x1d8] sm:$0xff] %vm1730_vm3, %v1725_v56  ;;  %v8979_v63 = vpop.f32.mrf.mxu0 }
 0x1d1   : > { %3685 = vst.msk [vmem:[#allocation7 + $0x4c] sm:$0xf] %vm2716_vm7, %v3596_v59  ;;  %v10483_v2 = vpop.permute.xlu1 %3853  ;;  %2656 = vrot.lane.b32.xlu0 %v10436_v38, %s9427_s29  ;;  %v3727_v38 = vld [vmem:[#allocation2 + $0xf1] sm:$0xff]  ;;  %v1519_v24 = vadd.f32 %v10369_v53, %v8979_v63  ;;  %v1658_v40 = vmax.f32 %v10492_v13, 0.0 }
 0x1d2   : > { %1788 = vst.msk [vmem:[#allocation5 + $0x1c8] sm:$0xff] %vm1730_vm3, %v1723_v57  ;;  %v1510_v14 = vpop.f32.mrf.mxu0  ;;  %v10514_v37 = vpack.c.bf16 %v3727_v38, %v3727_v38 }
 0x1d3   : > { %v3736_v0 = vld [vmem:[#allocation2 + $0x159] sm:$0xff]  ;;  %v3852_v10 = vpop.permute.xlu0 %3851  ;;  %v3479_v19 = vld [vmem:[#allocation2 + $0x150] sm:$0xff]  ;;  %v1511_v47 = vadd.f32 %v10369_v53, %v1510_v14  ;;  %v1661_v51 = vmax.f32 %v1519_v24, 0.0 }
 0x1d4   : > { %v3992_v54 = vld [vmem:[#allocation2 + $0x15a] sm:$0xff]  ;;  %v10489_v41 = vpack.c.bf16 %v3736_v0, %v3736_v0  ;;  %2911 = vrot.lane.b32.xlu1 %v8291_v26, %s9428_s22  ;;  %v3735_v20 = vld [vmem:[#allocation2 + $0x151] sm:$0xff]  ;;  %3941 = vst.msk [vmem:[#allocation7 + $0x4c] sm:$0xf] %vm2973_vm8, %v3852_v10  ;;  %v10502_v23 = vpack.c.bf16 %v3479_v19, %v3479_v19  ;;  %v8982_v27 = vpop.f32.mrf.mxu0 }
 0x1d5   : > { %v9200_v9 = vld [vmem:[#allocation7 + $0x34] ss:$12 sps:$4 sm:$0xff]   ;;  %v8365_v15 = vpack.c.bf16 %v3992_v54, %v3992_v54  ;;  %v10505_v25 = vpack.c.bf16 %v3735_v20, %v3735_v20  ;;  %v3480_v29 = vld [vmem:[#allocation2 + $0x158] sm:$0xff]  ;;  %v3345_v30 = vpop.permute.xlu1 %3344  ;;  %3615 = vrot.lane.b32.xlu0 %v10495_v18, %s9427_s29  ;;  %v1532_v17 = vadd.f32 %v10369_v53, %v8982_v27  ;;  %v1659_v54 = vmax.f32 %v1511_v47, 0.0 }
 0x1d6   : > { %3193 = vst.msk [vmem:[#allocation7 + $0x148] sm:$0xf] %vm2202_vm5, %v10489_v41  ;;  %4710 = vmatprep.mubr.bf16.mxu1 %v9200_v9  ;;  %v3991_v22 = vld [vmem:[#allocation2 + $0x152] sm:$0xff]  ;;  %v10511_v35 = vpack.c.bf16 %v3480_v29, %v3480_v29  ;;  %v1523_v42 = vpop.f32.mrf.mxu0  ;;  %2231 = vst.msk [vmem:[#allocation7 + $0x150] sm:$0xf] %vm2202_vm5, %v10502_v23 }
 0x1d7   : > { %4152 = vst.msk [vmem:[#allocation7 + $0x134] sm:$0xf] %vm2202_vm5, %v8365_v15  ;;  %4711 = vmatmul.mubr.bf16.gmra.mxu1 %v9202_v6  ;;  %v8364_v36 = vpack.c.bf16 %v3991_v22, %v3991_v22  ;;  %v1853_v39 = vld [vmem:[#allocation5 + $0x1d0] ss:$2 sm:$0xff]  ;;  %v1917_v33 = vld [vmem:[#allocation5 + $0x1d1] ss:$2 sm:$0xff]  ;;  %v3343_v43 = vpop.permute.xlu0 %3342  ;;  %v1524_v61 = vadd.f32 %v10369_v53, %v1523_v42 }
 0x1d8   : > { %3431 = vst.msk [vmem:[#allocation7 + $0x70] sm:$0xf] %vm2459_vm6, %v3345_v30  ;;  %3873 = vrot.lane.b32.xlu1 %v10500_v21, %s9428_s22  ;;  %v1951_v46 = vmax.f32 %v1853_v39, %v1917_v33  ;;  %v1664_v34 = vmax.f32 %v1532_v17, 0.0  ;;  %3430 = vst.msk [vmem:[#allocation7 + $0x64] sm:$0xf] %vm2459_vm6, %v3343_v43  ;;  %v8983_v26 = vpop.f32.mrf.mxu0 }
 0x1d9   : > { %3192 = vst.msk [vmem:[#allocation7 + $0x13c] sm:$0xf] %vm2202_vm5, %v10505_v25  ;;  %2232 = vst.msk [vmem:[#allocation7 + $0x15c] sm:$0xf] %vm2202_vm5, %v10511_v35  ;;  %v1851_v49 = vld [vmem:[#allocation5 + $0x1c0] ss:$2 sm:$0xff]  ;;  %v2386_v56 = vpop.permute.xlu1 %2385  ;;  %3871 = vrot.lane.b32.xlu0 %v10514_v37, %s9428_s22  ;;  %v1535_v57 = vadd.f32 %v10369_v53, %v8983_v26 }
 0x1da   : > { %4151 = vst.msk [vmem:[#allocation7 + $0x128] sm:$0xf] %vm2202_vm5, %v8364_v36  ;;  %v1915_v50 = vld [vmem:[#allocation5 + $0x1c1] ss:$2 sm:$0xff]  ;;  %v1728_v58 = vmax.f32 %v1660_v32, %v1664_v34  ;;  %v1662_v59 = vmax.f32 %v1524_v61, 0.0  ;;  %v1526_v63 = vpop.f32.mrf.mxu0 }
 0x1db   : > { %2039 = vst.msk [vmem:[#allocation2 + $0x171] sm:$0xff] %vm1730_vm3, %v1951_v46  ;;  %v1950_v52 = vmax.f32 %v1851_v49, %v1915_v50  ;;  %v2894_v0 = vpop.permute.xlu0 %2893  ;;  %v1665_v8 = vmax.f32 %v1535_v57, 0.0  ;;  %v1527_v9 = vadd.f32 %v10369_v53, %v1526_v63  ;;  %v3730_v46 = vld [vmem:[#allocation2 + $0x111] sm:$0xff]  ;;  %v3729_v50 = vld [vmem:[#allocation2 + $0x109] sm:$0xff] }
 0x1dc   : > { %2471 = vst.msk [vmem:[#allocation7 + $0x84] sm:$0xf] %vm2459_vm6, %v2386_v56  ;;  %3364 = vrot.lane.b32.xlu1 %v8263_v48, %s9426_s28  ;;  %v1726_v3 = vmax.f32 %v1658_v40, %v1662_v59  ;;  %v3473_v40 = vld [vmem:[#allocation2 + $0x108] sm:$0xff]  ;;  %v9205_v61 = vld [vmem:[#allocation7 + $0x48] ss:$12 sps:$4 sm:$0xff]   ;;  %v8327_v26 = vpack.c.bf16 %v3730_v46, %v3730_v46 }
 0x1dd   : > { %2038 = vst.msk [vmem:[#allocation2 + $0x169] sm:$0xff] %vm1730_vm3, %v1950_v52  ;;  %1793 = vst.msk [vmem:[#allocation5 + $0x1f0] sm:$0xff] %vm1730_vm3, %v1728_v58  ;;  %v2643_v6 = vpop.permute.xlu1 %2642  ;;  %3362 = vrot.lane.b32.xlu0 %v8262_v60, %s9426_s28  ;;  %v1729_v13 = vmax.f32 %v1661_v51, %v1665_v8  ;;  %v1663_v14 = vmax.f32 %v1527_v9, 0.0  ;;  %v8294_v49 = vpack.c.bf16 %v3473_v40, %v3473_v40  ;;  %v3219_v56 = vld [vmem:[#allocation2 + $0x112] sm:$0xff]  ;;  %v3218_v58 = vld [vmem:[#allocation2 + $0x10a] sm:$0xff] }
 0x1de   : > { %2982 = vst.msk [vmem:[#allocation7 + $0x60] sm:$0xf] %vm2973_vm8, %v2894_v0  ;;  %v8265_v63 = vpack.c.bf16 %v3219_v56, %v3219_v56 }
 0x1df   : > { %1791 = vst.msk [vmem:[#allocation5 + $0x1e0] sm:$0xff] %vm1730_vm3, %v1726_v3  ;;  %v2384_v15 = vpop.permute.xlu0 %2383  ;;  %1794 = vst.msk [vmem:[#allocation5 + $0x1f8] sm:$0xff] %vm1730_vm3, %v1729_v13  ;;  %v1727_v10 = vmax.f32 %v1659_v54, %v1663_v14 }
 0x1e0   : > { %2728 = vst.msk [vmem:[#allocation7 + $0x84] sm:$0xf] %vm2716_vm7, %v2643_v6  ;;  %2405 = vrot.lane.b32.xlu1 %v10500_v21, %s9426_s28  ;;  %v8264_v6 = vpack.c.bf16 %v3218_v58, %v3218_v58 }
 0x1e1   : > { %2470 = vst.msk [vmem:[#allocation7 + $0x78] sm:$0xf] %vm2459_vm6, %v2384_v15  ;;  %v3598_v19 = vpop.permute.xlu1 %3597  ;;  %2913 = vrot.lane.b32.xlu0 %v10495_v18, %s9428_s22 }
 0x1e2   : > { %v3738_v53 = vld [vmem:[#allocation2 + $0x171] sm:$0xff]  ;;  %1792 = vst.msk [vmem:[#allocation5 + $0x1e8] sm:$0xff] %vm1730_vm3, %v1727_v10 }
 0x1e3   : > { %v3994_v38 = vld [vmem:[#allocation2 + $0x172] sm:$0xff]  ;;  %v10549_v20 = vpack.c.bf16 %v3738_v53, %v3738_v53  ;;  %3686 = vst.msk [vmem:[#allocation7 + $0x58] sm:$0xf] %vm2716_vm7, %v3598_v19  ;;  %v2641_v29 = vpop.permute.xlu0 %2640 }
 0x1e4   : > { %v8367_v24 = vpack.c.bf16 %v3994_v38, %v3994_v38  ;;  %v3481_v21 = vld [vmem:[#allocation2 + $0x168] sm:$0xff]  ;;  %3942 = vst.msk [vmem:[#allocation7 + $0x58] sm:$0xf] %vm2973_vm8, %v10483_v2  ;;  %2662 = vrot.lane.b32.xlu1 %v8263_v48, %s9427_s29  ;;  %v3482_v18 = vld [vmem:[#allocation2 + $0x170] sm:$0xff] }
 0x1e5   : > { %v3737_v27 = vld [vmem:[#allocation2 + $0x169] sm:$0xff]  ;;  %v10555_v22 = vpack.c.bf16 %v3481_v21, %v3481_v21  ;;  %3195 = vst.msk [vmem:[#allocation7 + $0x160] sm:$0xf] %vm2202_vm5, %v10549_v20  ;;  %v10563_v32 = vpack.c.bf16 %v3482_v18, %v3482_v18  ;;  %v2896_v2 = vpop.permute.xlu1 %2895  ;;  %2403 = vrot.lane.b32.xlu0 %v10514_v37, %s9426_s28  ;;  %v3475_v21 = vld [vmem:[#allocation2 + $0x120] sm:$0xff] }
 0x1e6   : > { %v10557_v30 = vpack.c.bf16 %v3737_v27, %v3737_v27  ;;  %v3993_v31 = vld [vmem:[#allocation2 + $0x16a] sm:$0xff]  ;;  %4154 = vst.msk [vmem:[#allocation7 + $0x14c] sm:$0xf] %vm2202_vm5, %v8367_v24 }
 0x1e7   : > { %2727 = vst.msk [vmem:[#allocation7 + $0x78] sm:$0xf] %vm2716_vm7, %v2641_v29  ;;  %v8366_v17 = vpack.c.bf16 %v3993_v31, %v3993_v31  ;;  %v1857_v36 = vld [vmem:[#allocation5 + $0x1f0] ss:$2 sm:$0xff]  ;;  %v1921_v39 = vld [vmem:[#allocation5 + $0x1f1] ss:$2 sm:$0xff]  ;;  %v3600_v33 = vpop.permute.xlu0 %3599 }
 0x1e8   : > { %3194 = vst.msk [vmem:[#allocation7 + $0x154] sm:$0xf] %vm2202_vm5, %v10557_v30  ;;  %2233 = vst.msk [vmem:[#allocation7 + $0x168] sm:$0xf] %vm2202_vm5, %v10555_v22  ;;  %3617 = vrot.lane.b32.xlu1 %v10267_v5, %s9427_s29  ;;  %v1953_v37 = vmax.f32 %v1857_v36, %v1921_v39  ;;  %v9224_v27 = vld [vmem:[%s11660_s3 + $0x88] sm:$0xff]  }
 0x1e9   : > { %2983 = vst.msk [vmem:[#allocation7 + $0x6c] sm:$0xf] %vm2973_vm8, %v2896_v2  ;;  %v1855_v42 = vld [vmem:[#allocation5 + $0x1e0] ss:$2 sm:$0xff]  ;;  %v1919_v43 = vld [vmem:[#allocation5 + $0x1e1] ss:$2 sm:$0xff]  ;;  %v3858_v45 = vpop.permute.xlu1 %3857  ;;  %2660 = vrot.lane.b32.xlu0 %v8262_v60, %s9427_s29  ;;  %8984 = vmatprep.subr.bf16.mxu1 %v9224_v27  ;;  %v8296_v2 = vpack.c.bf16 %v3475_v21, %v3475_v21 }
 0x1ea   : > { %2234 = vst.msk [vmem:[#allocation7 + $0x174] sm:$0xf] %vm2202_vm5, %v10563_v32  ;;  %4153 = vst.msk [vmem:[#allocation7 + $0x140] sm:$0xf] %vm2202_vm5, %v8366_v17  ;;  %v1952_v47 = vmax.f32 %v1855_v42, %v1919_v43  ;;  %8985 = vmatpush3.bf16.msra.mxu1 %v9224_v27  ;;  %v3221_v39 = vld [vmem:[#allocation2 + $0x12a] sm:$0xff] }
 0x1eb   : > { %3687 = vst.msk [vmem:[#allocation7 + $0x64] sm:$0xf] %vm2716_vm7, %v3600_v33  ;;  %v9203_v34 = vld [vmem:[#allocation7 + $0x4c] ss:$12 sps:$4 sm:$0xff]   ;;  %v3856_v48 = vpop.permute.xlu0 %3855  ;;  %v8267_v40 = vpack.c.bf16 %v3221_v39, %v3221_v39 }
 0x1ec   : > { %2041 = vst.msk [vmem:[#allocation2 + $0x189] sm:$0xff] %vm1730_vm3, %v1953_v37  ;;  %2915 = vrot.lane.b32.xlu1 %v10267_v5, %s9428_s22  ;;  %2040 = vst.msk [vmem:[#allocation2 + $0x181] sm:$0xff] %vm1730_vm3, %v1952_v47  ;;  %4718 = vmatprep.mubr.bf16.mxu1 %v9203_v34  ;;  %v8326_v5 = vpack.c.bf16 %v3729_v50, %v3729_v50 }
 0x1ed   : > { %3943 = vst.msk [vmem:[#allocation7 + $0x64] sm:$0xf] %vm2973_vm8, %v3856_v48  ;;  %v3349_v51 = vpop.permute.xlu1 %3348  ;;  %3619 = vrot.lane.b32.xlu0 %v8294_v49, %s9427_s29  ;;  %4719 = vmatmul.mubr.bf16.gmra.mxu1 %v9205_v61 }
 0x1ee   : > { %3433 = vst.msk [vmem:[#allocation7 + $0x88] sm:$0xf] %vm2459_vm6, %v3349_v51 }
 0x1ef   : > { %v3347_v52 = vpop.permute.xlu0 %3346 }
 0x1f0   : > { %3877 = vrot.lane.b32.xlu1 %v8327_v26, %s9428_s22  ;;  %3432 = vst.msk [vmem:[#allocation7 + $0x7c] sm:$0xf] %vm2459_vm6, %v3347_v52  ;;  %v9208_v31 = vld [vmem:[#allocation7 + $0x60] ss:$12 sps:$4 sm:$0xff]  }
 0x1f1   : > { %v2390_v60 = vpop.permute.xlu1 %2389  ;;  %3875 = vrot.lane.b32.xlu0 %v8326_v5, %s9428_s22  ;;  %v3222_v52 = vld [vmem:[#allocation2 + $0x13a] sm:$0xff] }
 0x1f2   : > { %2473 = vst.msk [vmem:[#allocation7 + $0x9c] sm:$0xf] %vm2459_vm6, %v2390_v60 }
 0x1f3   : > { %v3740_v59 = vld [vmem:[#allocation2 + $0x189] sm:$0xff]  ;;  %v3739_v3 = vld [vmem:[#allocation2 + $0x181] sm:$0xff]  ;;  %v2898_v9 = vpop.permute.xlu0 %2897 }
 0x1f4   : > { %v3229_v57 = vld [vmem:[#allocation2 + $0x18a] sm:$0xff]  ;;  %v10589_v0 = vpack.c.bf16 %v3740_v59, %v3740_v59  ;;  %v3228_v8 = vld [vmem:[#allocation2 + $0x182] sm:$0xff]  ;;  %3368 = vrot.lane.b32.xlu1 %v8265_v63, %s9426_s28  ;;  %v10595_v13 = vpack.c.bf16 %v3739_v3, %v3739_v3  ;;  %2984 = vst.msk [vmem:[#allocation7 + $0x78] sm:$0xf] %vm2973_vm8, %v2898_v9  ;;  %v8268_v59 = vpack.c.bf16 %v3222_v52, %v3222_v52 }
 0x1f5   : > { %v10591_v54 = vpack.c.bf16 %v3229_v57, %v3229_v57  ;;  %v10597_v14 = vpack.c.bf16 %v3228_v8, %v3228_v8  ;;  %v2647_v15 = vpop.permute.xlu1 %2646  ;;  %3366 = vrot.lane.b32.xlu0 %v8264_v6, %s9426_s28 }
 0x1f6   : > { %3197 = vst.msk [vmem:[#allocation7 + $0x178] sm:$0xf] %vm2202_vm5, %v10589_v0  ;;  %3196 = vst.msk [vmem:[#allocation7 + $0x16c] sm:$0xf] %vm2202_vm5, %v10595_v13 }
 0x1f7   : > { %4156 = vst.msk [vmem:[#allocation7 + $0x164] sm:$0xf] %vm2202_vm5, %v10591_v54  ;;  %4155 = vst.msk [vmem:[#allocation7 + $0x158] sm:$0xf] %vm2202_vm5, %v10597_v14  ;;  %v2388_v10 = vpop.permute.xlu0 %2387 }
 0x1f8   : > { %2730 = vst.msk [vmem:[#allocation7 + $0x9c] sm:$0xf] %vm2716_vm7, %v2647_v15  ;;  %2409 = vrot.lane.b32.xlu1 %v8327_v26, %s9426_s28  ;;  %v3223_v26 = vld [vmem:[#allocation2 + $0x142] sm:$0xff] }
 0x1f9   : > { %2472 = vst.msk [vmem:[#allocation7 + $0x90] sm:$0xf] %vm2459_vm6, %v2388_v10  ;;  %v3602_v53 = vpop.permute.xlu1 %3601  ;;  %2917 = vrot.lane.b32.xlu0 %v8294_v49, %s9428_s22  ;;  %v3225_v10 = vld [vmem:[#allocation2 + $0x15a] sm:$0xff] }
 0x1fa   : > { %3688 = vst.msk [vmem:[#allocation7 + $0x70] sm:$0xf] %vm2716_vm7, %v3602_v53 }
 0x1fb   : > { %3944 = vst.msk [vmem:[#allocation7 + $0x70] sm:$0xf] %vm2973_vm8, %v3858_v45  ;;  %v2645_v38 = vpop.permute.xlu0 %2644 }
 0x1fc   : > { %2666 = vrot.lane.b32.xlu1 %v8265_v63, %s9427_s29  ;;  %2729 = vst.msk [vmem:[#allocation7 + $0x90] sm:$0xf] %vm2716_vm7, %v2645_v38  ;;  %v3224_v38 = vld [vmem:[#allocation2 + $0x152] sm:$0xff] }
 0x1fd   : > { %v2900_v19 = vpop.permute.xlu1 %2899  ;;  %2407 = vrot.lane.b32.xlu0 %v8326_v5, %s9426_s28  ;;  %v8269_v5 = vpack.c.bf16 %v3223_v26, %v3223_v26  ;;  %v8270_v21 = vpack.c.bf16 %v3224_v38, %v3224_v38 }
 0x1fe   : > { %2985 = vst.msk [vmem:[#allocation7 + $0x84] sm:$0xf] %vm2973_vm8, %v2900_v19  ;;  %v8271_v19 = vpack.c.bf16 %v3225_v10, %v3225_v10 }
 0x1ff   : > { %v3604_v24 = vpop.permute.xlu0 %3603 }
 0x200   : > { %3621 = vrot.lane.b32.xlu1 %v10326_v7, %s9427_s29  ;;  %3689 = vst.msk [vmem:[#allocation7 + $0x7c] sm:$0xf] %vm2716_vm7, %v3604_v24 }
 0x201   : > { %v3862_v29 = vpop.permute.xlu1 %3861  ;;  %2664 = vrot.lane.b32.xlu0 %v8264_v6, %s9427_s29 }
 0x202   : > { %v9206_v18 = vld [vmem:[#allocation7 + $0x64] ss:$12 sps:$4 sm:$0xff]  }
 0x203   : > { %v3860_v17 = vpop.permute.xlu0 %3859  ;;  %4726 = vmatprep.mubr.bf16.mxu1 %v9206_v18 }
 0x204   : > { %2919 = vrot.lane.b32.xlu1 %v10326_v7, %s9428_s22  ;;  %3945 = vst.msk [vmem:[#allocation7 + $0x7c] sm:$0xf] %vm2973_vm8, %v3860_v17  ;;  %4727 = vmatmul.mubr.bf16.gmra.mxu1 %v9208_v31  ;;  %v3220_v7 = vld [vmem:[#allocation2 + $0x122] sm:$0xff] }
 0x205   : > { %v3353_v36 = vpop.permute.xlu1 %3352  ;;  %3623 = vrot.lane.b32.xlu0 %v8296_v2, %s9427_s29  ;;  %v8266_v43 = vpack.c.bf16 %v3220_v7, %v3220_v7  ;;  %v9211_v50 = vld [vmem:[#allocation7 + $0x78] ss:$12 sps:$4 sm:$0xff]   ;;  %v9231_v31 = vld [vmem:[%s11660_s3 + $0x80] sm:$0xff]  }
 0x206   : > { %3435 = vst.msk [vmem:[#allocation7 + $0xa0] sm:$0xf] %vm2459_vm6, %v3353_v36  ;;  %8986 = vmatprep.subr.bf16.mxu1 %v9231_v31  ;;  %v3227_v7 = vld [vmem:[#allocation2 + $0x172] sm:$0xff] }
 0x207   : > { %v3351_v33 = vpop.permute.xlu0 %3350  ;;  %8987 = vmatpush3.bf16.msra.mxu1 %v9231_v31 }
 0x208   : > { %3881 = vrot.lane.b32.xlu1 %v10372_v55, %s9428_s22  ;;  %3434 = vst.msk [vmem:[#allocation7 + $0x94] sm:$0xf] %vm2459_vm6, %v3351_v33 }
 0x209   : > { %v2394_v37 = vpop.permute.xlu1 %2393  ;;  %3879 = vrot.lane.b32.xlu0 %v10381_v62, %s9428_s22 }
 0x20a   : > { %2475 = vst.msk [vmem:[#allocation7 + $0xb4] sm:$0xf] %vm2459_vm6, %v2394_v37 }
 0x20b   : > { %v2902_v42 = vpop.permute.xlu0 %2901 }
 0x20c   : > { %3372 = vrot.lane.b32.xlu1 %v8267_v40, %s9426_s28  ;;  %2986 = vst.msk [vmem:[#allocation7 + $0x90] sm:$0xf] %vm2973_vm8, %v2902_v42  ;;  %v8273_v42 = vpack.c.bf16 %v3227_v7, %v3227_v7 }
 0x20d   : > { %v2651_v45 = vpop.permute.xlu1 %2650  ;;  %3370 = vrot.lane.b32.xlu0 %v8266_v43, %s9426_s28 }
 0x20e   : > { %2732 = vst.msk [vmem:[#allocation7 + $0xb4] sm:$0xf] %vm2716_vm7, %v2651_v45 }
 0x20f   : > { %v2392_v46 = vpop.permute.xlu0 %2391 }
 0x210   : > { %2413 = vrot.lane.b32.xlu1 %v10372_v55, %s9426_s28  ;;  %2474 = vst.msk [vmem:[#allocation7 + $0xa8] sm:$0xf] %vm2459_vm6, %v2392_v46 }
 0x211   : > { %v3606_v47 = vpop.permute.xlu1 %3605  ;;  %2921 = vrot.lane.b32.xlu0 %v8296_v2, %s9428_s22 }
 0x212   : > { %3690 = vst.msk [vmem:[#allocation7 + $0x88] sm:$0xf] %vm2716_vm7, %v3606_v47 }
 0x213   : > { %3946 = vst.msk [vmem:[#allocation7 + $0x88] sm:$0xf] %vm2973_vm8, %v3862_v29  ;;  %v2649_v34 = vpop.permute.xlu0 %2648 }
 0x214   : > { %2670 = vrot.lane.b32.xlu1 %v8267_v40, %s9427_s29  ;;  %2731 = vst.msk [vmem:[#allocation7 + $0xa8] sm:$0xf] %vm2716_vm7, %v2649_v34  ;;  %v3226_v40 = vld [vmem:[#allocation2 + $0x16a] sm:$0xff] }
 0x215   : > { %v2904_v61 = vpop.permute.xlu1 %2903  ;;  %2411 = vrot.lane.b32.xlu0 %v10381_v62, %s9426_s28  ;;  %v8272_v45 = vpack.c.bf16 %v3226_v40, %v3226_v40 }
 0x216   : > { %2987 = vst.msk [vmem:[#allocation7 + $0x9c] sm:$0xf] %vm2973_vm8, %v2904_v61 }
 0x217   : > { %v3608_v55 = vpop.permute.xlu0 %3607 }
 0x218   : > { %3625 = vrot.lane.b32.xlu1 %v10387_v4, %s9427_s29  ;;  %3691 = vst.msk [vmem:[#allocation7 + $0x94] sm:$0xf] %vm2716_vm7, %v3608_v55 }
 0x219   : > { %v3866_v48 = vpop.permute.xlu1 %3865  ;;  %2668 = vrot.lane.b32.xlu0 %v8266_v43, %s9427_s29 }
 0x21a   : > { %v9209_v49 = vld [vmem:[#allocation7 + $0x7c] ss:$12 sps:$4 sm:$0xff]  }
 0x21b   : > { %v3864_v51 = vpop.permute.xlu0 %3863  ;;  %4734 = vmatprep.mubr.bf16.mxu1 %v9209_v49 }
 0x21c   : > { %2923 = vrot.lane.b32.xlu1 %v10387_v4, %s9428_s22  ;;  %3947 = vst.msk [vmem:[#allocation7 + $0x94] sm:$0xf] %vm2973_vm8, %v3864_v51  ;;  %4735 = vmatmul.mubr.bf16.gmra.mxu1 %v9211_v50 }
 0x21d   : > { %v3357_v62 = vpop.permute.xlu1 %3356  ;;  %3627 = vrot.lane.b32.xlu0 %v10438_v11, %s9427_s29  ;;  %v9214_v6 = vld [vmem:[#allocation7 + $0x90] ss:$12 sps:$4 sm:$0xff]  }
 0x21e   : > { %3437 = vst.msk [vmem:[#allocation7 + $0xb8] sm:$0xf] %vm2459_vm6, %v3357_v62 }
 0x21f   : > { %v3355_v56 = vpop.permute.xlu0 %3354 }
 0x220   : > { %3885 = vrot.lane.b32.xlu1 %v10431_v1, %s9428_s22  ;;  %3436 = vst.msk [vmem:[#allocation7 + $0xac] sm:$0xf] %vm2459_vm6, %v3355_v56 }
 0x221   : > { %v2398_v4 = vpop.permute.xlu1 %2397  ;;  %3883 = vrot.lane.b32.xlu0 %v10440_v12, %s9428_s22 }
 0x222   : > { %2477 = vst.msk [vmem:[#allocation7 + $0xcc] sm:$0xf] %vm2459_vm6, %v2398_v4 }
 0x223   : > { %v2906_v58 = vpop.permute.xlu0 %2905 }
 0x224   : > { %3376 = vrot.lane.b32.xlu1 %v8269_v5, %s9426_s28  ;;  %2988 = vst.msk [vmem:[#allocation7 + $0xa8] sm:$0xf] %vm2973_vm8, %v2906_v58 }
 0x225   : > { %v2655_v57 = vpop.permute.xlu1 %2654  ;;  %3374 = vrot.lane.b32.xlu0 %v8268_v59, %s9426_s28 }
 0x226   : > { %2734 = vst.msk [vmem:[#allocation7 + $0xcc] sm:$0xf] %vm2716_vm7, %v2655_v57 }
 0x227   : > { %v2396_v60 = vpop.permute.xlu0 %2395 }
 0x228   : > { %2417 = vrot.lane.b32.xlu1 %v10431_v1, %s9426_s28  ;;  %2476 = vst.msk [vmem:[#allocation7 + $0xc0] sm:$0xf] %vm2459_vm6, %v2396_v60  ;;  %v3741_v60 = vld [vmem:[#allocation2 + $0x199] sm:$0xff] }
 0x229   : > { %v3610_v63 = vpop.permute.xlu1 %3609  ;;  %2925 = vrot.lane.b32.xlu0 %v10438_v11, %s9428_s22 }
 0x22a   : > { %3692 = vst.msk [vmem:[#allocation7 + $0xa0] sm:$0xf] %vm2716_vm7, %v3610_v63 }
 0x22b   : > { %3948 = vst.msk [vmem:[#allocation7 + $0xa0] sm:$0xf] %vm2973_vm8, %v3866_v48  ;;  %v2653_v3 = vpop.permute.xlu0 %2652 }
 0x22c   : > { %2674 = vrot.lane.b32.xlu1 %v8269_v5, %s9427_s29  ;;  %2733 = vst.msk [vmem:[#allocation7 + $0xc0] sm:$0xf] %vm2716_vm7, %v2653_v3  ;;  %v3484_v5 = vld [vmem:[#allocation2 + $0x188] sm:$0xff] }
 0x22d   : > { %v2908_v8 = vpop.permute.xlu1 %2907  ;;  %2415 = vrot.lane.b32.xlu0 %v10440_v12, %s9426_s28  ;;  %v8305_v57 = vpack.c.bf16 %v3484_v5, %v3484_v5  ;;  %v3997_v5 = vld [vmem:[#allocation2 + $0x19a] sm:$0xff] }
 0x22e   : > { %2989 = vst.msk [vmem:[#allocation7 + $0xb4] sm:$0xf] %vm2973_vm8, %v2908_v8  ;;  %v3742_v8 = vld [vmem:[#allocation2 + $0x1a1] sm:$0xff] }
 0x22f   : > { %v3612_v1 = vpop.permute.xlu0 %3611 }
 0x230   : > { %3629 = vrot.lane.b32.xlu1 %v10446_v16, %s9427_s29  ;;  %3693 = vst.msk [vmem:[#allocation7 + $0xac] sm:$0xf] %vm2716_vm7, %v3612_v1 }
 0x231   : > { %v3870_v11 = vpop.permute.xlu1 %3869  ;;  %2672 = vrot.lane.b32.xlu0 %v8268_v59, %s9427_s29 }
 0x232   : > { %v9212_v9 = vld [vmem:[#allocation7 + $0x94] ss:$12 sps:$4 sm:$0xff]  }
 0x233   : > { %v3868_v15 = vpop.permute.xlu0 %3867  ;;  %4742 = vmatprep.mubr.bf16.mxu1 %v9212_v9 }
 0x234   : > { %2927 = vrot.lane.b32.xlu1 %v10446_v16, %s9428_s22  ;;  %3949 = vst.msk [vmem:[#allocation7 + $0xac] sm:$0xf] %vm2973_vm8, %v3868_v15  ;;  %4743 = vmatmul.mubr.bf16.gmra.mxu1 %v9214_v6  ;;  %v8339_v6 = vpack.c.bf16 %v3742_v8, %v3742_v8 }
 0x235   : > { %v3361_v12 = vpop.permute.xlu1 %3360  ;;  %3631 = vrot.lane.b32.xlu0 %v10502_v23, %s9427_s29  ;;  %v9217_v39 = vld [vmem:[#allocation7 + $0xa8] ss:$12 sps:$4 sm:$0xff]  }
 0x236   : > { %3439 = vst.msk [vmem:[#allocation7 + $0xd0] sm:$0xf] %vm2459_vm6, %v3361_v12 }
 0x237   : > { %v3359_v53 = vpop.permute.xlu0 %3358 }
 0x238   : > { %3889 = vrot.lane.b32.xlu1 %v10489_v41, %s9428_s22  ;;  %3438 = vst.msk [vmem:[#allocation7 + $0xc4] sm:$0xf] %vm2459_vm6, %v3359_v53 }
 0x239   : > { %v2402_v16 = vpop.permute.xlu1 %2401  ;;  %3887 = vrot.lane.b32.xlu0 %v10505_v25, %s9428_s22 }
 0x23a   : > { %2479 = vst.msk [vmem:[#allocation7 + $0xe4] sm:$0xf] %vm2459_vm6, %v2402_v16 }
 0x23b   : > { %v2910_v24 = vpop.permute.xlu0 %2909 }
 0x23c   : > { %3380 = vrot.lane.b32.xlu1 %v8271_v19, %s9426_s28  ;;  %2990 = vst.msk [vmem:[#allocation7 + $0xc0] sm:$0xf] %vm2973_vm8, %v2910_v24 }
 0x23d   : > { %v2659_v27 = vpop.permute.xlu1 %2658  ;;  %3378 = vrot.lane.b32.xlu0 %v8270_v21, %s9426_s28 }
 0x23e   : > { %2736 = vst.msk [vmem:[#allocation7 + $0xe4] sm:$0xf] %vm2716_vm7, %v2659_v27 }
 0x23f   : > { %v2400_v29 = vpop.permute.xlu0 %2399 }
 0x240   : > { %2421 = vrot.lane.b32.xlu1 %v10489_v41, %s9426_s28  ;;  %2478 = vst.msk [vmem:[#allocation7 + $0xd8] sm:$0xf] %vm2459_vm6, %v2400_v29 }
 0x241   : > { %2929 = vrot.lane.b32.xlu0 %v10502_v23, %s9428_s22 }
 0x242   : > { %v3614_v18 = vpop.permute.xlu1 %3613 }
 0x243   : > { %3694 = vst.msk [vmem:[#allocation7 + $0xb8] sm:$0xf] %vm2716_vm7, %v3614_v18  ;;  %v2657_v17 = vpop.permute.xlu0 %2656 }
 0x244   : > { %3950 = vst.msk [vmem:[#allocation7 + $0xb8] sm:$0xf] %vm2973_vm8, %v3870_v11  ;;  %2678 = vrot.lane.b32.xlu1 %v8271_v19, %s9427_s29 }
 0x245   : > { %2735 = vst.msk [vmem:[#allocation7 + $0xd8] sm:$0xf] %vm2716_vm7, %v2657_v17  ;;  %2419 = vrot.lane.b32.xlu0 %v10505_v25, %s9426_s28 }
 0x246   : > { %v2912_v41 = vpop.permute.xlu1 %2911 }
 0x247   : > { %2991 = vst.msk [vmem:[#allocation7 + $0xcc] sm:$0xf] %vm2973_vm8, %v2912_v41  ;;  %v3616_v23 = vpop.permute.xlu0 %3615 }
 0x248   : > { %3633 = vrot.lane.b32.xlu1 %v10511_v35, %s9427_s29  ;;  %3695 = vst.msk [vmem:[#allocation7 + $0xc4] sm:$0xf] %vm2716_vm7, %v3616_v23 }
 0x249   : > { %2676 = vrot.lane.b32.xlu0 %v8270_v21, %s9427_s29 }
 0x24a   : > { %v3874_v2 = vpop.permute.xlu1 %3873 }
 0x24b   : > { %v9215_v36 = vld [vmem:[#allocation7 + $0xac] ss:$12 sps:$4 sm:$0xff]   ;;  %v3872_v33 = vpop.permute.xlu0 %3871 }
 0x24c   : > { %2931 = vrot.lane.b32.xlu1 %v10511_v35, %s9428_s22  ;;  %3951 = vst.msk [vmem:[#allocation7 + $0xc4] sm:$0xf] %vm2973_vm8, %v3872_v33  ;;  %4750 = vmatprep.mubr.bf16.mxu1 %v9215_v36 }
 0x24d   : > { %3635 = vrot.lane.b32.xlu0 %v10555_v22, %s9427_s29  ;;  %4751 = vmatmul.mubr.bf16.gmra.mxu1 %v9217_v39 }
 0x24e   : > { %v3365_v25 = vpop.permute.xlu1 %3364  ;;  %v9220_v50 = vld [vmem:[#allocation7 + $0xc0] ss:$12 sps:$4 sm:$0xff]  }
 0x24f   : > { %3441 = vst.msk [vmem:[#allocation7 + $0xe8] sm:$0xf] %vm2459_vm6, %v3365_v25  ;;  %v3363_v37 = vpop.permute.xlu0 %3362 }
 0x250   : > { %3893 = vrot.lane.b32.xlu1 %v10549_v20, %s9428_s22  ;;  %3440 = vst.msk [vmem:[#allocation7 + $0xdc] sm:$0xf] %vm2459_vm6, %v3363_v37 }
 0x251   : > { %3891 = vrot.lane.b32.xlu0 %v10557_v30, %s9428_s22 }
 0x252   : > { %v2406_v35 = vpop.permute.xlu1 %2405 }
 0x253   : > { %2481 = vst.msk [vmem:[#allocation7 + $0xfc] sm:$0xf] %vm2459_vm6, %v2406_v35  ;;  %v2914_v43 = vpop.permute.xlu0 %2913 }
 0x254   : > { %3384 = vrot.lane.b32.xlu1 %v8273_v42, %s9426_s28  ;;  %2992 = vst.msk [vmem:[#allocation7 + $0xd8] sm:$0xf] %vm2973_vm8, %v2914_v43 }
 0x255   : > { %3382 = vrot.lane.b32.xlu0 %v8272_v45, %s9426_s28 }
 0x256   : > { %v2663_v46 = vpop.permute.xlu1 %2662 }
 0x257   : > { %2738 = vst.msk [vmem:[#allocation7 + $0xfc] sm:$0xf] %vm2716_vm7, %v2663_v46  ;;  %v2404_v47 = vpop.permute.xlu0 %2403 }
 0x258   : > { %2425 = vrot.lane.b32.xlu1 %v10549_v20, %s9426_s28  ;;  %2480 = vst.msk [vmem:[#allocation7 + $0xf0] sm:$0xf] %vm2459_vm6, %v2404_v47 }
 0x259   : > { %2933 = vrot.lane.b32.xlu0 %v10555_v22, %s9428_s22  ;;  %v3483_v22 = vld [vmem:[#allocation2 + $0x180] sm:$0xff] }
 0x25a   : > { %v3618_v34 = vpop.permute.xlu1 %3617  ;;  %v8304_v62 = vpack.c.bf16 %v3483_v22, %v3483_v22 }
 0x25b   : > { %3696 = vst.msk [vmem:[#allocation7 + $0xd0] sm:$0xf] %vm2716_vm7, %v3618_v34  ;;  %v2661_v61 = vpop.permute.xlu0 %2660 }
 0x25c   : > { %3952 = vst.msk [vmem:[#allocation7 + $0xd0] sm:$0xf] %vm2973_vm8, %v3874_v2  ;;  %2682 = vrot.lane.b32.xlu1 %v8273_v42, %s9427_s29 }
 0x25d   : > { %2737 = vst.msk [vmem:[#allocation7 + $0xf0] sm:$0xf] %vm2716_vm7, %v2661_v61  ;;  %2423 = vrot.lane.b32.xlu0 %v10557_v30, %s9426_s28 }
 0x25e   : > { %v2916_v55 = vpop.permute.xlu1 %2915 }
 0x25f   : > { %2993 = vst.msk [vmem:[#allocation7 + $0xe4] sm:$0xf] %vm2973_vm8, %v2916_v55  ;;  %v3620_v20 = vpop.permute.xlu0 %3619 }
 0x260   : > { %3637 = vrot.lane.b32.xlu1 %v10563_v32, %s9427_s29  ;;  %3697 = vst.msk [vmem:[#allocation7 + $0xdc] sm:$0xf] %vm2716_vm7, %v3620_v20 }
 0x261   : > { %2680 = vrot.lane.b32.xlu0 %v8272_v45, %s9427_s29 }
 0x262   : > { %v3878_v48 = vpop.permute.xlu1 %3877 }
 0x263   : > { %v9218_v49 = vld [vmem:[#allocation7 + $0xc4] ss:$12 sps:$4 sm:$0xff]   ;;  %v3876_v51 = vpop.permute.xlu0 %3875 }
 0x264   : > { %2935 = vrot.lane.b32.xlu1 %v10563_v32, %s9428_s22  ;;  %3953 = vst.msk [vmem:[#allocation7 + $0xdc] sm:$0xf] %vm2973_vm8, %v3876_v51  ;;  %4758 = vmatprep.mubr.bf16.mxu1 %v9218_v49 }
 0x265   : > { %3639 = vrot.lane.b32.xlu0 %v8304_v62, %s9427_s29  ;;  %4759 = vmatmul.mubr.bf16.gmra.mxu1 %v9220_v50 }
 0x266   : > { %v3369_v30 = vpop.permute.xlu1 %3368  ;;  %v8597_v26 = vpop.f32.mrf.mxu1  ;;  %v9223_v10 = vld [vmem:[#allocation7 + $0xd8] ss:$12 sps:$4 sm:$0xff]  }
 0x267   : > { %3443 = vst.msk [vmem:[#allocation7 + $0x100] sm:$0xf] %vm2459_vm6, %v3369_v30  ;;  %v3367_v56 = vpop.permute.xlu0 %3366 }
 0x268   : > { %3897 = vrot.lane.b32.xlu1 %v10589_v0, %s9428_s22  ;;  %v8598_v52 = vpop.f32.mrf.mxu1  ;;  %3442 = vst.msk [vmem:[#allocation7 + $0xf4] sm:$0xf] %vm2459_vm6, %v3367_v56  ;;  %v3486_v0 = vld [vmem:[#allocation2 + $0x1a0] sm:$0xff] }
 0x269   : > { %v10763_v32 = vadd.f32 %v8598_v52, %v8597_v26  ;;  %3895 = vrot.lane.b32.xlu0 %v10595_v13, %s9428_s22  ;;  %v8307_v63 = vpack.c.bf16 %v3486_v0, %v3486_v0 }
 0x26a   : > { %v2410_v4 = vpop.permute.xlu1 %2409  ;;  %v10783_v11 = vpop.f32.mrf.mxu1 }
 0x26b   : > { %2483 = vst.msk [vmem:[#allocation7 + $0x114] sm:$0xf] %vm2459_vm6, %v2410_v4  ;;  %v2918_v58 = vpop.permute.xlu0 %2917 }
 0x26c   : > { %3388 = vrot.lane.b32.xlu1 %v10591_v54, %s9426_s28  ;;  %2994 = vst.msk [vmem:[#allocation7 + $0xf0] sm:$0xf] %vm2973_vm8, %v2918_v58  ;;  %v8338_v54 = vpack.c.bf16 %v3741_v60, %v3741_v60  ;;  %v10787_v53 = vpop.f32.mrf.mxu1  ;;  %v3998_v58 = vld [vmem:[#allocation2 + $0x1a2] sm:$0xff] }
 0x26d   : > { %3386 = vrot.lane.b32.xlu0 %v10597_v14, %s9426_s28  ;;  %v8371_v60 = vpack.c.bf16 %v3998_v58, %v3998_v58 }
 0x26e   : > { %v2667_v59 = vpop.permute.xlu1 %2666 }
 0x26f   : > { %2740 = vst.msk [vmem:[#allocation7 + $0x114] sm:$0xf] %vm2716_vm7, %v2667_v59  ;;  %v2408_v13 = vpop.permute.xlu0 %2407 }
 0x270   : > { %3641 = vrot.lane.b32.xlu1 %v8305_v57, %s9427_s29  ;;  %2482 = vst.msk [vmem:[#allocation7 + $0x108] sm:$0xf] %vm2459_vm6, %v2408_v13 }
 0x271   : > { %2937 = vrot.lane.b32.xlu0 %v8304_v62, %s9428_s22  ;;  %4158 = vst.msk [vmem:[#allocation7 + $0x17c] sm:$0xf] %vm2202_vm5, %v8371_v60  ;;  %v9244_v60 = vld [vmem:[#allocation7 + $0x8] ss:$12 sps:$4 sm:$0xff]  }
 0x272   : > { %v3622_v3 = vpop.permute.xlu1 %3621 }
 0x273   : > { %3698 = vst.msk [vmem:[#allocation7 + $0xe8] sm:$0xf] %vm2716_vm7, %v3622_v3  ;;  %v2665_v14 = vpop.permute.xlu0 %2664 }
 0x274   : > { %3954 = vst.msk [vmem:[#allocation7 + $0xe8] sm:$0xf] %vm2973_vm8, %v3878_v48  ;;  %3645 = vrot.lane.b32.xlu1 %v8307_v63, %s9427_s29 }
 0x275   : > { %2739 = vst.msk [vmem:[#allocation7 + $0x108] sm:$0xf] %vm2716_vm7, %v2665_v14  ;;  %3899 = vrot.lane.b32.xlu0 %v8338_v54, %s9428_s22 }
 0x276   : > { %v2920_v1 = vpop.permute.xlu1 %2919 }
 0x277   : > { %2995 = vst.msk [vmem:[#allocation7 + $0xfc] sm:$0xf] %vm2973_vm8, %v2920_v1  ;;  %v3624_v9 = vpop.permute.xlu0 %3623 }
 0x278   : > { %2939 = vrot.lane.b32.xlu1 %v8305_v57, %s9428_s22  ;;  %3699 = vst.msk [vmem:[#allocation7 + $0xf4] sm:$0xf] %vm2716_vm7, %v3624_v9  ;;  %v8370_v57 = vpack.c.bf16 %v3997_v5, %v3997_v5 }
 0x27a   : > { %v3882_v15 = vpop.permute.xlu1 %3881  ;;  %4157 = vst.msk [vmem:[#allocation7 + $0x170] sm:$0xf] %vm2202_vm5, %v8370_v57 }
 0x27b   : > { %v9221_v12 = vld [vmem:[#allocation7 + $0xdc] ss:$12 sps:$4 sm:$0xff]   ;;  %v3880_v38 = vpop.permute.xlu0 %3879 }
 0x27c   : > { %3901 = vrot.lane.b32.xlu1 %v8339_v6, %s9428_s22  ;;  %3955 = vst.msk [vmem:[#allocation7 + $0xf4] sm:$0xf] %vm2973_vm8, %v3880_v38  ;;  %4766 = vmatprep.mubr.bf16.mxu1 %v9221_v12 }
 0x27d   : > { %v8603_v19 = vpop.f32.mrf.mxu1  ;;  %4767 = vmatmul.mubr.bf16.gmra.mxu1 %v9223_v10 }
 0x27e   : > { %v3373_v16 = vpop.permute.xlu1 %3372  ;;  %v9227_v7 = vld [vmem:[#allocation7 + $0xf0] ss:$12 sps:$4 sm:$0xff]  }
 0x27f   : > { %3445 = vst.msk [vmem:[#allocation7 + $0x118] sm:$0xf] %vm2459_vm6, %v3373_v16  ;;  %v3371_v24 = vpop.permute.xlu0 %3370  ;;  %v8604_v21 = vpop.f32.mrf.mxu1 }
 0x280   : > { %3444 = vst.msk [vmem:[#allocation7 + $0x10c] sm:$0xf] %vm2459_vm6, %v3371_v24  ;;  %v10793_v27 = vadd.f32 %v8604_v21, %v8603_v19 }
 0x281   : > { %v10803_v36 = vpop.f32.mrf.mxu1 }
 0x282   : > { %v2414_v29 = vpop.permute.xlu1 %2413 }
 0x283   : > { %2485 = vst.msk [vmem:[#allocation7 + $0x12c] sm:$0xf] %vm2459_vm6, %v2414_v29  ;;  %v2922_v18 = vpop.permute.xlu0 %2921  ;;  %v10806_v37 = vpop.f32.mrf.mxu1 }
 0x284   : > { %2996 = vst.msk [vmem:[#allocation7 + $0x108] sm:$0xf] %vm2973_vm8, %v2922_v18 }
 0x286   : > { %v2671_v31 = vpop.permute.xlu1 %2670 }
 0x287   : > { %2742 = vst.msk [vmem:[#allocation7 + $0x12c] sm:$0xf] %vm2716_vm7, %v2671_v31  ;;  %v2412_v17 = vpop.permute.xlu0 %2411 }
 0x288   : > { %2484 = vst.msk [vmem:[#allocation7 + $0x120] sm:$0xf] %vm2459_vm6, %v2412_v17 }
 0x28a   : > { %v3626_v41 = vpop.permute.xlu1 %3625 }
 0x28b   : > { %3700 = vst.msk [vmem:[#allocation7 + $0x100] sm:$0xf] %vm2716_vm7, %v3626_v41  ;;  %v2669_v23 = vpop.permute.xlu0 %2668 }
 0x28c   : > { %3956 = vst.msk [vmem:[#allocation7 + $0x100] sm:$0xf] %vm2973_vm8, %v3882_v15 }
 0x28d   : > { %2741 = vst.msk [vmem:[#allocation7 + $0x120] sm:$0xf] %vm2716_vm7, %v2669_v23 }
 0x28e   : > { %v2924_v2 = vpop.permute.xlu1 %2923 }
 0x28f   : > { %2997 = vst.msk [vmem:[#allocation7 + $0x114] sm:$0xf] %vm2973_vm8, %v2924_v2  ;;  %v3628_v39 = vpop.permute.xlu0 %3627 }
 0x290   : > { %3701 = vst.msk [vmem:[#allocation7 + $0x10c] sm:$0xf] %vm2716_vm7, %v3628_v39 }
 0x292   : > { %v3886_v33 = vpop.permute.xlu1 %3885 }
 0x293   : > { %v9225_v25 = vld [vmem:[#allocation7 + $0xf4] ss:$12 sps:$4 sm:$0xff]   ;;  %v3884_v40 = vpop.permute.xlu0 %3883 }
 0x294   : > { %3957 = vst.msk [vmem:[#allocation7 + $0x10c] sm:$0xf] %vm2973_vm8, %v3884_v40  ;;  %4774 = vmatprep.mubr.bf16.mxu1 %v9225_v25 }
 0x295   : > { %4775 = vmatmul.mubr.bf16.gmra.mxu1 %v9227_v7 }
 0x296   : > { %v3377_v35 = vpop.permute.xlu1 %3376  ;;  %v9230_v30 = vld [vmem:[#allocation7 + $0x108] ss:$12 sps:$4 sm:$0xff]  }
 0x297   : > { %v8609_v42 = vpop.f32.mrf.mxu1  ;;  %3447 = vst.msk [vmem:[#allocation7 + $0x130] sm:$0xf] %vm2459_vm6, %v3377_v35  ;;  %v3375_v43 = vpop.permute.xlu0 %3374 }
 0x298   : > { %3446 = vst.msk [vmem:[#allocation7 + $0x124] sm:$0xf] %vm2459_vm6, %v3375_v43 }
 0x299   : > { %v8610_v45 = vpop.f32.mrf.mxu1 }
 0x29a   : > { %v10811_v46 = vadd.f32 %v8610_v45, %v8609_v42  ;;  %v2418_v47 = vpop.permute.xlu1 %2417 }
 0x29b   : > { %2487 = vst.msk [vmem:[#allocation7 + $0x144] sm:$0xf] %vm2459_vm6, %v2418_v47  ;;  %v2926_v34 = vpop.permute.xlu0 %2925  ;;  %v10821_v49 = vpop.f32.mrf.mxu1 }
 0x29c   : > { %2998 = vst.msk [vmem:[#allocation7 + $0x120] sm:$0xf] %vm2973_vm8, %v2926_v34 }
 0x29d   : > { %v10824_v26 = vpop.f32.mrf.mxu1 }
 0x29e   : > { %v2675_v61 = vpop.permute.xlu1 %2674 }
 0x29f   : > { %2744 = vst.msk [vmem:[#allocation7 + $0x144] sm:$0xf] %vm2716_vm7, %v2675_v61  ;;  %v2416_v55 = vpop.permute.xlu0 %2415 }
 0x2a0   : > { %2486 = vst.msk [vmem:[#allocation7 + $0x138] sm:$0xf] %vm2459_vm6, %v2416_v55 }
 0x2a2   : > { %v3630_v20 = vpop.permute.xlu1 %3629 }
 0x2a3   : > { %3702 = vst.msk [vmem:[#allocation7 + $0x118] sm:$0xf] %vm2716_vm7, %v3630_v20  ;;  %v2673_v22 = vpop.permute.xlu0 %2672 }
 0x2a4   : > { %3958 = vst.msk [vmem:[#allocation7 + $0x118] sm:$0xf] %vm2973_vm8, %v3886_v33 }
 0x2a5   : > { %2743 = vst.msk [vmem:[#allocation7 + $0x138] sm:$0xf] %vm2716_vm7, %v2673_v22 }
 0x2a6   : > { %v2928_v48 = vpop.permute.xlu1 %2927 }
 0x2a7   : > { %2999 = vst.msk [vmem:[#allocation7 + $0x12c] sm:$0xf] %vm2973_vm8, %v2928_v48  ;;  %v3632_v50 = vpop.permute.xlu0 %3631 }
 0x2a8   : > { %3703 = vst.msk [vmem:[#allocation7 + $0x124] sm:$0xf] %vm2716_vm7, %v3632_v50 }
 0x2aa   : > { %v3890_v51 = vpop.permute.xlu1 %3889 }
 0x2ab   : > { %v9228_v62 = vld [vmem:[#allocation7 + $0x10c] ss:$12 sps:$4 sm:$0xff]   ;;  %v3888_v56 = vpop.permute.xlu0 %3887 }
 0x2ac   : > { %3959 = vst.msk [vmem:[#allocation7 + $0x124] sm:$0xf] %vm2973_vm8, %v3888_v56  ;;  %4782 = vmatprep.mubr.bf16.mxu1 %v9228_v62 }
 0x2ad   : > { %v8615_v4 = vpop.f32.mrf.mxu1  ;;  %4783 = vmatmul.mubr.bf16.gmra.mxu1 %v9230_v30 }
 0x2ae   : > { %v3381_v52 = vpop.permute.xlu1 %3380  ;;  %v9234_v38 = vld [vmem:[#allocation7 + $0x120] ss:$12 sps:$4 sm:$0xff]  }
 0x2af   : > { %3449 = vst.msk [vmem:[#allocation7 + $0x148] sm:$0xf] %vm2459_vm6, %v3381_v52  ;;  %v3379_v0 = vpop.permute.xlu0 %3378  ;;  %v8616_v59 = vpop.f32.mrf.mxu1 }
 0x2b0   : > { %3448 = vst.msk [vmem:[#allocation7 + $0x13c] sm:$0xf] %vm2459_vm6, %v3379_v0  ;;  %v10829_v13 = vadd.f32 %v8616_v59, %v8615_v4 }
 0x2b1   : > { %v10841_v6 = vpop.f32.mrf.mxu1 }
 0x2b2   : > { %v2422_v63 = vpop.permute.xlu1 %2421 }
 0x2b3   : > { %2489 = vst.msk [vmem:[#allocation7 + $0x15c] sm:$0xf] %vm2459_vm6, %v2422_v63  ;;  %v2930_v3 = vpop.permute.xlu0 %2929  ;;  %v10844_v16 = vpop.f32.mrf.mxu1 }
 0x2b4   : > { %3000 = vst.msk [vmem:[#allocation7 + $0x138] sm:$0xf] %vm2973_vm8, %v2930_v3  ;;  %v9245_v3 = vld [vmem:[#allocation7 + $0x20] ss:$12 sps:$4 sm:$0xff]  }
 0x2b6   : > { %v2679_v54 = vpop.permute.xlu1 %2678 }
 0x2b7   : > { %2746 = vst.msk [vmem:[#allocation7 + $0x15c] sm:$0xf] %vm2716_vm7, %v2679_v54  ;;  %v2420_v14 = vpop.permute.xlu0 %2419  ;;  %v9246_v54 = vld [vmem:[#allocation7 + $0x38] ss:$12 sps:$4 sm:$0xff]  }
 0x2b8   : > { %2488 = vst.msk [vmem:[#allocation7 + $0x150] sm:$0xf] %vm2459_vm6, %v2420_v14  ;;  %v9247_v14 = vld [vmem:[#allocation7 + $0x50] ss:$12 sps:$4 sm:$0xff]  }
 0x2ba   : > { %v3634_v8 = vpop.permute.xlu1 %3633 }
 0x2bb   : > { %3704 = vst.msk [vmem:[#allocation7 + $0x130] sm:$0xf] %vm2716_vm7, %v3634_v8  ;;  %v2677_v1 = vpop.permute.xlu0 %2676 }
 0x2bc   : > { %3960 = vst.msk [vmem:[#allocation7 + $0x130] sm:$0xf] %vm2973_vm8, %v3890_v51 }
 0x2bd   : > { %2745 = vst.msk [vmem:[#allocation7 + $0x150] sm:$0xf] %vm2716_vm7, %v2677_v1  ;;  %v9248_v1 = vld [vmem:[#allocation7 + $0x68] ss:$12 sps:$4 sm:$0xff]  }
 0x2be   : > { %v2932_v9 = vpop.permute.xlu1 %2931 }
 0x2bf   : > { %3001 = vst.msk [vmem:[#allocation7 + $0x144] sm:$0xf] %vm2973_vm8, %v2932_v9  ;;  %v3636_v15 = vpop.permute.xlu0 %3635 }
 0x2c0   : > { %3705 = vst.msk [vmem:[#allocation7 + $0x13c] sm:$0xf] %vm2716_vm7, %v3636_v15 }
 0x2c2   : > { %v3894_v12 = vpop.permute.xlu1 %3893 }
 0x2c3   : > { %v9232_v10 = vld [vmem:[#allocation7 + $0x124] ss:$12 sps:$4 sm:$0xff]   ;;  %v3892_v19 = vpop.permute.xlu0 %3891 }
 0x2c4   : > { %3961 = vst.msk [vmem:[#allocation7 + $0x13c] sm:$0xf] %vm2973_vm8, %v3892_v19  ;;  %4790 = vmatprep.mubr.bf16.mxu1 %v9232_v10  ;;  %v8621_v21 = vpop.f32.mrf.mxu1 }
 0x2c5   : > { %4791 = vmatmul.mubr.bf16.gmra.mxu1 %v9234_v38  ;;  %v9250_v38 = vld [vmem:[#allocation7 + $0x98] ss:$12 sps:$4 sm:$0xff]  }
 0x2c6   : > { %v3385_v24 = vpop.permute.xlu1 %3384  ;;  %v8622_v18 = vpop.f32.mrf.mxu1  ;;  %v9237_v43 = vld [vmem:[#allocation7 + $0x138] ss:$12 sps:$4 sm:$0xff]  }
 0x2c7   : > { %3451 = vst.msk [vmem:[#allocation7 + $0x160] sm:$0xf] %vm2459_vm6, %v3385_v24  ;;  %v3383_v29 = vpop.permute.xlu0 %3382  ;;  %v10849_v31 = vadd.f32 %v8622_v18, %v8621_v21  ;;  %v9251_v24 = vld [vmem:[#allocation7 + $0xb0] ss:$12 sps:$4 sm:$0xff]   ;;  %v9252_v21 = vld [vmem:[#allocation7 + $0xc8] ss:$12 sps:$4 sm:$0xff]  }
 0x2c8   : > { %3450 = vst.msk [vmem:[#allocation7 + $0x154] sm:$0xf] %vm2459_vm6, %v3383_v29  ;;  %v10859_v7 = vpop.f32.mrf.mxu1  ;;  %v9253_v29 = vld [vmem:[#allocation7 + $0xe0] ss:$12 sps:$4 sm:$0xff]  }
 0x2ca   : > { %v2426_v17 = vpop.permute.xlu1 %2425  ;;  %v10862_v45 = vpop.f32.mrf.mxu1 }
 0x2cb   : > { %2491 = vst.msk [vmem:[#allocation7 + $0x174] sm:$0xf] %vm2459_vm6, %v2426_v17  ;;  %v2934_v41 = vpop.permute.xlu0 %2933  ;;  %v9254_v17 = vld [vmem:[#allocation7 + $0xf8] ss:$12 sps:$4 sm:$0xff]  }
 0x2cc   : > { %3002 = vst.msk [vmem:[#allocation7 + $0x150] sm:$0xf] %vm2973_vm8, %v2934_v41 }
 0x2ce   : > { %v2683_v23 = vpop.permute.xlu1 %2682 }
 0x2cf   : > { %2748 = vst.msk [vmem:[#allocation7 + $0x174] sm:$0xf] %vm2716_vm7, %v2683_v23  ;;  %v2424_v2 = vpop.permute.xlu0 %2423  ;;  %v9260_v23 = vld [vmem:[%s11662_s5 + $0x118] sm:$0xff]  }
 0x2d0   : > { %2490 = vst.msk [vmem:[#allocation7 + $0x168] sm:$0xf] %vm2459_vm6, %v2424_v2  ;;  %9020 = vmatprep.subr.bf16.mxu0 %v9260_v23 }
 0x2d1   : > { %9021 = vmatpush3.bf16.msra.mxu0 %v9260_v23 }
 0x2d2   : > { %v3638_v39 = vpop.permute.xlu1 %3637 }
 0x2d3   : > { %3706 = vst.msk [vmem:[#allocation7 + $0x148] sm:$0xf] %vm2716_vm7, %v3638_v39  ;;  %v2681_v33 = vpop.permute.xlu0 %2680  ;;  %v9255_v39 = vld [vmem:[#allocation7 + $0x110] ss:$12 sps:$4 sm:$0xff]  }
 0x2d4   : > { %3962 = vst.msk [vmem:[#allocation7 + $0x148] sm:$0xf] %vm2973_vm8, %v3894_v12  ;;  %v9249_v12 = vld [vmem:[#allocation7 + $0x80] ss:$12 sps:$4 sm:$0xff]  }
 0x2d5   : > { %2747 = vst.msk [vmem:[#allocation7 + $0x168] sm:$0xf] %vm2716_vm7, %v2681_v33 }
 0x2d6   : > { %v2936_v25 = vpop.permute.xlu1 %2935 }
 0x2d7   : > { %3003 = vst.msk [vmem:[#allocation7 + $0x15c] sm:$0xf] %vm2973_vm8, %v2936_v25  ;;  %v3640_v40 = vpop.permute.xlu0 %3639  ;;  %v9256_v25 = vld [vmem:[#allocation7 + $0x128] ss:$12 sps:$4 sm:$0xff]  }
 0x2d8   : > { %3707 = vst.msk [vmem:[#allocation7 + $0x154] sm:$0xf] %vm2716_vm7, %v3640_v40 }
 0x2da   : > { %v3898_v35 = vpop.permute.xlu1 %3897 }
 0x2db   : > { %v9235_v42 = vld [vmem:[#allocation7 + $0x13c] ss:$12 sps:$4 sm:$0xff]   ;;  %v3896_v47 = vpop.permute.xlu0 %3895 }
 0x2dc   : > { %3963 = vst.msk [vmem:[#allocation7 + $0x154] sm:$0xf] %vm2973_vm8, %v3896_v47  ;;  %4798 = vmatprep.mubr.bf16.mxu1 %v9235_v42  ;;  %v8627_v61 = vpop.f32.mrf.mxu1  ;;  %v9257_v47 = vld [vmem:[#allocation7 + $0x140] ss:$12 sps:$4 sm:$0xff]  }
 0x2dd   : > { %4799 = vmatmul.mubr.bf16.gmra.mxu1 %v9237_v43 }
 0x2de   : > { %v3389_v34 = vpop.permute.xlu1 %3388  ;;  %v8628_v20 = vpop.f32.mrf.mxu1  ;;  %v9240_v52 = vld [vmem:[#allocation7 + $0x150] ss:$12 sps:$4 sm:$0xff]  }
 0x2df   : > { %3453 = vst.msk [vmem:[#allocation7 + $0x178] sm:$0xf] %vm2459_vm6, %v3389_v34  ;;  %v3387_v55 = vpop.permute.xlu0 %3386  ;;  %v10867_v22 = vadd.f32 %v8628_v20, %v8627_v61  ;;  %v9258_v34 = vld [vmem:[#allocation7 + $0x158] ss:$12 sps:$4 sm:$0xff]   ;;  %v9259_v61 = vld [vmem:[#allocation7 + $0x170] ss:$12 sps:$4 sm:$0xff]  }
 0x2e0   : > { %3452 = vst.msk [vmem:[#allocation7 + $0x16c] sm:$0xf] %vm2459_vm6, %v3387_v55  ;;  %v10878_v4 = vpop.f32.mrf.mxu1 }
 0x2e1   : > { %3709 = vst.msk [vmem:[#allocation7 + $0x16c] sm:$0xf] %vm2716_vm7, %v10161_v44 }
 0x2e2   : > { %v3642_v48 = vpop.permute.xlu1 %3641  ;;  %v10880_v5 = vpop.f32.mrf.mxu1 }
 0x2e3   : > { %3708 = vst.msk [vmem:[#allocation7 + $0x160] sm:$0xf] %vm2716_vm7, %v3642_v48  ;;  %v2938_v50 = vpop.permute.xlu0 %2937 }
 0x2e4   : > { %3964 = vst.msk [vmem:[#allocation7 + $0x160] sm:$0xf] %vm2973_vm8, %v3898_v35  ;;  %3004 = vst.msk [vmem:[#allocation7 + $0x168] sm:$0xf] %vm2973_vm8, %v2938_v50 }
 0x2e6   : > { %v3646_v51 = vpop.permute.xlu1 %3645 }
 0x2e7   : > { %3710 = vst.msk [vmem:[#allocation7 + $0x178] sm:$0xf] %vm2716_vm7, %v3646_v51  ;;  %v3900_v62 = vpop.permute.xlu0 %3899 }
 0x2e8   : > { %3965 = vst.msk [vmem:[#allocation7 + $0x16c] sm:$0xf] %vm2973_vm8, %v3900_v62 }
 0x2ea   : > { %v2940_v30 = vpop.permute.xlu1 %2939 }
 0x2eb   : > { %3005 = vst.msk [vmem:[#allocation7 + $0x174] sm:$0xf] %vm2973_vm8, %v2940_v30  ;;  %v9238_v56 = vld [vmem:[#allocation7 + $0x154] ss:$12 sps:$4 sm:$0xff]  }
 0x2ec   : > { %4806 = vmatprep.mubr.bf16.mxu1 %v9238_v56 }
 0x2ed   : > { %4807 = vmatmul.mubr.bf16.gmra.mxu1 %v9240_v52 }
 0x2ee   : > { %v3902_v44 = vpop.permute.xlu1 %3901 }
 0x2ef   : > { %3966 = vst.msk [vmem:[#allocation7 + $0x178] sm:$0xf] %vm2973_vm8, %v3902_v44 }
 0x2f2   : > { %v9243_v59 = vld [vmem:[#allocation7 + $0x168] ss:$12 sps:$4 sm:$0xff]  }
 0x2f4   : > { %v8633_v58 = vpop.f32.mrf.mxu1 }
 0x2f6   : > { %v9241_v0 = vld [vmem:[#allocation7 + $0x16c] ss:$12 sps:$4 sm:$0xff]   ;;  %v8634_v57 = vpop.f32.mrf.mxu1 }
 0x2f7   : > { %4814 = vmatprep.mubr.bf16.mxu1 %v9241_v0  ;;  %v10882_v63 = vadd.f32 %v8634_v57, %v8633_v58 }
 0x2f8   : > { %4815 = vmatmul.mubr.bf16.gmra.mxu1 %v9243_v59  ;;  %v10887_v8 = vpop.f32.mrf.mxu1  ;;  %v5167_v59 = vld [vmem:[#allocation3 + $0x1] sm:$0xff] }
 0x2f9   : > { %8988 = vmatprep.mubr.msk.bf16.mxu1 %vm1730_vm3, %v9244_v60  ;;  %v8380_v57 = vpack.c.bf16 %v5167_v59, %v5167_v59  ;;  %v9269_v59 = vld [vmem:[%s11662_s5 + $0x38] sm:$0xff]  }
 0x2fa   : > { %v10891_v9 = vpop.f32.mrf.mxu1 }
 0x2fb   : > { %5199 = vrot.lane.b32.xlu0 %v8380_v57, %s9427_s29  ;;  %v9270_v57 = vld [vmem:[%s11662_s5 + $0x70] sm:$0xff]  }
 0x300   : > { %8989 = vmatmul.mubr.msk.bf16.vlgmr.msra.gmra.mxu1 %vm1730_vm3, %v9245_v3 }
 0x301   : > { %8992 = vmatprep.mubr.msk.bf16.mxu1 %vm1730_vm3, %v9246_v54  ;;  %v9261_v54 = vld [vmem:[%s11662_s5 + $0x110] sm:$0xff]  }
 0x302   : > { %9022 = vmatprep.subr.bf16.mxu0 %v9261_v54 }
 0x303   : > { %9023 = vmatpush3.bf16.msra.mxu0 %v9261_v54 }
 0x308   : > { %8993 = vmatmul.mubr.msk.bf16.gmra.mxu1 %vm1730_vm3, %v9247_v14 }
 0x309   : > { %8996 = vmatprep.mubr.msk.bf16.mxu1 %vm1730_vm3, %v9248_v1 }
 0x30d   : > { %v8639_v15 = vpop.f32.mrf.mxu1 }
 0x30f   : > { %v8640_v10 = vpop.f32.mrf.mxu1 }
 0x310   : > { %v10893_v19 = vadd.f32 %v8640_v10, %v8639_v15  ;;  %8997 = vmatmul.mubr.msk.bf16.gmra.mxu1 %vm1730_vm3, %v9249_v12  ;;  %v9263_v10 = vld [vmem:[%s11662_s5 + $0x108] sm:$0xff]  }
 0x311   : > { %9000 = vmatprep.mubr.msk.bf16.mxu1 %vm1730_vm3, %v9250_v38  ;;  %v10899_v18 = vpop.f32.mrf.mxu1  ;;  %9024 = vmatprep.subr.bf16.mxu0 %v9263_v10 }
 0x312   : > { %9025 = vmatpush3.bf16.msra.mxu0 %v9263_v10  ;;  %v9271_v10 = vld [vmem:[%s11662_s5 + $0x30] sm:$0xff]  }
 0x313   : > { %v10903_v41 = vpop.f32.mrf.mxu1 }
 0x318   : > { %9001 = vmatmul.mubr.msk.bf16.gmra.mxu1 %vm1730_vm3, %v9251_v24  ;;  %v9264_v24 = vld [vmem:[%s11662_s5 + $0x100] sm:$0xff]  }
 0x319   : > { %9004 = vmatprep.mubr.msk.bf16.mxu1 %vm1730_vm3, %v9252_v21  ;;  %9026 = vmatprep.subr.bf16.mxu0 %v9264_v24 }
 0x31a   : > { %9027 = vmatpush3.bf16.msra.mxu0 %v9264_v24  ;;  %v9272_v24 = vld [vmem:[%s11662_s5 + $0x68] sm:$0xff]  }
 0x320   : > { %9005 = vmatmul.mubr.msk.bf16.gmra.mxu1 %vm1730_vm3, %v9253_v29 }
 0x321   : > { %9008 = vmatprep.mubr.msk.bf16.mxu1 %vm1730_vm3, %v9254_v17 }
 0x325   : > { %v8645_v2 = vpop.f32.mrf.mxu1 }
 0x327   : > { %v8646_v33 = vpop.f32.mrf.mxu1 }
 0x328   : > { %v10908_v40 = vadd.f32 %v8646_v33, %v8645_v2  ;;  %9009 = vmatmul.mubr.msk.bf16.gmra.mxu1 %vm1730_vm3, %v9255_v39  ;;  %v5576_v39 = vld [vmem:[#allocation3 + $0x92] sm:$0xff] }
 0x329   : > { %v8648_v35 = vpop.f32.mrf.mxu1  ;;  %9012 = vmatprep.mubr.msk.bf16.mxu1 %vm1730_vm3, %v9256_v25  ;;  %v8443_v33 = vpack.c.bf16 %v5576_v39, %v5576_v39 }
 0x32b   : > { %v8649_v42 = vpop.f32.mrf.mxu1  ;;  %5616 = vst.msk [vmem:[#allocation8 + $0x9c] sm:$0xf] %vm5158_vm11, %v8443_v33 }
 0x32c   : > { %v10912_v43 = vadd.f32 %v8649_v42, %v8648_v35 }
 0x330   : > { %9013 = vmatmul.mubr.msk.bf16.gmra.mxu1 %vm1730_vm3, %v9257_v47 }
 0x331   : > { %9016 = vmatprep.mubr.msk.bf16.mxu1 %vm1730_vm3, %v9258_v34 }
 0x338   : > { %9017 = vmatmul.mubr.msk.bf16.gmra.mxu1 %vm1730_vm3, %v9259_v61 }
 0x33d   : > { %v8651_v55 = vpop.f32.mrf.mxu1 }
 0x33f   : > { %v8652_v20 = vpop.f32.mrf.mxu1 }
 0x340   : > { %v10917_v48 = vadd.f32 %v8652_v20, %v8651_v55 }
 0x341   : > { %v8654_v50 = vpop.f32.mrf.mxu1 }
 0x343   : > { %v8655_v51 = vpop.f32.mrf.mxu1 }
 0x344   : > { %v10919_v62 = vadd.f32 %v8655_v51, %v8654_v50 }
 0x355   : > { %v8657_v30 = vpop.f32.mrf.mxu1 }
 0x357   : > { %v8658_v56 = vpop.f32.mrf.mxu1 }
 0x358   : > { %v10951_v52 = vadd.f32 %v8658_v56, %v8657_v30 }
 0x359   : > { %v8660_v44 = vpop.f32.mrf.mxu1 }
 0x35b   : > { %v8661_v58 = vpop.f32.mrf.mxu1 }
 0x35c   : > { %v10953_v0 = vadd.f32 %v8661_v58, %v8660_v44  ;;  %v9268_v58 = vld [vmem:[%s11662_s5 + $0x78] sm:$0xff]  }
 0x35d   : > { %8711 = vmatprep.subr.bf16.mxu1 %v9268_v58 }
 0x35e   : > { %8712 = vmatpush3.bf16.msra.mxu1 %v9269_v59 }
 0x35f   : > { %8713 = vmatprep.subr.bf16.mxu1 %v9270_v57 }
 0x362   : > { %8714 = vmatpush3.bf16.msra.mxu1 %v9271_v10  ;;  %v8614_v10 = vadd.f32 %v10824_v26, %v10821_v49  ;;  %v8632_v26 = vadd.f32 %v10880_v5, %v10878_v4 }
 0x363   : > { %8715 = vmatprep.subr.bf16.mxu1 %v9272_v24 }
 0x36d   : > { %v8663_v60 = vpop.f32.mrf.mxu1 }
 0x36f   : > { %v8664_v3 = vpop.f32.mrf.mxu1 }
 0x370   : > { %v10959_v14 = vadd.f32 %v8664_v3, %v8663_v60  ;;  %v5118_v3 = vld [vmem:[#allocation3] sm:$0xff] }
 0x371   : > { %v8666_v1 = vpop.f32.mrf.mxu1  ;;  %v8372_v54 = vpack.c.bf16 %v5118_v3, %v5118_v3 }
 0x373   : > { %v8667_v15 = vpop.f32.mrf.mxu1  ;;  %5159 = vst.msk [vmem:[#allocation8] sm:$0xf] %vm5158_vm11, %v8372_v54 }
 0x374   : > { %v10961_v12 = vadd.f32 %v8667_v15, %v8666_v1  ;;  %v5232_v1 = vld [vmem:[#allocation3 + $0x2] sm:$0xff] }
 0x385   : > { %v8669_v38 = vpop.f32.mrf.mxu1 }
 0x387   : > { %v8670_v21 = vpop.f32.mrf.mxu1 }
 0x388   : > { %v10969_v29 = vadd.f32 %v8670_v21, %v8669_v38  ;;  %v8388_v38 = vpack.c.bf16 %v5232_v1, %v5232_v1 }
 0x389   : > { %v8672_v17 = vpop.f32.mrf.mxu1 }
 0x38a   : > { %5272 = vst.msk [vmem:[#allocation8 + $0x4] sm:$0xf] %vm5158_vm11, %v8388_v38 }
 0x38b   : > { %v8673_v23 = vpop.f32.mrf.mxu1 }
 0x38c   : > { %v10971_v2 = vadd.f32 %v8673_v23, %v8672_v17  ;;  %v11009_v17 = vld [vmem:[%s11661_s4] ss:$0 sm:$0xff]  ;;  %v8608_v23 = vadd.f32 %v10806_v37, %v10803_v36 }
 0x38d   : > { %v4705_v39 = vadd.f32 %v10793_v27, %v11009_v17  ;;  %v9274_v36 = vld [vmem:[%s11662_s5 + $0x60] sm:$0xff]   ;;  %v4721_v3 = vadd.f32 %v10829_v13, %v11009_v17  ;;  %v4713_v1 = vadd.f32 %v10811_v46, %v11009_v17  ;;  %v4716_v46 = vadd.f32 %v8614_v10, %v11009_v17  ;;  %v9276_v10 = vld [vmem:[%s11662_s5 + $0x58] sm:$0xff]  }
 0x38e   : > { %v4737_v49 = vadd.f32 %v10867_v22, %v11009_v17 }
 0x39d   : > { %v8675_v25 = vpop.f32.mrf.mxu1 }
 0x39f   : > { %v8676_v35 = vpop.f32.mrf.mxu1 }
 0x3a0   : > { %v10974_v42 = vadd.f32 %v8676_v35, %v8675_v25  ;;  %v9273_v25 = vld [vmem:[%s11662_s5 + $0x28] sm:$0xff]   ;;  %v8602_v35 = vadd.f32 %v10787_v53, %v10783_v11 }
 0x3a1   : > { %v8678_v47 = vpop.f32.mrf.mxu1  ;;  %8716 = vmatpush3.bf16.msra.mxu1 %v9273_v25 }
 0x3a2   : > { %v4700_v11 = vadd.f32 %v8602_v35, %v11009_v17  ;;  %8717 = vmatprep.subr.bf16.mxu1 %v9274_v36 }
 0x3a3   : > { %v8679_v34 = vpop.f32.mrf.mxu1 }
 0x3a4   : > { %v10976_v61 = vadd.f32 %v8679_v34, %v8678_v47  ;;  %v4697_v34 = vadd.f32 %v10763_v32, %v11009_v17  ;;  %v8620_v32 = vadd.f32 %v10844_v16, %v10841_v6 }
 0x3a6   : > { %v4724_v16 = vadd.f32 %v8620_v32, %v11009_v17 }
 0x3ad   : > { %v8681_v55 = vpop.f32.mrf.mxu1 }
 0x3af   : > { %v8682_v20 = vpop.f32.mrf.mxu1 }
 0x3b0   : > { %v10978_v50 = vadd.f32 %v8682_v20, %v8681_v55  ;;  %v4708_v55 = vadd.f32 %v8608_v23, %v11009_v17 }
 0x3b1   : > { %v8684_v51 = vpop.f32.mrf.mxu1 }
 0x3b3   : > { %v8685_v30 = vpop.f32.mrf.mxu1 }
 0x3b4   : > { %v10980_v56 = vadd.f32 %v8685_v30, %v8684_v51 }
 0x3b8   : > { %v10982_v44 = vpop.f32.mrf.mxu1 }
 0x3ba   : > { %v10993_v60 = vpop.f32.mrf.mxu1 }
 0x3bc   : > { %v10995_v15 = vpop.f32.mrf.mxu1 }
 0x3be   : > { %v11004_v21 = vpop.f32.mrf.mxu1 }
 0x3c0   : > { %v8990_v33 = vpop.f32.mrf.mxu1 }
 0x3c1   : > { %v4866_v47 = vadd.f32 %v8990_v33, %v4705_v39 }
 0x3c2   : > { %v4857_v37 = vpop.f32.mrf.mxu1 }
 0x3c3   : > { %v4858_v27 = vadd.f32 %v4857_v37, %v4697_v34  ;;  %v4986_v51 = vmax.f32 %v4866_v47, 0.0 }
 0x3c4   : > { %v8991_v20 = vpop.f32.mrf.mxu1 }
 0x3c5   : > { %v4984_v30 = vmax.f32 %v4858_v27, 0.0  ;;  %v4869_v58 = vadd.f32 %v8991_v20, %v4708_v55  ;;  %v8626_v27 = vadd.f32 %v10862_v45, %v10859_v7  ;;  %v9275_v7 = vld [vmem:[%s11662_s5 + $0x20] sm:$0xff]  }
 0x3c6   : > { %v4860_v53 = vpop.f32.mrf.mxu1  ;;  %8718 = vmatpush3.bf16.msra.mxu1 %v9275_v7 }
 0x3c7   : > { %v5016_v59 = vmax.f32 %v4984_v30, %v4986_v51  ;;  %v4861_v57 = vadd.f32 %v4860_v53, %v4700_v11  ;;  %v4987_v38 = vmax.f32 %v4869_v58, 0.0  ;;  %v4729_v58 = vadd.f32 %v10849_v31, %v11009_v17  ;;  %v5200_v11 = vpop.permute.xlu0 %5199  ;;  %8719 = vmatprep.subr.bf16.mxu1 %v9276_v10 }
 0x3c8   : > { %v8994_v54 = vpop.f32.mrf.mxu1  ;;  %5224 = vst.msk [vmem:[#allocation8] sm:$0xf] %vm5223_vm12, %v5200_v11  ;;  %v4740_v53 = vadd.f32 %v8632_v26, %v11009_v17  ;;  %v4761_v10 = vadd.f32 %v10908_v40, %v11009_v17  ;;  %v9283_v40 = vld [vmem:[%s11662_s5] sm:$0xff]  }
 0x3c9   : > { %5033 = vst.msk [vmem:[#allocation6] sm:$0xff] %vm5032_vm9, %v5016_v59  ;;  %v4985_v24 = vmax.f32 %v4861_v57, 0.0  ;;  %v4882_v23 = vadd.f32 %v8994_v54, %v4721_v3  ;;  %v4732_v57 = vadd.f32 %v8626_v27, %v11009_v17 }
 0x3ca   : > { %v4873_v39 = vpop.f32.mrf.mxu1 }
 0x3cb   : > { %v5017_v33 = vmax.f32 %v4985_v24, %v4987_v38  ;;  %v4874_v6 = vadd.f32 %v4873_v39, %v4713_v1  ;;  %v4990_v13 = vmax.f32 %v4882_v23, 0.0  ;;  %v9277_v38 = vld [vmem:[%s11662_s5 + $0x18] sm:$0xff]   ;;  %v9278_v23 = vld [vmem:[%s11662_s5 + $0x50] sm:$0xff]   ;;  %v8644_v39 = vadd.f32 %v10903_v41, %v10899_v18 }
 0x3cc   : > { %v8995_v25 = vpop.f32.mrf.mxu1  ;;  %v4745_v18 = vadd.f32 %v10882_v63, %v11009_v17  ;;  %8720 = vmatpush3.bf16.msra.mxu1 %v9277_v38 }
 0x3cd   : > { %5034 = vst.msk [vmem:[#allocation6 + $0x8] sm:$0xff] %vm5032_vm9, %v5017_v33  ;;  %v4988_v35 = vmax.f32 %v4874_v6, 0.0  ;;  %v4885_v47 = vadd.f32 %v8995_v25, %v4724_v16  ;;  %v4753_v16 = vadd.f32 %v10893_v19, %v11009_v17  ;;  %v8638_v25 = vadd.f32 %v10891_v9, %v10887_v8  ;;  %8721 = vmatprep.subr.bf16.mxu1 %v9278_v23  ;;  %v9279_v8 = vld [vmem:[%s11662_s5 + $0x10] sm:$0xff]  }
 0x3ce   : > { %v4876_v34 = vpop.f32.mrf.mxu1  ;;  %v4772_v23 = vadd.f32 %v10919_v62, %v11009_v17 }
 0x3cf   : > { %v5018_v36 = vmax.f32 %v4988_v35, %v4990_v13  ;;  %v4877_v37 = vadd.f32 %v4876_v34, %v4716_v46  ;;  %v4991_v20 = vmax.f32 %v4885_v47, 0.0 }
 0x3d0   : > { %v8998_v55 = vpop.f32.mrf.mxu1  ;;  %8722 = vmatpush3.bf16.msra.mxu1 %v9279_v8 }
 0x3d1   : > { %5035 = vst.msk [vmem:[#allocation6 + $0x10] sm:$0xff] %vm5032_vm9, %v5018_v36  ;;  %v4989_v51 = vmax.f32 %v4877_v37, 0.0  ;;  %v4898_v30 = vadd.f32 %v8998_v55, %v4737_v49  ;;  %v4756_v49 = vadd.f32 %v8644_v39, %v11009_v17  ;;  %v4748_v37 = vadd.f32 %v8638_v25, %v11009_v17 }
 0x3d2   : > { %v4889_v22 = vpop.f32.mrf.mxu1 }
 0x3d3   : > { %v5019_v4 = vmax.f32 %v4989_v51, %v4991_v20  ;;  %v4890_v5 = vadd.f32 %v4889_v22, %v4729_v58  ;;  %v4994_v31 = vmax.f32 %v4898_v30, 0.0  ;;  %v9280_v51 = vld [vmem:[%s11662_s5 + $0x48] sm:$0xff]   ;;  %v9282_v58 = vld [vmem:[%s11662_s5 + $0x40] sm:$0xff]  }
 0x3d4   : > { %v5049_v45 = vld [vmem:[#allocation6] ss:$2 sm:$0xff]  ;;  %v5065_v32 = vld [vmem:[#allocation6 + $0x1] ss:$2 sm:$0xff]  ;;  %v8999_v59 = vpop.f32.mrf.mxu1  ;;  %v9281_v30 = vld [vmem:[%s11662_s5 + $0x8] sm:$0xff]   ;;  %8723 = vmatprep.subr.bf16.mxu1 %v9280_v51 }
 0x3d5   : > { %v5080_v3 = vmax.f32 %v5049_v45, %v5065_v32  ;;  %5036 = vst.msk [vmem:[#allocation6 + $0x18] sm:$0xff] %vm5032_vm9, %v5019_v4  ;;  %v4992_v54 = vmax.f32 %v4890_v5, 0.0  ;;  %v4901_v1 = vadd.f32 %v8999_v59, %v4740_v53  ;;  %v4769_v45 = vadd.f32 %v10917_v48, %v11009_v17  ;;  %8724 = vmatpush3.bf16.msra.mxu1 %v9281_v30 }
 0x3d6   : > { %v4892_v24 = vpop.f32.mrf.mxu1  ;;  %8725 = vmatprep.subr.bf16.mxu1 %v9282_v58 }
 0x3d7   : > { %v5020_v33 = vmax.f32 %v4992_v54, %v4994_v31  ;;  %v4893_v6 = vadd.f32 %v4892_v24, %v4732_v57  ;;  %5110 = vst.msk [vmem:[#allocation3 + $0x11] sm:$0xff] %vm5032_vm9, %v5080_v3  ;;  %v4995_v35 = vmax.f32 %v4901_v1, 0.0 }
 0x3d8   : > { %v9002_v13 = vpop.f32.mrf.mxu1 }
 0x3d9   : > { %5037 = vst.msk [vmem:[#allocation6 + $0x20] sm:$0xff] %vm5032_vm9, %v5020_v33  ;;  %v4993_v47 = vmax.f32 %v4893_v6, 0.0  ;;  %v4914_v46 = vadd.f32 %v9002_v13, %v4753_v16  ;;  %v4764_v16 = vadd.f32 %v10912_v43, %v11009_v17  ;;  %8726 = vmatpush3.bf16.msra.mxu1 %v9283_v40 }
 0x3da   : > { %v4905_v41 = vpop.f32.mrf.mxu1 }
 0x3db   : > { %v5021_v34 = vmax.f32 %v4993_v47, %v4995_v35  ;;  %v4906_v19 = vadd.f32 %v4905_v41, %v4745_v18  ;;  %v4998_v63 = vmax.f32 %v4914_v46, 0.0 }
 0x3dc   : > { %v5051_v9 = vld [vmem:[#allocation6 + $0x10] ss:$2 sm:$0xff]  ;;  %v5067_v26 = vld [vmem:[#allocation6 + $0x11] ss:$2 sm:$0xff]  ;;  %v9003_v36 = vpop.f32.mrf.mxu1 }
 0x3dd   : > { %v5081_v27 = vmax.f32 %v5051_v9, %v5067_v26  ;;  %5038 = vst.msk [vmem:[#allocation6 + $0x28] sm:$0xff] %vm5032_vm9, %v5021_v34  ;;  %v4996_v55 = vmax.f32 %v4906_v19, 0.0  ;;  %v4917_v20 = vadd.f32 %v9003_v36, %v4756_v49  ;;  %v4785_v49 = vadd.f32 %v10959_v14, %v11009_v17 }
 0x3de   : > { %v4908_v11 = vpop.f32.mrf.mxu1  ;;  %v5280_v22 = vld [vmem:[#allocation3 + $0x10] sm:$0xff] }
 0x3df   : > { %v5168_v4 = vld [vmem:[#allocation3 + $0x11] sm:$0xff]  ;;  %v5022_v53 = vmax.f32 %v4996_v55, %v4998_v63  ;;  %v4909_v7 = vadd.f32 %v4908_v11, %v4748_v37  ;;  %5111 = vst.msk [vmem:[#allocation3 + $0x21] sm:$0xff] %vm5032_vm9, %v5081_v27  ;;  %v8396_v32 = vpack.c.bf16 %v5280_v22, %v5280_v22  ;;  %v4999_v31 = vmax.f32 %v4917_v20, 0.0 }
 0x3e0   : > { %v5392_v5 = vld [vmem:[#allocation3 + $0x12] sm:$0xff]  ;;  %v9006_v59 = vpop.f32.mrf.mxu1  ;;  %v8381_v57 = vpack.c.bf16 %v5168_v4, %v5168_v4  ;;  %v4777_v63 = vadd.f32 %v10951_v52, %v11009_v17  ;;  %v4788_v52 = vadd.f32 %v10961_v12, %v11009_v17  ;;  %v4780_v11 = vadd.f32 %v10953_v0, %v11009_v17 }
 0x3e1   : > { %v11093_v3 = vpack.c.bf16 %v5392_v5, %v5392_v5  ;;  %5039 = vst.msk [vmem:[#allocation6 + $0x30] sm:$0xff] %vm5032_vm9, %v5022_v53  ;;  %v4997_v54 = vmax.f32 %v4909_v7, 0.0  ;;  %v4930_v1 = vadd.f32 %v9006_v59, %v4769_v45  ;;  %5312 = vrot.lane.b32.xlu0 %v8396_v32, %s9427_s29 }
 0x3e2   : > { %5160 = vst.msk [vmem:[#allocation8 + $0x14] sm:$0xf] %vm5158_vm11, %v8396_v32  ;;  %5201 = vrot.lane.b32.xlu1 %v8381_v57, %s9427_s29  ;;  %v4921_v48 = vpop.f32.mrf.mxu1  ;;  %5384 = vst.msk [vmem:[#allocation8 + $0x8] sm:$0xf] %vm5158_vm11, %v8381_v57 }
 0x3e3   : > { %5273 = vst.msk [vmem:[#allocation8 + $0x18] sm:$0xf] %vm5158_vm11, %v11093_v3  ;;  %v5023_v38 = vmax.f32 %v4997_v54, %v4999_v31  ;;  %v4922_v24 = vadd.f32 %v4921_v48, %v4761_v10  ;;  %v5002_v13 = vmax.f32 %v4930_v1, 0.0  ;;  %v4801_v31 = vadd.f32 %v10974_v42, %v11009_v17 }
 0x3e4   : > { %v5053_v39 = vld [vmem:[#allocation6 + $0x20] ss:$2 sm:$0xff]  ;;  %v5069_v33 = vld [vmem:[#allocation6 + $0x21] ss:$2 sm:$0xff]  ;;  %v9007_v6 = vpop.f32.mrf.mxu1  ;;  %v8689_v42 = vadd.f32 %v10993_v60, %v10982_v44 }
 0x3e5   : > { %v5082_v25 = vmax.f32 %v5053_v39, %v5069_v33  ;;  %5040 = vst.msk [vmem:[#allocation6 + $0x38] sm:$0xff] %vm5032_vm9, %v5023_v38  ;;  %v5000_v35 = vmax.f32 %v4922_v24, 0.0  ;;  %v4933_v47 = vadd.f32 %v9007_v6, %v4772_v23  ;;  %v4793_v23 = vadd.f32 %v10969_v29, %v11009_v17 }
 0x3e6   : > { %v4924_v46 = vpop.f32.mrf.mxu1  ;;  %v5169_v18 = vld [vmem:[#allocation3 + $0x21] sm:$0xff]  ;;  %v4804_v33 = vadd.f32 %v10976_v61, %v11009_v17  ;;  %v8692_v61 = vadd.f32 %v11004_v21, %v10995_v15  ;;  %v4809_v15 = vadd.f32 %v10978_v50, %v11009_v17 }
 0x3e7   : > { %v5281_v62 = vld [vmem:[#allocation3 + $0x20] sm:$0xff]  ;;  %5112 = vst.msk [vmem:[#allocation3 + $0x31] sm:$0xff] %vm5032_vm9, %v5082_v25  ;;  %v5024_v34 = vmax.f32 %v5000_v35, %v5002_v13  ;;  %v4925_v19 = vadd.f32 %v4924_v46, %v4764_v16  ;;  %v11115_v8 = vpack.c.bf16 %v5169_v18, %v5169_v18  ;;  %v5003_v36 = vmax.f32 %v4933_v47, 0.0 }
 0x3e8   : > { %v5569_v41 = vld [vmem:[#allocation3 + $0x22] sm:$0xff]  ;;  %v9010_v43 = vpop.f32.mrf.mxu1  ;;  %v8397_v9 = vpack.c.bf16 %v5281_v62, %v5281_v62  ;;  %v4796_v16 = vadd.f32 %v10971_v2, %v11009_v17  ;;  %v4817_v18 = vadd.f32 %v8689_v42, %v11009_v17  ;;  %v4820_v50 = vadd.f32 %v8692_v61, %v11009_v17 }
 0x3e9   : > { %v11117_v26 = vpack.c.bf16 %v5569_v41, %v5569_v41  ;;  %5041 = vst.msk [vmem:[#allocation6 + $0x40] sm:$0xff] %vm5032_vm9, %v5024_v34  ;;  %v5001_v37 = vmax.f32 %v4925_v19, 0.0  ;;  %v4946_v27 = vadd.f32 %v9010_v43, %v4785_v49  ;;  %5203 = vrot.lane.b32.xlu0 %v11115_v8, %s9427_s29 }
 0x3ea   : > { %5385 = vst.msk [vmem:[#allocation8 + $0x1c] sm:$0xf] %vm5158_vm11, %v11115_v8  ;;  %5314 = vrot.lane.b32.xlu1 %v8397_v9, %s9427_s29  ;;  %v4937_v14 = vpop.f32.mrf.mxu1  ;;  %5161 = vst.msk [vmem:[#allocation8 + $0x28] sm:$0xf] %vm5158_vm11, %v8397_v9 }
 0x3eb   : > { %5609 = vst.msk [vmem:[#allocation8 + $0x10] sm:$0xf] %vm5158_vm11, %v11117_v26  ;;  %5274 = vst.msk [vmem:[#allocation8 + $0x2c] sm:$0xf] %vm5158_vm11, %v11117_v26  ;;  %v5025_v55 = vmax.f32 %v5001_v37, %v5003_v36  ;;  %v4938_v20 = vadd.f32 %v4937_v14, %v4777_v63  ;;  %v5006_v4 = vmax.f32 %v4946_v27, 0.0 }
 0x3ec   : > { %5497 = vst.msk [vmem:[#allocation8 + $0xc] sm:$0xf] %vm5158_vm11, %v8397_v9  ;;  %v5055_v51 = vld [vmem:[#allocation6 + $0x30] ss:$2 sm:$0xff]  ;;  %v5071_v30 = vld [vmem:[#allocation6 + $0x31] ss:$2 sm:$0xff]  ;;  %v9011_v58 = vpop.f32.mrf.mxu1 }
 0x3ed   : > { %v5083_v22 = vmax.f32 %v5055_v51, %v5071_v30  ;;  %5042 = vst.msk [vmem:[#allocation6 + $0x48] sm:$0xff] %vm5032_vm9, %v5025_v55  ;;  %v5004_v5 = vmax.f32 %v4938_v20, 0.0  ;;  %v4949_v53 = vadd.f32 %v9011_v58, %v4788_v52  ;;  %v4812_v58 = vadd.f32 %v10980_v56, %v11009_v17 }
 0x3ee   : > { %v4940_v7 = vpop.f32.mrf.mxu1  ;;  %v5282_v45 = vld [vmem:[#allocation3 + $0x30] sm:$0xff] }
 0x3ef   : > { %v5170_v32 = vld [vmem:[#allocation3 + $0x31] sm:$0xff]  ;;  %5113 = vst.msk [vmem:[#allocation3 + $0x41] sm:$0xff] %vm5032_vm9, %v5083_v22  ;;  %v5026_v57 = vmax.f32 %v5004_v5, %v5006_v4  ;;  %v4941_v12 = vadd.f32 %v4940_v7, %v4780_v11  ;;  %v8398_v54 = vpack.c.bf16 %v5282_v45, %v5282_v45  ;;  %v5007_v48 = vmax.f32 %v4949_v53, 0.0  ;;  %v9290_v11 = vld [vmem:[%s11662_s5 + $0xf8] sm:$0xff]  }
 0x3f0   : > { %v5570_v59 = vld [vmem:[#allocation3 + $0x32] sm:$0xff]  ;;  %v9014_v1 = vpop.f32.mrf.mxu1  ;;  %v11141_v0 = vpack.c.bf16 %v5170_v32, %v5170_v32  ;;  %8751 = vmatprep.subr.bf16.mxu1 %v9290_v11 }
 0x3f1   : > { %v11143_v10 = vpack.c.bf16 %v5570_v59, %v5570_v59  ;;  %5043 = vst.msk [vmem:[#allocation6 + $0x50] sm:$0xff] %vm5032_vm9, %v5026_v57  ;;  %v5005_v38 = vmax.f32 %v4941_v12, 0.0  ;;  %v4962_v24 = vadd.f32 %v9014_v1, %v4801_v31  ;;  %5316 = vrot.lane.b32.xlu0 %v8398_v54, %s9427_s29  ;;  %v9298_v11 = vld [vmem:[%s11662_s5 + $0xe0] sm:$0xff]  }
 0x3f2   : > { %5162 = vst.msk [vmem:[#allocation8 + $0x3c] sm:$0xf] %vm5158_vm11, %v8398_v54  ;;  %5498 = vst.msk [vmem:[#allocation8 + $0x20] sm:$0xf] %vm5158_vm11, %v8398_v54  ;;  %5205 = vrot.lane.b32.xlu1 %v11141_v0, %s9427_s29  ;;  %v4953_v40 = vpop.f32.mrf.mxu1 }
 0x3f3   : > { %5610 = vst.msk [vmem:[#allocation8 + $0x24] sm:$0xf] %vm5158_vm11, %v11143_v10  ;;  %5275 = vst.msk [vmem:[#allocation8 + $0x40] sm:$0xf] %vm5158_vm11, %v11143_v10  ;;  %v5027_v29 = vmax.f32 %v5005_v38, %v5007_v48  ;;  %v4954_v39 = vadd.f32 %v4953_v40, %v4793_v23  ;;  %v5010_v13 = vmax.f32 %v4962_v24, 0.0 }
 0x3f4   : > { %5386 = vst.msk [vmem:[#allocation8 + $0x30] sm:$0xf] %vm5158_vm11, %v11141_v0  ;;  %v5057_v6 = vld [vmem:[#allocation6 + $0x40] ss:$2 sm:$0xff]  ;;  %v5073_v44 = vld [vmem:[#allocation6 + $0x41] ss:$2 sm:$0xff]  ;;  %v9015_v60 = vpop.f32.mrf.mxu1 }
 0x3f5   : > { %v5084_v25 = vmax.f32 %v5057_v6, %v5073_v44  ;;  %5044 = vst.msk [vmem:[#allocation6 + $0x58] sm:$0xff] %vm5032_vm9, %v5027_v29  ;;  %v5008_v35 = vmax.f32 %v4954_v39, 0.0  ;;  %v4965_v47 = vadd.f32 %v9015_v60, %v4804_v33 }
 0x3f6   : > { %v4956_v46 = vpop.f32.mrf.mxu1  ;;  %v5171_v62 = vld [vmem:[#allocation3 + $0x41] sm:$0xff] }
 0x3f7   : > { %v5283_v41 = vld [vmem:[#allocation3 + $0x40] sm:$0xff]  ;;  %5114 = vst.msk [vmem:[#allocation3 + $0x51] sm:$0xff] %vm5032_vm9, %v5084_v25  ;;  %v5028_v19 = vmax.f32 %v5008_v35, %v5010_v13  ;;  %v4957_v49 = vadd.f32 %v4956_v46, %v4796_v16  ;;  %v11170_v2 = vpack.c.bf16 %v5171_v62, %v5171_v62  ;;  %v5011_v37 = vmax.f32 %v4965_v47, 0.0 }
 0x3f8   : > { %v5571_v34 = vld [vmem:[#allocation3 + $0x42] sm:$0xff]  ;;  %v9018_v43 = vpop.f32.mrf.mxu1  ;;  %v8399_v9 = vpack.c.bf16 %v5283_v41, %v5283_v41 }
 0x3f9   : > { %v11172_v36 = vpack.c.bf16 %v5571_v34, %v5571_v34  ;;  %5045 = vst.msk [vmem:[#allocation6 + $0x60] sm:$0xff] %vm5032_vm9, %v5028_v19  ;;  %v5009_v27 = vmax.f32 %v4957_v49, 0.0  ;;  %v4978_v63 = vadd.f32 %v9018_v43, %v4817_v18  ;;  %5207 = vrot.lane.b32.xlu0 %v11170_v2, %s9427_s29 }
 0x3fa   : > { %v9262_v21 = vld [vmem:[#allocation8 + $0x10] ss:$20 sps:$4 sm:$0xff]   ;;  %5387 = vst.msk [vmem:[#allocation8 + $0x44] sm:$0xf] %vm5158_vm11, %v11170_v2  ;;  %5318 = vrot.lane.b32.xlu1 %v8399_v9, %s9427_s29  ;;  %v4969_v14 = vpop.f32.mrf.mxu1  ;;  %5163 = vst.msk [vmem:[#allocation8 + $0x50] sm:$0xf] %vm5158_vm11, %v8399_v9 }
 0x3fb   : > { %5611 = vst.msk [vmem:[#allocation8 + $0x38] sm:$0xf] %vm5158_vm11, %v11172_v36  ;;  %5276 = vst.msk [vmem:[#allocation8 + $0x54] sm:$0xf] %vm5158_vm11, %v11172_v36  ;;  %v5029_v55 = vmax.f32 %v5009_v27, %v5011_v37  ;;  %v4970_v20 = vadd.f32 %v4969_v14, %v4809_v15  ;;  %9028 = vmatprep.mubr.msk.bf16.mxu0 %vm5032_vm9, %v9262_v21  ;;  %v5014_v4 = vmax.f32 %v4978_v63, 0.0  ;;  %v9291_v15 = vld [vmem:[%s11662_s5 + $0xb8] sm:$0xff]  }
 0x3fc   : > { %5499 = vst.msk [vmem:[#allocation8 + $0x34] sm:$0xf] %vm5158_vm11, %v8399_v9  ;;  %v5059_v52 = vld [vmem:[#allocation6 + $0x50] ss:$2 sm:$0xff]  ;;  %v5075_v51 = vld [vmem:[#allocation6 + $0x51] ss:$2 sm:$0xff]  ;;  %v9019_v30 = vpop.f32.mrf.mxu1 }
 0x3fd   : > { %v5085_v22 = vmax.f32 %v5059_v52, %v5075_v51  ;;  %5046 = vst.msk [vmem:[#allocation6 + $0x68] sm:$0xff] %vm5032_vm9, %v5029_v55  ;;  %v5012_v5 = vmax.f32 %v4970_v20, 0.0  ;;  %v4981_v53 = vadd.f32 %v9019_v30, %v4820_v50  ;;  %v9292_v20 = vld [vmem:[%s11662_s5 + $0xf0] sm:$0xff]   ;;  %v9296_v52 = vld [vmem:[%s11662_s5 + $0xe8] sm:$0xff]  }
 0x3fe   : > { %v4972_v7 = vpop.f32.mrf.mxu1  ;;  %v5284_v45 = vld [vmem:[#allocation3 + $0x50] sm:$0xff]  ;;  %v9293_v50 = vld [vmem:[%s11662_s5 + $0xb0] sm:$0xff]  }
 0x3ff   : > { %v5172_v32 = vld [vmem:[#allocation3 + $0x51] sm:$0xff]  ;;  %5115 = vst.msk [vmem:[#allocation3 + $0x61] sm:$0xff] %vm5032_vm9, %v5085_v22  ;;  %v5030_v57 = vmax.f32 %v5012_v5, %v5014_v4  ;;  %v4973_v12 = vadd.f32 %v4972_v7, %v4812_v58  ;;  %v8400_v56 = vpack.c.bf16 %v5284_v45, %v5284_v45  ;;  %v5015_v54 = vmax.f32 %v4981_v53, 0.0  ;;  %v9300_v4 = vld [vmem:[%s11662_s5 + $0xd8] sm:$0xff]  }
 0x400   : > { %v5572_v59 = vld [vmem:[#allocation3 + $0x52] sm:$0xff]  ;;  %v11197_v17 = vpack.c.bf16 %v5172_v32, %v5172_v32  ;;  %v9301_v53 = vld [vmem:[%s11662_s5 + $0x98] sm:$0xff]  }
 0x401   : > { %v11199_v31 = vpack.c.bf16 %v5572_v59, %v5572_v59  ;;  %5047 = vst.msk [vmem:[#allocation6 + $0x70] sm:$0xff] %vm5032_vm9, %v5030_v57  ;;  %v5013_v1 = vmax.f32 %v4973_v12, 0.0  ;;  %5320 = vrot.lane.b32.xlu0 %v8400_v56, %s9427_s29  ;;  %v9297_v58 = vld [vmem:[%s11662_s5 + $0xa8] sm:$0xff]   ;;  %v9299_v22 = vld [vmem:[%s11662_s5 + $0xa0] sm:$0xff]   ;;  %v9302_v59 = vld [vmem:[%s11662_s5 + $0xd0] sm:$0xff]  }
 0x402   : > { %5164 = vst.msk [vmem:[#allocation8 + $0x64] sm:$0xf] %vm5158_vm11, %v8400_v56  ;;  %5500 = vst.msk [vmem:[#allocation8 + $0x48] sm:$0xf] %vm5158_vm11, %v8400_v56  ;;  %5209 = vrot.lane.b32.xlu1 %v11197_v17, %s9427_s29  ;;  %v9303_v57 = vld [vmem:[%s11662_s5 + $0x90] sm:$0xff]   ;;  %v9306_v12 = vld [vmem:[%s11662_s5 + $0xc8] sm:$0xff]  }
 0x403   : > { %5612 = vst.msk [vmem:[#allocation8 + $0x4c] sm:$0xf] %vm5158_vm11, %v11199_v31  ;;  %5277 = vst.msk [vmem:[#allocation8 + $0x68] sm:$0xf] %vm5158_vm11, %v11199_v31  ;;  %v5031_v48 = vmax.f32 %v5013_v1, %v5015_v54  ;;  %v9308_v54 = vld [vmem:[%s11662_s5 + $0xc0] sm:$0xff]  }
 0x404   : > { %5388 = vst.msk [vmem:[#allocation8 + $0x58] sm:$0xf] %vm5158_vm11, %v11197_v17  ;;  %v5061_v38 = vld [vmem:[#allocation6 + $0x60] ss:$2 sm:$0xff]  ;;  %v5077_v24 = vld [vmem:[#allocation6 + $0x61] ss:$2 sm:$0xff] }
 0x405   : > { %v5086_v23 = vmax.f32 %v5061_v38, %v5077_v24  ;;  %5048 = vst.msk [vmem:[#allocation6 + $0x78] sm:$0xff] %vm5032_vm9, %v5031_v48  ;;  %v9309_v1 = vld [vmem:[%s11662_s5 + $0x80] sm:$0xff]  }
 0x406   : > { %v5173_v42 = vld [vmem:[#allocation3 + $0x61] sm:$0xff] }
 0x407   : > { %v5285_v40 = vld [vmem:[#allocation3 + $0x60] sm:$0xff]  ;;  %5116 = vst.msk [vmem:[#allocation3 + $0x71] sm:$0xff] %vm5032_vm9, %v5086_v23  ;;  %v8386_v39 = vpack.c.bf16 %v5173_v42, %v5173_v42 }
 0x408   : > { %v5573_v29 = vld [vmem:[#allocation3 + $0x62] sm:$0xff]  ;;  %v8401_v33 = vpack.c.bf16 %v5285_v40, %v5285_v40 }
 0x409   : > { %v8440_v6 = vpack.c.bf16 %v5573_v29, %v5573_v29  ;;  %5211 = vrot.lane.b32.xlu0 %v8386_v39, %s9427_s29  ;;  %5389 = vst.msk [vmem:[#allocation8 + $0x6c] sm:$0xf] %vm5158_vm11, %v8386_v39 }
 0x40a   : > { %5322 = vrot.lane.b32.xlu1 %v8401_v33, %s9427_s29  ;;  %v9265_v44 = vld [vmem:[#allocation8 + $0x38] ss:$20 sps:$4 sm:$0xff]   ;;  %5165 = vst.msk [vmem:[#allocation8 + $0x78] sm:$0xf] %vm5158_vm11, %v8401_v33  ;;  %5501 = vst.msk [vmem:[#allocation8 + $0x5c] sm:$0xf] %vm5158_vm11, %v8401_v33 }
 0x40b   : > { %5613 = vst.msk [vmem:[#allocation8 + $0x60] sm:$0xf] %vm5158_vm11, %v8440_v6  ;;  %5278 = vst.msk [vmem:[#allocation8 + $0x7c] sm:$0xf] %vm5158_vm11, %v8440_v6  ;;  %9029 = vmatmul.mubr.msk.bf16.vlgmr.msra.gmra.mxu0 %vm5032_vm9, %v9265_v44 }
 0x40c   : > { %v5063_v60 = vld [vmem:[#allocation6 + $0x70] ss:$2 sm:$0xff]  ;;  %v5079_v16 = vld [vmem:[#allocation6 + $0x71] ss:$2 sm:$0xff] }
 0x40d   : > { %v5087_v25 = vmax.f32 %v5063_v60, %v5079_v16 }
 0x40e   : > { %v5286_v13 = vld [vmem:[#allocation3 + $0x70] sm:$0xff] }
 0x40f   : > { %v5174_v35 = vld [vmem:[#allocation3 + $0x71] sm:$0xff]  ;;  %5117 = vst.msk [vmem:[#allocation3 + $0x81] sm:$0xff] %vm5032_vm9, %v5087_v25  ;;  %v8402_v46 = vpack.c.bf16 %v5286_v13, %v5286_v13 }
 0x410   : > { %v5574_v47 = vld [vmem:[#allocation3 + $0x72] sm:$0xff]  ;;  %v8387_v18 = vpack.c.bf16 %v5174_v35, %v5174_v35 }
 0x411   : > { %v8441_v62 = vpack.c.bf16 %v5574_v47, %v5574_v47  ;;  %5324 = vrot.lane.b32.xlu0 %v8402_v46, %s9427_s29  ;;  %5166 = vst.msk [vmem:[#allocation8 + $0x8c] sm:$0xf] %vm5158_vm11, %v8402_v46  ;;  %5502 = vst.msk [vmem:[#allocation8 + $0x70] sm:$0xf] %vm5158_vm11, %v8402_v46 }
 0x412   : > { %5213 = vrot.lane.b32.xlu1 %v8387_v18, %s9427_s29  ;;  %5390 = vst.msk [vmem:[#allocation8 + $0x80] sm:$0xf] %vm5158_vm11, %v8387_v18 }
 0x413   : > { %5614 = vst.msk [vmem:[#allocation8 + $0x74] sm:$0xf] %vm5158_vm11, %v8441_v62  ;;  %5279 = vst.msk [vmem:[#allocation8 + $0x90] sm:$0xf] %vm5158_vm11, %v8441_v62 }
 0x415   : > { %5424 = vrot.lane.b32.xlu0 %v11093_v3, %s9427_s29 }
 0x416   : > { %v5287_v41 = vld [vmem:[#allocation3 + $0x80] sm:$0xff] }
 0x417   : > { %v5575_v34 = vld [vmem:[#allocation3 + $0x82] sm:$0xff]  ;;  %v8403_v19 = vpack.c.bf16 %v5287_v41, %v5287_v41 }
 0x418   : > { %v5511_v61 = vld [vmem:[#allocation3 + $0x81] sm:$0xff]  ;;  %v8442_v49 = vpack.c.bf16 %v5575_v34, %v5575_v34 }
 0x419   : > { %v8434_v43 = vpack.c.bf16 %v5511_v61, %v5511_v61  ;;  %5537 = vrot.lane.b32.xlu0 %v11115_v8, %s9427_s29  ;;  %5326 = vrot.lane.b32.xlu1 %v8403_v19, %s9427_s29  ;;  %5503 = vst.msk [vmem:[#allocation8 + $0x84] sm:$0xf] %vm5158_vm11, %v8403_v19  ;;  %v5464_v8 = vld [vmem:[#allocation3 + $0x90] sm:$0xff] }
 0x41a   : > { %v9266_v9 = vld [vmem:[#allocation8 + $0x60] ss:$20 sps:$4 sm:$0xff]   ;;  %5615 = vst.msk [vmem:[#allocation8 + $0x88] sm:$0xf] %vm5158_vm11, %v8442_v49 }
 0x41b   : > { %5391 = vst.msk [vmem:[#allocation8 + $0x94] sm:$0xf] %vm5158_vm11, %v8434_v43  ;;  %9032 = vmatprep.mubr.msk.bf16.mxu0 %vm5032_vm9, %v9266_v9 }
 0x41d   : > { %5428 = vrot.lane.b32.xlu0 %v11143_v10, %s9427_s29  ;;  %5426 = vrot.lane.b32.xlu1 %v11117_v26, %s9427_s29  ;;  %v8427_v26 = vpack.c.bf16 %v5464_v8, %v5464_v8 }
 0x41f   : > { %5504 = vst.msk [vmem:[#allocation8 + $0x98] sm:$0xf] %vm5158_vm11, %v8427_v26 }
 0x421   : > { %v9267_v3 = vld [vmem:[#allocation8 + $0x88] ss:$20 sps:$4 sm:$0xff]   ;;  %5541 = vrot.lane.b32.xlu0 %v11170_v2, %s9427_s29  ;;  %5539 = vrot.lane.b32.xlu1 %v11141_v0, %s9427_s29  ;;  %v5512_v0 = vld [vmem:[#allocation3 + $0x91] sm:$0xff] }
 0x422   : > { %9033 = vmatmul.mubr.msk.bf16.gmra.mxu0 %vm5032_vm9, %v9267_v3  ;;  %v8435_v10 = vpack.c.bf16 %v5512_v0, %v5512_v0 }
 0x425   : > { %5432 = vrot.lane.b32.xlu0 %v11199_v31, %s9427_s29  ;;  %5430 = vrot.lane.b32.xlu1 %v11172_v36, %s9427_s29  ;;  %v9307_v31 = vld [vmem:[%s11662_s5 + $0x88] sm:$0xff]  }
 0x429   : > { %5545 = vrot.lane.b32.xlu0 %v8386_v39, %s9427_s29  ;;  %5543 = vrot.lane.b32.xlu1 %v11197_v17, %s9427_s29 }
 0x42d   : > { %5436 = vrot.lane.b32.xlu0 %v8441_v62, %s9427_s29  ;;  %5434 = vrot.lane.b32.xlu1 %v8440_v6, %s9427_s29 }
 0x431   : > { %5549 = vrot.lane.b32.xlu0 %v8434_v43, %s9427_s29  ;;  %5547 = vrot.lane.b32.xlu1 %v8387_v18, %s9427_s29 }
 0x435   : > { %5438 = vrot.lane.b32.xlu1 %v8442_v49, %s9427_s29 }
 0x439   : > { %5551 = vrot.lane.b32.xlu1 %v8435_v10, %s9427_s29 }
 0x453   : > { %v5313_v2 = vpop.permute.xlu0 %5312 }
 0x454   : > { %5336 = vst.msk [vmem:[#allocation8 + $0x4] sm:$0xf] %vm5223_vm12, %v5313_v2  ;;  %v5202_v36 = vpop.permute.xlu1 %5201 }
 0x455   : > { %5225 = vst.msk [vmem:[#allocation8 + $0x14] sm:$0xf] %vm5223_vm12, %v5202_v36 }
 0x45b   : > { %v5204_v37 = vpop.permute.xlu0 %5203 }
 0x45c   : > { %5226 = vst.msk [vmem:[#allocation8 + $0x28] sm:$0xf] %vm5223_vm12, %v5204_v37  ;;  %v5315_v27 = vpop.permute.xlu1 %5314  ;;  %v9284_v14 = vld [vmem:[#allocation8] ss:$20 sps:$4 sm:$0xff]  }
 0x45d   : > { %5337 = vst.msk [vmem:[#allocation8 + $0x18] sm:$0xf] %vm5223_vm12, %v5315_v27  ;;  %v6328_v27 = vld [vmem:[#allocation4 + $0x1] sm:$0xff] }
 0x463   : > { %v5317_v63 = vpop.permute.xlu0 %5316 }
 0x464   : > { %5338 = vst.msk [vmem:[#allocation8 + $0x2c] sm:$0xf] %vm5223_vm12, %v5317_v63  ;;  %v5206_v21 = vpop.permute.xlu1 %5205  ;;  %v9286_v55 = vld [vmem:[#allocation8 + $0x4] ss:$20 sps:$4 sm:$0xff]   ;;  %v8452_v63 = vpack.c.bf16 %v6328_v27, %v6328_v27 }
 0x465   : > { %5227 = vst.msk [vmem:[#allocation8 + $0x3c] sm:$0xf] %vm5223_vm12, %v5206_v21  ;;  %6080 = vmatprep.mubr.bf16.mxu1 %v9286_v55  ;;  %v6640_v21 = vld [vmem:[#allocation4 + $0x90] sm:$0xff] }
 0x466   : > { %6081 = vmatmul.mubr.bf16.vlgmr.msra.gmra.mxu1 %v9284_v14  ;;  %6360 = vrot.lane.b32.xlu0 %v8452_v63, %s9426_s28  ;;  %v8499_v55 = vpack.c.bf16 %v6640_v21, %v6640_v21 }
 0x467   : > { %8752 = vmatpush3.bf16.msra.mxu1 %v9291_v15  ;;  %v6392_v15 = vld [vmem:[#allocation4 + $0x2] sm:$0xff] }
 0x468   : > { %8753 = vmatprep.subr.bf16.mxu1 %v9292_v20  ;;  %v8460_v14 = vpack.c.bf16 %v6392_v15, %v6392_v15  ;;  %6679 = vrot.lane.b32.xlu1 %v8499_v55, %s9427_s29  ;;  %v9322_v20 = vld [vmem:[%s11664_s7 + $0x88] sm:$0xff]  }
 0x469   : > { %9036 = vmatprep.subr.bf16.mxu0 %v9322_v20 }
 0x46a   : > { %6424 = vrot.lane.b32.xlu0 %v8460_v14, %s9427_s29  ;;  %9037 = vmatpush3.bf16.msra.mxu0 %v9322_v20 }
 0x46b   : > { %v5208_v51 = vpop.permute.xlu0 %5207  ;;  %8754 = vmatpush3.bf16.msra.mxu1 %v9293_v50  ;;  %v9324_v50 = vld [vmem:[%s11664_s7 + $0x80] sm:$0xff]  }
 0x46c   : > { %5228 = vst.msk [vmem:[#allocation8 + $0x50] sm:$0xf] %vm5223_vm12, %v5208_v51  ;;  %v5319_v30 = vpop.permute.xlu1 %5318  ;;  %8755 = vmatprep.subr.bf16.mxu1 %v9296_v52  ;;  %v9289_v32 = vld [vmem:[#allocation8 + $0x28] ss:$20 sps:$4 sm:$0xff]   ;;  %9038 = vmatprep.subr.bf16.mxu0 %v9324_v50  ;;  %v6768_v52 = vld [vmem:[#allocation4 + $0x92] sm:$0xff] }
 0x46d   : > { %5339 = vst.msk [vmem:[#allocation8 + $0x40] sm:$0xf] %vm5223_vm12, %v5319_v30  ;;  %v8515_v51 = vpack.c.bf16 %v6768_v52, %v6768_v52 }
 0x46e   : > { %9039 = vmatpush3.bf16.msra.mxu0 %v9324_v50  ;;  %v9333_v50 = vld [vmem:[%s11664_s7 + $0x28] sm:$0xff]  }
 0x46f   : > { %8756 = vmatpush3.bf16.msra.mxu1 %v9297_v58  ;;  %9048 = vmatprep.subr.mxu0 %v9425_v28  ;;  %6808 = vst.msk [vmem:[#allocation9 + $0x5c] sm:$0xf] %vm2202_vm5, %v8515_v51  ;;  %v9334_v51 = vld [vmem:[%s11664_s7 + $0x60] sm:$0xff]  }
 0x470   : > { %8757 = vmatprep.subr.bf16.mxu1 %v9298_v11 }
 0x473   : > { %v5321_v5 = vpop.permute.xlu0 %5320  ;;  %8758 = vmatpush3.bf16.msra.mxu1 %v9299_v22 }
 0x474   : > { %5340 = vst.msk [vmem:[#allocation8 + $0x54] sm:$0xf] %vm5223_vm12, %v5321_v5  ;;  %v5210_v7 = vpop.permute.xlu1 %5209  ;;  %v9287_v45 = vld [vmem:[#allocation8 + $0x2c] ss:$20 sps:$4 sm:$0xff]   ;;  %8759 = vmatprep.subr.bf16.mxu1 %v9300_v4 }
 0x475   : > { %5229 = vst.msk [vmem:[#allocation8 + $0x64] sm:$0xf] %vm5223_vm12, %v5210_v7  ;;  %6088 = vmatprep.mubr.bf16.mxu1 %v9287_v45 }
 0x476   : > { %6089 = vmatmul.mubr.bf16.gmra.mxu1 %v9289_v32  ;;  %v6280_v32 = vld [vmem:[#allocation4] sm:$0xff] }
 0x477   : > { %8760 = vmatpush3.bf16.msra.mxu1 %v9301_v53 }
 0x478   : > { %8761 = vmatprep.subr.bf16.mxu1 %v9302_v59  ;;  %v9328_v59 = vld [vmem:[%s11664_s7 + $0x78] sm:$0xff]  }
 0x47b   : > { %v5212_v56 = vpop.permute.xlu0 %5211  ;;  %8762 = vmatpush3.bf16.msra.mxu1 %v9303_v57  ;;  %v5629_v24 = vld [vmem:[#allocation8 + $0x50] sm:$0xff] }
 0x47c   : > { %v5323_v17 = vpop.permute.xlu1 %5322  ;;  %5230 = vst.msk [vmem:[#allocation8 + $0x78] sm:$0xf] %vm5223_vm12, %v5212_v56  ;;  %8763 = vmatprep.subr.bf16.mxu1 %v9306_v12  ;;  %v8444_v12 = vpack.c.bf16 %v6280_v32, %v6280_v32 }
 0x47d   : > { %5341 = vst.msk [vmem:[#allocation8 + $0x68] sm:$0xf] %vm5223_vm12, %v5323_v17 }
 0x47e   : > { %6320 = vst.msk [vmem:[#allocation9] sm:$0xf] %vm2202_vm5, %v8444_v12 }
 0x47f   : > { %8764 = vmatpush3.bf16.msra.mxu1 %v9307_v31 }
 0x480   : > { %8765 = vmatprep.subr.bf16.mxu1 %v9308_v54 }
 0x483   : > { %v5325_v48 = vpop.permute.xlu0 %5324  ;;  %8766 = vmatpush3.bf16.msra.mxu1 %v9309_v1 }
 0x484   : > { %v5214_v38 = vpop.permute.xlu1 %5213  ;;  %v5632_v23 = vld [vmem:[#allocation8 + $0x64] sm:$0xff]  ;;  %5342 = vst.msk [vmem:[#allocation8 + $0x7c] sm:$0xf] %vm5223_vm12, %v5325_v48  ;;  %8799 = vmatprep.subr.bf16.mxu1 %v9328_v59 }
 0x485   : > { %v9294_v42 = vld [vmem:[#allocation8 + $0x54] ss:$20 sps:$4 sm:$0xff]   ;;  %5231 = vst.msk [vmem:[#allocation8 + $0x8c] sm:$0xf] %vm5223_vm12, %v5214_v38  ;;  %v7922_v40 = vcombine.low %v5629_v24, %v5632_v23  ;;  %v11367_v23 = vld [vmem:[%s11663_s6] ss:$0 sm:$0xff] }
 0x486   : > { %6096 = vmatprep.mubr.bf16.mxu1 %v9294_v42 }
 0x487   : > { %6097 = vmatmul.mubr.bf16.gmra.mxu1 %v7922_v40  ;;  %v5425_v29 = vpop.permute.xlu0 %5424 }
 0x488   : > { %5448 = vst.msk [vmem:[#allocation8 + $0x8] sm:$0xf] %vm5223_vm12, %v5425_v29 }
 0x48b   : > { %v5538_v39 = vpop.permute.xlu0 %5537  ;;  %v5327_v33 = vpop.permute.xlu1 %5326  ;;  %v5635_v60 = vld [vmem:[#allocation8 + $0x78] sm:$0xff] }
 0x48c   : > { %5561 = vst.msk [vmem:[#allocation8 + $0xc] sm:$0xf] %vm5223_vm12, %v5538_v39  ;;  %5343 = vst.msk [vmem:[#allocation8 + $0x90] sm:$0xf] %vm5223_vm12, %v5327_v33 }
 0x48f   : > { %v5429_v6 = vpop.permute.xlu0 %5428  ;;  %v5427_v44 = vpop.permute.xlu1 %5426 }
 0x490   : > { %5450 = vst.msk [vmem:[#allocation8 + $0x30] sm:$0xf] %vm5223_vm12, %v5429_v6  ;;  %5449 = vst.msk [vmem:[#allocation8 + $0x1c] sm:$0xf] %vm5223_vm12, %v5427_v44 }
 0x493   : > { %v5542_v16 = vpop.permute.xlu0 %5541  ;;  %v5540_v25 = vpop.permute.xlu1 %5539  ;;  %v5638_v13 = vld [vmem:[#allocation8 + $0x8c] sm:$0xff] }
 0x494   : > { %v9304_v35 = vld [vmem:[#allocation8 + $0x7c] ss:$20 sps:$4 sm:$0xff]   ;;  %5563 = vst.msk [vmem:[#allocation8 + $0x34] sm:$0xf] %vm5223_vm12, %v5542_v16  ;;  %5562 = vst.msk [vmem:[#allocation8 + $0x20] sm:$0xf] %vm5223_vm12, %v5540_v25  ;;  %v7927_v47 = vcombine.low %v5635_v60, %v5638_v13 }
 0x495   : > { %6104 = vmatprep.mubr.bf16.mxu1 %v9304_v35 }
 0x496   : > { %6105 = vmatmul.mubr.bf16.gmra.mxu1 %v7927_v47 }
 0x497   : > { %v5433_v46 = vpop.permute.xlu0 %5432  ;;  %v5431_v18 = vpop.permute.xlu1 %5430  ;;  %v9310_v34 = vld [vmem:[#allocation8 + $0x8] ss:$20 sps:$4 sm:$0xff]  }
 0x498   : > { %5452 = vst.msk [vmem:[#allocation8 + $0x58] sm:$0xf] %vm5223_vm12, %v5433_v46  ;;  %5451 = vst.msk [vmem:[#allocation8 + $0x44] sm:$0xf] %vm5223_vm12, %v5431_v18 }
 0x49b   : > { %v5546_v62 = vpop.permute.xlu0 %5545  ;;  %v5544_v41 = vpop.permute.xlu1 %5543  ;;  %v9312_v61 = vld [vmem:[#allocation8 + $0xc] ss:$20 sps:$4 sm:$0xff]  }
 0x49c   : > { %5565 = vst.msk [vmem:[#allocation8 + $0x5c] sm:$0xf] %vm5223_vm12, %v5546_v62  ;;  %5564 = vst.msk [vmem:[#allocation8 + $0x48] sm:$0xf] %vm5223_vm12, %v5544_v41  ;;  %6145 = vmatprep.mubr.bf16.mxu1 %v9312_v61  ;;  %v9329_v41 = vld [vmem:[%s11664_s7 + $0x38] sm:$0xff]   ;;  %v9330_v61 = vld [vmem:[%s11664_s7 + $0x70] sm:$0xff]  }
 0x49e   : > { %6146 = vmatmul.mubr.bf16.vlgmr.msra.gmra.mxu1 %v9310_v34 }
 0x49f   : > { %v5437_v19 = vpop.permute.xlu0 %5436  ;;  %v5435_v49 = vpop.permute.xlu1 %5434  ;;  %v9313_v3 = vld [vmem:[#allocation8 + $0x30] ss:$20 sps:$4 sm:$0xff]   ;;  %8800 = vmatpush3.bf16.msra.mxu1 %v9329_v41 }
 0x4a0   : > { %5454 = vst.msk [vmem:[#allocation8 + $0x80] sm:$0xf] %vm5223_vm12, %v5437_v19  ;;  %5453 = vst.msk [vmem:[#allocation8 + $0x6c] sm:$0xf] %vm5223_vm12, %v5435_v49  ;;  %8801 = vmatprep.subr.bf16.mxu1 %v9330_v61 }
 0x4a3   : > { %v5550_v43 = vpop.permute.xlu0 %5549  ;;  %v5548_v9 = vpop.permute.xlu1 %5547  ;;  %v9315_v8 = vld [vmem:[#allocation8 + $0x34] ss:$20 sps:$4 sm:$0xff]  }
 0x4a4   : > { %5567 = vst.msk [vmem:[#allocation8 + $0x84] sm:$0xf] %vm5223_vm12, %v5550_v43  ;;  %5566 = vst.msk [vmem:[#allocation8 + $0x70] sm:$0xf] %vm5223_vm12, %v5548_v9  ;;  %6153 = vmatprep.mubr.bf16.mxu1 %v9315_v8 }
 0x4a6   : > { %6154 = vmatmul.mubr.bf16.gmra.mxu1 %v9313_v3 }
 0x4a7   : > { %v5439_v26 = vpop.permute.xlu1 %5438  ;;  %v9316_v10 = vld [vmem:[#allocation8 + $0x58] ss:$20 sps:$4 sm:$0xff]  }
 0x4a8   : > { %5455 = vst.msk [vmem:[#allocation8 + $0x94] sm:$0xf] %vm5223_vm12, %v5439_v26 }
 0x4ab   : > { %v5552_v0 = vpop.permute.xlu1 %5551  ;;  %v9318_v2 = vld [vmem:[#allocation8 + $0x5c] ss:$20 sps:$4 sm:$0xff]  }
 0x4ac   : > { %5568 = vst.msk [vmem:[#allocation8 + $0x98] sm:$0xf] %vm5223_vm12, %v5552_v0  ;;  %6161 = vmatprep.mubr.bf16.mxu1 %v9318_v2 }
 0x4ae   : > { %6162 = vmatmul.mubr.bf16.gmra.mxu1 %v9316_v10  ;;  %v9331_v10 = vld [vmem:[%s11664_s7 + $0x30] sm:$0xff]  }
 0x4af   : > { %v9319_v36 = vld [vmem:[#allocation8 + $0x80] ss:$20 sps:$4 sm:$0xff]   ;;  %8802 = vmatpush3.bf16.msra.mxu1 %v9331_v10 }
 0x4b3   : > { %v9321_v37 = vld [vmem:[#allocation8 + $0x84] ss:$20 sps:$4 sm:$0xff]  }
 0x4b4   : > { %6169 = vmatprep.mubr.bf16.mxu1 %v9321_v37 }
 0x4b6   : > { %6170 = vmatmul.mubr.bf16.gmra.mxu1 %v9319_v36  ;;  %v9332_v36 = vld [vmem:[%s11664_s7 + $0x68] sm:$0xff]  }
 0x4b7   : > { %8803 = vmatprep.subr.bf16.mxu1 %v9332_v36  ;;  %v9340_v36 = vld [vmem:[%s11664_s7 + $0x48] sm:$0xff]  }
 0x4b8   : > { %8804 = vmatpush3.bf16.msra.mxu1 %v9333_v50 }
 0x4b9   : > { %8805 = vmatprep.subr.bf16.mxu1 %v9334_v51 }
 0x4cb   : > { %v9030_v48 = vpop.f32.mrf.mxu0 }
 0x4cd   : > { %v6212_v29 = vpop.f32.mrf.mxu0 }
 0x4cf   : > { %v9031_v13 = vpop.f32.mrf.mxu0 }
 0x4d1   : > { %v6215_v43 = vpop.f32.mrf.mxu0 }
 0x4d8   : > { %v6361_v40 = vpop.permute.xlu0 %6360 }
 0x4d9   : > { %6384 = vst.msk [vmem:[#allocation9] sm:$0xf] %vm2459_vm6, %v6361_v40 }
 0x4dc   : > { %v6425_v25 = vpop.permute.xlu0 %6424 }
 0x4dd   : > { %6448 = vst.msk [vmem:[#allocation9] sm:$0xf] %vm2716_vm7, %v6425_v25 }
 0x4e2   : > { %v11387_v63 = vpop.f32.mrf.mxu0 }
 0x526   : > { %v8727_v30 = vpop.f32.mrf.mxu1 }
 0x528   : > { %v8728_v58 = vpop.f32.mrf.mxu1 }
 0x529   : > { %v8729_v24 = vadd.f32 %v8728_v58, %v8727_v30 }
 0x52a   : > { %v8730_v11 = vpop.f32.mrf.mxu1 }
 0x52b   : > { %v6083_v33 = vadd.f32 %v8729_v24, %v11367_v23 }
 0x52c   : > { %v8731_v22 = vpop.f32.mrf.mxu1 }
 0x52d   : > { %v8732_v6 = vadd.f32 %v8731_v22, %v8730_v11  ;;  %v6228_v11 = vpop.f32.mrf.mxu0 }
 0x52f   : > { %v6086_v47 = vadd.f32 %v8732_v6, %v11367_v23 }
 0x536   : > { %v8733_v4 = vpop.f32.mrf.mxu1 }
 0x538   : > { %v8734_v5 = vpop.f32.mrf.mxu1 }
 0x539   : > { %v8735_v46 = vadd.f32 %v8734_v5, %v8733_v4 }
 0x53a   : > { %v8736_v53 = vpop.f32.mrf.mxu1 }
 0x53b   : > { %v6091_v3 = vadd.f32 %v8735_v46, %v11367_v23  ;;  %v9337_v46 = vld [vmem:[%s11664_s7 + $0x18] sm:$0xff]  }
 0x53c   : > { %v8737_v7 = vpop.f32.mrf.mxu1 }
 0x53d   : > { %v8738_v8 = vadd.f32 %v8737_v7, %v8736_v53 }
 0x53f   : > { %v6094_v14 = vadd.f32 %v8738_v8, %v11367_v23 }
 0x547   : > { %v8739_v45 = vpop.f32.mrf.mxu1 }
 0x549   : > { %v8740_v57 = vpop.f32.mrf.mxu1 }
 0x54a   : > { %v8741_v15 = vadd.f32 %v8740_v57, %v8739_v45 }
 0x54b   : > { %v11354_v56 = vpop.f32.mrf.mxu1 }
 0x54c   : > { %v6099_v22 = vadd.f32 %v8741_v15, %v11367_v23 }
 0x54d   : > { %v8743_v17 = vpop.f32.mrf.mxu1 }
 0x54e   : > { %v8744_v4 = vadd.f32 %v8743_v17, %v11354_v56  ;;  %v9336_v56 = vld [vmem:[%s11664_s7 + $0x58] sm:$0xff]  }
 0x556   : > { %v11356_v31 = vpop.f32.mrf.mxu1 }
 0x558   : > { %v11358_v54 = vpop.f32.mrf.mxu1 }
 0x55a   : > { %v11360_v1 = vpop.f32.mrf.mxu1 }
 0x55c   : > { %v11362_v38 = vpop.f32.mrf.mxu1 }
 0x55e   : > { %v8767_v42 = vpop.f32.mrf.mxu1 }
 0x560   : > { %v8768_v39 = vpop.f32.mrf.mxu1 }
 0x561   : > { %v8769_v44 = vadd.f32 %v8768_v39, %v8767_v42  ;;  %v6102_v39 = vadd.f32 %v8744_v4, %v11367_v23 }
 0x562   : > { %v8770_v60 = vpop.f32.mrf.mxu1 }
 0x563   : > { %v6148_v16 = vadd.f32 %v8769_v44, %v6083_v33  ;;  %v8747_v33 = vadd.f32 %v11358_v54, %v11356_v31 }
 0x564   : > { %v8771_v35 = vpop.f32.mrf.mxu1 }
 0x565   : > { %v6213_v18 = vadd.f32 %v6212_v29, %v6148_v16  ;;  %v8772_v62 = vadd.f32 %v8771_v35, %v8770_v60  ;;  %v11409_v29 = vpop.f32.mrf.mxu0  ;;  %v6107_v61 = vadd.f32 %v8747_v33, %v11367_v23 }
 0x566   : > { %v8773_v34 = vpop.f32.mrf.mxu1 }
 0x567   : > { %v6243_v19 = vmax.f32 %v6213_v18, 0.0  ;;  %v6151_v49 = vadd.f32 %v8772_v62, %v6086_v47  ;;  %v9338_v18 = vld [vmem:[%s11664_s7 + $0x50] sm:$0xff]  }
 0x568   : > { %v8774_v9 = vpop.f32.mrf.mxu1 }
 0x569   : > { %6272 = vst.msk [vmem:[#allocation4 + $0x11] sm:$0xff] %vm1730_vm3, %v6243_v19  ;;  %v6216_v26 = vadd.f32 %v6215_v43, %v6151_v49  ;;  %v8775_v0 = vadd.f32 %v8774_v9, %v8773_v34  ;;  %v6231_v34 = vpop.f32.mrf.mxu0  ;;  %v8750_v19 = vadd.f32 %v11362_v38, %v11360_v1  ;;  %v9339_v1 = vld [vmem:[%s11664_s7 + $0x10] sm:$0xff]  }
 0x56a   : > { %v8776_v2 = vpop.f32.mrf.mxu1 }
 0x56b   : > { %v6244_v37 = vmax.f32 %v6216_v26, 0.0  ;;  %v6156_v27 = vadd.f32 %v8775_v0, %v6091_v3  ;;  %v6110_v15 = vadd.f32 %v8750_v19, %v11367_v23  ;;  %v9341_v23 = vld [vmem:[%s11664_s7 + $0x8] sm:$0xff]  }
 0x56c   : > { %v8777_v21 = vpop.f32.mrf.mxu1 }
 0x56d   : > { %6273 = vst.msk [vmem:[#allocation4 + $0x21] sm:$0xff] %vm1730_vm3, %v6244_v37  ;;  %v6221_v55 = vadd.f32 %v9030_v48, %v6156_v27  ;;  %v8778_v20 = vadd.f32 %v8777_v21, %v8776_v2  ;;  %v9335_v48 = vld [vmem:[%s11664_s7 + $0x20] sm:$0xff]  }
 0x56e   : > { %v8779_v52 = vpop.f32.mrf.mxu1  ;;  %8806 = vmatpush3.bf16.msra.mxu1 %v9335_v48 }
 0x56f   : > { %v6245_v30 = vmax.f32 %v6221_v55, 0.0  ;;  %v6159_v58 = vadd.f32 %v8778_v20, %v6094_v14  ;;  %8807 = vmatprep.subr.bf16.mxu1 %v9336_v56 }
 0x570   : > { %v8780_v5 = vpop.f32.mrf.mxu1  ;;  %v6568_v53 = vld [vmem:[#allocation4 + $0x12] sm:$0xff] }
 0x571   : > { %v6329_v7 = vld [vmem:[#allocation4 + $0x11] sm:$0xff]  ;;  %6274 = vst.msk [vmem:[#allocation4 + $0x31] sm:$0xff] %vm1730_vm3, %v6245_v30  ;;  %v6224_v32 = vadd.f32 %v9031_v13, %v6159_v58  ;;  %v8781_v59 = vadd.f32 %v8780_v5, %v8779_v52  ;;  %v8484_v57 = vpack.c.bf16 %v6568_v53, %v6568_v53 }
 0x572   : > { %v6456_v45 = vld [vmem:[#allocation4 + $0x10] sm:$0xff]  ;;  %v8453_v12 = vpack.c.bf16 %v6329_v7, %v6329_v7  ;;  %v8782_v24 = vpop.f32.mrf.mxu1  ;;  %8808 = vmatpush3.bf16.msra.mxu1 %v9337_v46 }
 0x573   : > { %v8468_v42 = vpack.c.bf16 %v6456_v45, %v6456_v45  ;;  %v6246_v17 = vmax.f32 %v6224_v32, 0.0  ;;  %v6164_v40 = vadd.f32 %v8781_v59, %v6099_v22  ;;  %6600 = vrot.lane.b32.xlu0 %v8484_v57, %s9426_s28  ;;  %8809 = vmatprep.subr.bf16.mxu1 %v9338_v18 }
 0x574   : > { %6362 = vrot.lane.b32.xlu1 %v8453_v12, %s9426_s28  ;;  %6560 = vst.msk [vmem:[#allocation9 + $0x4] sm:$0xf] %vm2202_vm5, %v8453_v12  ;;  %v8783_v6 = vpop.f32.mrf.mxu1  ;;  %v6633_v44 = vld [vmem:[#allocation4 + $0x20] sm:$0xff] }
 0x575   : > { %v6569_v60 = vld [vmem:[#allocation4 + $0x22] sm:$0xff]  ;;  %6321 = vst.msk [vmem:[#allocation9 + $0xc] sm:$0xf] %vm2202_vm5, %v8468_v42  ;;  %v6229_v25 = vadd.f32 %v6228_v11, %v6164_v40  ;;  %v8784_v13 = vadd.f32 %v8783_v6, %v8782_v24  ;;  %v8492_v35 = vpack.c.bf16 %v6633_v44, %v6633_v44  ;;  %v9342_v11 = vld [vmem:[%s11664_s7 + $0x40] sm:$0xff]  }
 0x576   : > { %v6697_v16 = vld [vmem:[#allocation4 + $0x21] sm:$0xff]  ;;  %6275 = vst.msk [vmem:[#allocation4 + $0x41] sm:$0xff] %vm1730_vm3, %v6246_v17  ;;  %v11416_v47 = vpack.c.bf16 %v6569_v60, %v6569_v60  ;;  %v8785_v31 = vpop.f32.mrf.mxu1  ;;  %8810 = vmatpush3.bf16.msra.mxu1 %v9339_v1 }
 0x577   : > { %v11421_v54 = vpack.c.bf16 %v6697_v16, %v6697_v16  ;;  %v6247_v62 = vmax.f32 %v6229_v25, 0.0  ;;  %v6167_v41 = vadd.f32 %v8784_v13, %v6102_v39  ;;  %6488 = vrot.lane.b32.xlu0 %v8468_v42, %s9428_s22  ;;  %6322 = vst.msk [vmem:[#allocation9 + $0x18] sm:$0xf] %vm2202_vm5, %v8492_v35  ;;  %8811 = vmatprep.subr.bf16.mxu1 %v9340_v36 }
 0x578   : > { %6426 = vrot.lane.b32.xlu1 %v8484_v57, %s9427_s29  ;;  %6801 = vst.msk [vmem:[#allocation9 + $0x8] sm:$0xf] %vm2202_vm5, %v11416_v47  ;;  %v8786_v49 = vpop.f32.mrf.mxu1  ;;  %v6634_v43 = vld [vmem:[#allocation4 + $0x30] sm:$0xff] }
 0x579   : > { %v6762_v9 = vld [vmem:[#allocation4 + $0x32] sm:$0xff]  ;;  %6561 = vst.msk [vmem:[#allocation9 + $0x10] sm:$0xf] %vm2202_vm5, %v11421_v54  ;;  %v6232_v8 = vadd.f32 %v6231_v34, %v6167_v41  ;;  %v8787_v26 = vadd.f32 %v8786_v49, %v8785_v31  ;;  %v11437_v0 = vpack.c.bf16 %v6634_v43, %v6634_v43 }
 0x57a   : > { %v6698_v3 = vld [vmem:[#allocation4 + $0x31] sm:$0xff]  ;;  %6276 = vst.msk [vmem:[#allocation4 + $0x51] sm:$0xff] %vm1730_vm3, %v6247_v62  ;;  %v11439_v10 = vpack.c.bf16 %v6762_v9, %v6762_v9  ;;  %v8788_v38 = vpop.f32.mrf.mxu1  ;;  %8812 = vmatpush3.bf16.msra.mxu1 %v9341_v23 }
 0x57b   : > { %v11444_v2 = vpack.c.bf16 %v6698_v3, %v6698_v3  ;;  %v6248_v37 = vmax.f32 %v6232_v8, 0.0  ;;  %v6172_v27 = vadd.f32 %v8787_v26, %v6107_v61  ;;  %6665 = vrot.lane.b32.xlu0 %v8492_v35, %s9427_s29  ;;  %6323 = vst.msk [vmem:[#allocation9 + $0x24] sm:$0xf] %vm2202_vm5, %v11437_v0  ;;  %8813 = vmatprep.subr.bf16.mxu1 %v9342_v11  ;;  %v9343_v57 = vld [vmem:[%s11664_s7] sm:$0xff]   ;;  %v11559_v61 = vpop.permute.xlu1 %6679 }
 0x57c   : > { %6602 = vrot.lane.b32.xlu1 %v11416_v47, %s9426_s28  ;;  %6802 = vst.msk [vmem:[#allocation9 + $0x14] sm:$0xf] %vm2202_vm5, %v11439_v10  ;;  %v8789_v14 = vpop.f32.mrf.mxu1  ;;  %v6704_v41 = vld [vmem:[#allocation4 + $0x91] sm:$0xff] }
 0x57d   : > { %v6763_v21 = vld [vmem:[#allocation4 + $0x42] sm:$0xff]  ;;  %6562 = vst.msk [vmem:[#allocation9 + $0x1c] sm:$0xf] %vm2202_vm5, %v11444_v2  ;;  %v6237_v52 = vadd.f32 %v11387_v63, %v6172_v27  ;;  %v8790_v51 = vadd.f32 %v8789_v14, %v8788_v38  ;;  %v8507_v34 = vpack.c.bf16 %v6704_v41, %v6704_v41 }
 0x57e   : > { %v6635_v55 = vld [vmem:[#allocation4 + $0x40] sm:$0xff]  ;;  %v11459_v50 = vpack.c.bf16 %v6763_v21, %v6763_v21  ;;  %6277 = vst.msk [vmem:[#allocation4 + $0x61] sm:$0xff] %vm1730_vm3, %v6248_v37  ;;  %8814 = vmatpush3.bf16.msra.mxu1 %v9343_v57 }
 0x57f   : > { %v6699_v20 = vld [vmem:[#allocation4 + $0x41] sm:$0xff]  ;;  %v11463_v30 = vpack.c.bf16 %v6635_v55, %v6635_v55  ;;  %v6249_v22 = vmax.f32 %v6237_v52, 0.0  ;;  %v6175_v4 = vadd.f32 %v8790_v51, %v6110_v15  ;;  %6729 = vrot.lane.b32.xlu0 %v11421_v54, %s9428_s22 }
 0x580   : > { %v11468_v58 = vpack.c.bf16 %v6699_v20, %v6699_v20  ;;  %6803 = vst.msk [vmem:[#allocation9 + $0x20] sm:$0xf] %vm2202_vm5, %v11459_v50  ;;  %6490 = vrot.lane.b32.xlu1 %v8492_v35, %s9428_s22 }
 0x581   : > { %6324 = vst.msk [vmem:[#allocation9 + $0x30] sm:$0xf] %vm2202_vm5, %v11463_v30  ;;  %v6764_v63 = vld [vmem:[#allocation4 + $0x52] sm:$0xff]  ;;  %v6240_v45 = vadd.f32 %v11409_v29, %v6175_v4 }
 0x582   : > { %v6636_v5 = vld [vmem:[#allocation4 + $0x50] sm:$0xff]  ;;  %6563 = vst.msk [vmem:[#allocation9 + $0x28] sm:$0xf] %vm2202_vm5, %v11468_v58  ;;  %v11482_v7 = vpack.c.bf16 %v6764_v63, %v6764_v63 }
 0x583   : > { %v6700_v53 = vld [vmem:[#allocation4 + $0x51] sm:$0xff]  ;;  %6278 = vst.msk [vmem:[#allocation4 + $0x71] sm:$0xff] %vm1730_vm3, %v6249_v22  ;;  %v8495_v32 = vpack.c.bf16 %v6636_v5, %v6636_v5  ;;  %v6250_v48 = vmax.f32 %v6240_v45, 0.0  ;;  %6364 = vrot.lane.b32.xlu0 %v11421_v54, %s9426_s28 }
 0x584   : > { %v8503_v59 = vpack.c.bf16 %v6700_v53, %v6700_v53  ;;  %v9323_v12 = vld [vmem:[#allocation9 + $0x8] ss:$12 sps:$4 sm:$0xff]   ;;  %6804 = vst.msk [vmem:[#allocation9 + $0x2c] sm:$0xf] %vm2202_vm5, %v11482_v7  ;;  %6667 = vrot.lane.b32.xlu1 %v11437_v0, %s9427_s29 }
 0x585   : > { %6325 = vst.msk [vmem:[#allocation9 + $0x3c] sm:$0xf] %vm2202_vm5, %v8495_v32  ;;  %9040 = vmatprep.mubr.msk.bf16.mxu0 %vm1730_vm3, %v9323_v12  ;;  %v6765_v24 = vld [vmem:[#allocation4 + $0x62] sm:$0xff] }
 0x586   : > { %6564 = vst.msk [vmem:[#allocation9 + $0x34] sm:$0xf] %vm2202_vm5, %v8503_v59  ;;  %v6637_v42 = vld [vmem:[#allocation4 + $0x60] sm:$0xff]  ;;  %v8512_v17 = vpack.c.bf16 %v6765_v24, %v6765_v24 }
 0x587   : > { %v6701_v56 = vld [vmem:[#allocation4 + $0x61] sm:$0xff]  ;;  %6279 = vst.msk [vmem:[#allocation4 + $0x81] sm:$0xff] %vm1730_vm3, %v6250_v48  ;;  %v8496_v40 = vpack.c.bf16 %v6637_v42, %v6637_v42  ;;  %6428 = vrot.lane.b32.xlu0 %v11416_v47, %s9427_s29 }
 0x588   : > { %v8504_v29 = vpack.c.bf16 %v6701_v56, %v6701_v56  ;;  %6731 = vrot.lane.b32.xlu1 %v11444_v2, %s9428_s22  ;;  %6805 = vst.msk [vmem:[#allocation9 + $0x38] sm:$0xf] %vm2202_vm5, %v8512_v17 }
 0x589   : > { %6326 = vst.msk [vmem:[#allocation9 + $0x48] sm:$0xf] %vm2202_vm5, %v8496_v40 }
 0x58a   : > { %6565 = vst.msk [vmem:[#allocation9 + $0x40] sm:$0xf] %vm2202_vm5, %v8504_v29  ;;  %v6766_v39 = vld [vmem:[#allocation4 + $0x72] sm:$0xff] }
 0x58b   : > { %v6638_v33 = vld [vmem:[#allocation4 + $0x70] sm:$0xff]  ;;  %v8513_v44 = vpack.c.bf16 %v6766_v39, %v6766_v39  ;;  %v9325_v25 = vld [vmem:[#allocation9 + $0x20] ss:$12 sps:$4 sm:$0xff]   ;;  %6604 = vrot.lane.b32.xlu0 %v11439_v10, %s9426_s28 }
 0x58c   : > { %v6702_v6 = vld [vmem:[#allocation4 + $0x71] sm:$0xff]  ;;  %v8497_v60 = vpack.c.bf16 %v6638_v33, %v6638_v33  ;;  %6366 = vrot.lane.b32.xlu1 %v11444_v2, %s9426_s28  ;;  %9041 = vmatmul.mubr.msk.bf16.vlgmr.msra.gmra.mxu0 %vm1730_vm3, %v9325_v25 }
 0x58d   : > { %v8505_v16 = vpack.c.bf16 %v6702_v6, %v6702_v6  ;;  %6806 = vst.msk [vmem:[#allocation9 + $0x44] sm:$0xf] %vm2202_vm5, %v8513_v44 }
 0x58e   : > { %6327 = vst.msk [vmem:[#allocation9 + $0x54] sm:$0xf] %vm2202_vm5, %v8497_v60  ;;  %v6767_v13 = vld [vmem:[#allocation4 + $0x82] sm:$0xff] }
 0x58f   : > { %6566 = vst.msk [vmem:[#allocation9 + $0x4c] sm:$0xf] %vm2202_vm5, %v8505_v16  ;;  %v6703_v35 = vld [vmem:[#allocation4 + $0x81] sm:$0xff]  ;;  %v8514_v47 = vpack.c.bf16 %v6767_v13, %v6767_v13  ;;  %6492 = vrot.lane.b32.xlu0 %v11437_v0, %s9428_s22 }
 0x590   : > { %v8506_v46 = vpack.c.bf16 %v6703_v35, %v6703_v35  ;;  %6430 = vrot.lane.b32.xlu1 %v11439_v10, %s9427_s29  ;;  %v6639_v18 = vld [vmem:[#allocation4 + $0x80] sm:$0xff] }
 0x591   : > { %6807 = vst.msk [vmem:[#allocation9 + $0x50] sm:$0xf] %vm2202_vm5, %v8514_v47  ;;  %v8498_v62 = vpack.c.bf16 %v6639_v18, %v6639_v18 }
 0x592   : > { %6567 = vst.msk [vmem:[#allocation9 + $0x58] sm:$0xf] %vm2202_vm5, %v8506_v46 }
 0x593   : > { %6669 = vrot.lane.b32.xlu0 %v11463_v30, %s9427_s29 }
 0x594   : > { %v9326_v31 = vld [vmem:[#allocation9 + $0x38] ss:$12 sps:$4 sm:$0xff]   ;;  %6606 = vrot.lane.b32.xlu1 %v11459_v50, %s9426_s28 }
 0x595   : > { %9044 = vmatprep.mubr.msk.bf16.mxu0 %vm1730_vm3, %v9326_v31 }
 0x597   : > { %6733 = vrot.lane.b32.xlu0 %v11468_v58, %s9428_s22 }
 0x598   : > { %v9327_v54 = vld [vmem:[#allocation9 + $0x50] ss:$12 sps:$4 sm:$0xff]   ;;  %6494 = vrot.lane.b32.xlu1 %v11463_v30, %s9428_s22 }
 0x599   : > { %9045 = vmatmul.mubr.msk.bf16.gmra.mxu0 %vm1730_vm3, %v9327_v54 }
 0x59a   : > { %9064 = vmatprep.mubr.msk.f32.mxu0 %vm9429_vm13, %v9425_v28 }
 0x59b   : > { %6368 = vrot.lane.b32.xlu0 %v11468_v58, %s9426_s28 }
 0x59c   : > { %6671 = vrot.lane.b32.xlu1 %v8495_v32, %s9427_s29 }
 0x59f   : > { %6432 = vrot.lane.b32.xlu0 %v11459_v50, %s9427_s29 }
 0x5a0   : > { %6735 = vrot.lane.b32.xlu1 %v8503_v59, %s9428_s22 }
 0x5a3   : > { %6608 = vrot.lane.b32.xlu0 %v11482_v7, %s9426_s28 }
 0x5a4   : > { %6370 = vrot.lane.b32.xlu1 %v8503_v59, %s9426_s28 }
 0x5a7   : > { %6496 = vrot.lane.b32.xlu0 %v8495_v32, %s9428_s22 }
 0x5a8   : > { %6434 = vrot.lane.b32.xlu1 %v11482_v7, %s9427_s29 }
 0x5ab   : > { %6673 = vrot.lane.b32.xlu0 %v8496_v40, %s9427_s29 }
 0x5ac   : > { %6610 = vrot.lane.b32.xlu1 %v8512_v17, %s9426_s28 }
 0x5af   : > { %6737 = vrot.lane.b32.xlu0 %v8504_v29, %s9428_s22 }
 0x5b0   : > { %6498 = vrot.lane.b32.xlu1 %v8496_v40, %s9428_s22 }
 0x5b3   : > { %6372 = vrot.lane.b32.xlu0 %v8504_v29, %s9426_s28 }
 0x5b4   : > { %6675 = vrot.lane.b32.xlu1 %v8497_v60, %s9427_s29 }
 0x5b7   : > { %6436 = vrot.lane.b32.xlu0 %v8512_v17, %s9427_s29 }
 0x5b8   : > { %6739 = vrot.lane.b32.xlu1 %v8505_v16, %s9428_s22 }
 0x5bb   : > { %6612 = vrot.lane.b32.xlu0 %v8513_v44, %s9426_s28 }
 0x5bc   : > { %6374 = vrot.lane.b32.xlu1 %v8505_v16, %s9426_s28 }
 0x5bf   : > { %6500 = vrot.lane.b32.xlu0 %v8497_v60, %s9428_s22 }
 0x5c0   : > { %6438 = vrot.lane.b32.xlu1 %v8513_v44, %s9427_s29 }
 0x5c3   : > { %6677 = vrot.lane.b32.xlu0 %v8498_v62, %s9427_s29 }
 0x5c4   : > { %6614 = vrot.lane.b32.xlu1 %v8514_v47, %s9426_s28  ;;  %s9366_s28 = sshll.u32 %s9431_s27, 4  ;;  %s9367_s28 = int_to_ptr.vmem [resolvable:$false] %s9366_s28 }
 0x5c5   : > { %s9368_s13 = scalar_lea.vmem %s9367_s28, 32 }
 0x5c7   : > { %6741 = vrot.lane.b32.xlu0 %v8506_v46, %s9428_s22 }
 0x5c8   : > { %6502 = vrot.lane.b32.xlu1 %v8498_v62, %s9428_s22 }
 0x5cc   : > { %6743 = vrot.lane.b32.xlu1 %v8507_v34, %s9428_s22  ;;  %s323_s22 = sand.u32 1, %s9414_s10  }
 0x5cd   : > { %s324_s21 = scalar_lea.vmem [#allocation10], %s323_s22  ;;  %s7265_s14 = scalar_lea.sflag [#allocation11], %s323_s22 }
 0x5ce   : > { %s7277_s23 = sshll.u32 %s324_s21, 4  ;;  %s7278_s23 = int_to_ptr.vmem [resolvable:$true] %s7277_s23 }
 0x5cf   : > { %s9362_s16 = scalar_lea.vmem %s7278_s23, 16  ;;  %p9369_p0 = scmp.lt.s32.totalorder %s7278_s23, %s9367_s28 }
 0x5d0   : > { %p9363_p11 = scmp.ne.s32.totalorder %s7278_s23, %s9362_s16  ;;  %p9370_p1 = scmp.lt.s32.totalorder %s9368_s13, %s9362_s16 }
 0x5d2   : > { %p9364_p12 = pnand %p9363_p11, %p9520_p5  ;;  %p9371_p2 = por %p9370_p1, %p9369_p0 }
 0x5d4   : > { %p9365_p13 = pneg %p9364_p12 }
 0x5d6   : > { %p9372_p3 = pnand %p9371_p2, %p9365_p13 }
 0x5e5   : > { %v6601_v19 = vpop.permute.xlu0 %6600 }
 0x5e6   : > { %v6363_v49 = vpop.permute.xlu1 %6362  ;;  %6624 = vst.msk [vmem:[#allocation9 + $0x4] sm:$0xf] %vm2459_vm6, %v6601_v19 }
 0x5e7   : > { %6385 = vst.msk [vmem:[#allocation9 + $0xc] sm:$0xf] %vm2459_vm6, %v6363_v49 }
 0x5e9   : > { %v6489_v43 = vpop.permute.xlu0 %6488 }
 0x5ea   : > { %v6427_v9 = vpop.permute.xlu1 %6426  ;;  %6512 = vst.msk [vmem:[#allocation9] sm:$0xf] %vm2973_vm8, %v6489_v43 }
 0x5eb   : > { %6449 = vst.msk [vmem:[#allocation9 + $0xc] sm:$0xf] %vm2716_vm7, %v6427_v9 }
 0x5ed   : > { %v6666_v3 = vpop.permute.xlu0 %6665 }
 0x5ee   : > { %v6603_v8 = vpop.permute.xlu1 %6602  ;;  %6689 = vst.msk [vmem:[#allocation9 + $0x4] sm:$0xf] %vm2716_vm7, %v6666_v3 }
 0x5ef   : > { %6625 = vst.msk [vmem:[#allocation9 + $0x10] sm:$0xf] %vm2459_vm6, %v6603_v8 }
 0x5f1   : > { %v6730_v26 = vpop.permute.xlu0 %6729 }
 0x5f2   : > { %v6491_v0 = vpop.permute.xlu1 %6490  ;;  %6753 = vst.msk [vmem:[#allocation9 + $0x4] sm:$0xf] %vm2973_vm8, %v6730_v26 }
 0x5f3   : > { %6513 = vst.msk [vmem:[#allocation9 + $0xc] sm:$0xf] %vm2973_vm8, %v6491_v0 }
 0x5f5   : > { %v6365_v10 = vpop.permute.xlu0 %6364 }
 0x5f6   : > { %v6668_v1 = vpop.permute.xlu1 %6667  ;;  %6386 = vst.msk [vmem:[#allocation9 + $0x18] sm:$0xf] %vm2459_vm6, %v6365_v10 }
 0x5f7   : > { %6690 = vst.msk [vmem:[#allocation9 + $0x10] sm:$0xf] %vm2716_vm7, %v6668_v1 }
 0x5f9   : > { %v6429_v38 = vpop.permute.xlu0 %6428 }
 0x5fa   : > { %v6732_v2 = vpop.permute.xlu1 %6731  ;;  %6450 = vst.msk [vmem:[#allocation9 + $0x18] sm:$0xf] %vm2716_vm7, %v6429_v38  ;;  %v9344_v21 = vld [vmem:[#allocation9] ss:$12 sps:$4 sm:$0xff]  }
 0x5fb   : > { %6754 = vst.msk [vmem:[#allocation9 + $0x10] sm:$0xf] %vm2973_vm8, %v6732_v2 }
 0x5fd   : > { %v6605_v36 = vpop.permute.xlu0 %6604 }
 0x5fe   : > { %v6367_v37 = vpop.permute.xlu1 %6366  ;;  %6626 = vst.msk [vmem:[#allocation9 + $0x1c] sm:$0xf] %vm2459_vm6, %v6605_v36 }
 0x5ff   : > { %6387 = vst.msk [vmem:[#allocation9 + $0x24] sm:$0xf] %vm2459_vm6, %v6367_v37 }
 0x601   : > { %v6493_v27 = vpop.permute.xlu0 %6492 }
 0x602   : > { %v6431_v15 = vpop.permute.xlu1 %6430  ;;  %v9346_v14 = vld [vmem:[#allocation9 + $0x4] ss:$12 sps:$4 sm:$0xff]   ;;  %6514 = vst.msk [vmem:[#allocation9 + $0x18] sm:$0xf] %vm2973_vm8, %v6493_v27 }
 0x603   : > { %6451 = vst.msk [vmem:[#allocation9 + $0x24] sm:$0xf] %vm2716_vm7, %v6431_v15  ;;  %7080 = vmatprep.mubr.bf16.mxu1 %v9346_v14  ;;  %v8044_v15 = vld [vmem:[%s11665_s8] ss:$0 sm:$0xff] }
 0x604   : > { %7081 = vmatmul.mubr.bf16.vlgmr.msra.gmra.mxu1 %v9344_v21 }
 0x605   : > { %v6670_v55 = vpop.permute.xlu0 %6669 }
 0x606   : > { %v6607_v20 = vpop.permute.xlu1 %6606  ;;  %6691 = vst.msk [vmem:[#allocation9 + $0x1c] sm:$0xf] %vm2716_vm7, %v6670_v55 }
 0x607   : > { %6627 = vst.msk [vmem:[#allocation9 + $0x28] sm:$0xf] %vm2459_vm6, %v6607_v20 }
 0x609   : > { %v6734_v50 = vpop.permute.xlu0 %6733 }
 0x60a   : > { %v6495_v52 = vpop.permute.xlu1 %6494  ;;  %6755 = vst.msk [vmem:[#allocation9 + $0x1c] sm:$0xf] %vm2973_vm8, %v6734_v50 }
 0x60b   : > { %6515 = vst.msk [vmem:[#allocation9 + $0x24] sm:$0xf] %vm2973_vm8, %v6495_v52 }
 0x60d   : > { %v6369_v51 = vpop.permute.xlu0 %6368 }
 0x60e   : > { %v6672_v30 = vpop.permute.xlu1 %6671  ;;  %6388 = vst.msk [vmem:[#allocation9 + $0x30] sm:$0xf] %vm2459_vm6, %v6369_v51 }
 0x60f   : > { %6692 = vst.msk [vmem:[#allocation9 + $0x28] sm:$0xf] %vm2716_vm7, %v6672_v30 }
 0x611   : > { %v6433_v23 = vpop.permute.xlu0 %6432 }
 0x612   : > { %v6736_v58 = vpop.permute.xlu1 %6735  ;;  %6452 = vst.msk [vmem:[#allocation9 + $0x30] sm:$0xf] %vm2716_vm7, %v6433_v23  ;;  %v9347_v5 = vld [vmem:[#allocation9 + $0x18] ss:$12 sps:$4 sm:$0xff]  }
 0x613   : > { %6756 = vst.msk [vmem:[#allocation9 + $0x28] sm:$0xf] %vm2973_vm8, %v6736_v58 }
 0x615   : > { %v6609_v11 = vpop.permute.xlu0 %6608 }
 0x616   : > { %v6371_v22 = vpop.permute.xlu1 %6370  ;;  %6628 = vst.msk [vmem:[#allocation9 + $0x34] sm:$0xf] %vm2459_vm6, %v6609_v11 }
 0x617   : > { %6389 = vst.msk [vmem:[#allocation9 + $0x3c] sm:$0xf] %vm2459_vm6, %v6371_v22 }
 0x619   : > { %v6497_v4 = vpop.permute.xlu0 %6496 }
 0x61a   : > { %v6435_v63 = vpop.permute.xlu1 %6434  ;;  %v9349_v53 = vld [vmem:[#allocation9 + $0x1c] ss:$12 sps:$4 sm:$0xff]   ;;  %6516 = vst.msk [vmem:[#allocation9 + $0x30] sm:$0xf] %vm2973_vm8, %v6497_v4 }
 0x61b   : > { %6453 = vst.msk [vmem:[#allocation9 + $0x3c] sm:$0xf] %vm2716_vm7, %v6435_v63  ;;  %7088 = vmatprep.mubr.bf16.mxu1 %v9349_v53 }
 0x61c   : > { %7089 = vmatmul.mubr.bf16.gmra.mxu1 %v9347_v5 }
 0x61d   : > { %v6674_v7 = vpop.permute.xlu0 %6673 }
 0x61e   : > { %v6611_v45 = vpop.permute.xlu1 %6610  ;;  %6693 = vst.msk [vmem:[#allocation9 + $0x34] sm:$0xf] %vm2716_vm7, %v6674_v7 }
 0x61f   : > { %6629 = vst.msk [vmem:[#allocation9 + $0x40] sm:$0xf] %vm2459_vm6, %v6611_v45 }
 0x621   : > { %v6738_v32 = vpop.permute.xlu0 %6737 }
 0x622   : > { %v6499_v59 = vpop.permute.xlu1 %6498  ;;  %6757 = vst.msk [vmem:[#allocation9 + $0x34] sm:$0xf] %vm2973_vm8, %v6738_v32 }
 0x623   : > { %6517 = vst.msk [vmem:[#allocation9 + $0x3c] sm:$0xf] %vm2973_vm8, %v6499_v59 }
 0x625   : > { %v6373_v57 = vpop.permute.xlu0 %6372 }
 0x626   : > { %v6676_v12 = vpop.permute.xlu1 %6675  ;;  %6390 = vst.msk [vmem:[#allocation9 + $0x48] sm:$0xf] %vm2459_vm6, %v6373_v57 }
 0x627   : > { %6694 = vst.msk [vmem:[#allocation9 + $0x40] sm:$0xf] %vm2716_vm7, %v6676_v12 }
 0x629   : > { %v6437_v48 = vpop.permute.xlu0 %6436 }
 0x62a   : > { %v6740_v24 = vpop.permute.xlu1 %6739  ;;  %6454 = vst.msk [vmem:[#allocation9 + $0x48] sm:$0xf] %vm2716_vm7, %v6437_v48  ;;  %v9350_v29 = vld [vmem:[#allocation9 + $0x30] ss:$12 sps:$4 sm:$0xff]  }
 0x62b   : > { %6758 = vst.msk [vmem:[#allocation9 + $0x40] sm:$0xf] %vm2973_vm8, %v6740_v24  ;;  %v9430_v24 = vmov 0.015625  }
 0x62d   : > { %v6613_v42 = vpop.permute.xlu0 %6612 }
 0x62e   : > { %v6375_v56 = vpop.permute.xlu1 %6374  ;;  %6630 = vst.msk [vmem:[#allocation9 + $0x4c] sm:$0xf] %vm2459_vm6, %v6613_v42 }
 0x62f   : > { %6391 = vst.msk [vmem:[#allocation9 + $0x54] sm:$0xf] %vm2459_vm6, %v6375_v56 }
 0x631   : > { %v6501_v17 = vpop.permute.xlu0 %6500 }
 0x632   : > { %v6439_v40 = vpop.permute.xlu1 %6438  ;;  %v9352_v39 = vld [vmem:[#allocation9 + $0x34] ss:$12 sps:$4 sm:$0xff]   ;;  %6518 = vst.msk [vmem:[#allocation9 + $0x48] sm:$0xf] %vm2973_vm8, %v6501_v17 }
 0x633   : > { %6455 = vst.msk [vmem:[#allocation9 + $0x54] sm:$0xf] %vm2716_vm7, %v6439_v40  ;;  %7096 = vmatprep.mubr.bf16.mxu1 %v9352_v39 }
 0x634   : > { %7097 = vmatmul.mubr.bf16.gmra.mxu1 %v9350_v29 }
 0x635   : > { %v6678_v33 = vpop.permute.xlu0 %6677 }
 0x636   : > { %v6615_v6 = vpop.permute.xlu1 %6614  ;;  %6695 = vst.msk [vmem:[#allocation9 + $0x4c] sm:$0xf] %vm2716_vm7, %v6678_v33 }
 0x637   : > { %6631 = vst.msk [vmem:[#allocation9 + $0x58] sm:$0xf] %vm2459_vm6, %v6615_v6 }
 0x638   : > { %6696 = vst.msk [vmem:[#allocation9 + $0x58] sm:$0xf] %vm2716_vm7, %v11559_v61 }
 0x639   : > { %v6742_v44 = vpop.permute.xlu0 %6741 }
 0x63a   : > { %v6503_v60 = vpop.permute.xlu1 %6502  ;;  %6759 = vst.msk [vmem:[#allocation9 + $0x4c] sm:$0xf] %vm2973_vm8, %v6742_v44 }
 0x63b   : > { %6519 = vst.msk [vmem:[#allocation9 + $0x54] sm:$0xf] %vm2973_vm8, %v6503_v60 }
 0x63e   : > { %v6744_v16 = vpop.permute.xlu1 %6743 }
 0x63f   : > { %6760 = vst.msk [vmem:[#allocation9 + $0x58] sm:$0xf] %vm2973_vm8, %v6744_v16 }
 0x642   : > { %v9353_v25 = vld [vmem:[#allocation9 + $0x48] ss:$12 sps:$4 sm:$0xff]  }
 0x646   : > { %v9355_v13 = vld [vmem:[#allocation9 + $0x4c] ss:$12 sps:$4 sm:$0xff]  }
 0x647   : > { %7104 = vmatprep.mubr.bf16.mxu1 %v9355_v13 }
 0x648   : > { %7105 = vmatmul.mubr.bf16.gmra.mxu1 %v9353_v25 }
 0x64c   : > { %v9042_v61 = vpop.f32.mrf.mxu0 }
 0x64e   : > { %v7147_v49 = vpop.f32.mrf.mxu0 }
 0x650   : > { %v9043_v9 = vpop.f32.mrf.mxu0 }
 0x652   : > { %v7150_v8 = vpop.f32.mrf.mxu0 }
 0x659   : > { %v9046_v0 = vpop.f32.mrf.mxu0 }
 0x65b   : > { %v7163_v2 = vpop.f32.mrf.mxu0 }
 0x65d   : > { %v9047_v20 = vpop.f32.mrf.mxu0 }
 0x65f   : > { %v7166_v11 = vpop.f32.mrf.mxu0 }
 0x6c4   : > { %v8815_v35 = vpop.f32.mrf.mxu1 }
 0x6c6   : > { %v8816_v47 = vpop.f32.mrf.mxu1 }
 0x6c7   : > { %v8817_v5 = vadd.f32 %v8816_v47, %v8815_v35 }
 0x6c8   : > { %v8818_v46 = vpop.f32.mrf.mxu1 }
 0x6c9   : > { %v7083_v59 = vadd.f32 %v8817_v5, %v8044_v15 }
 0x6ca   : > { %v8819_v31 = vpop.f32.mrf.mxu1 }
 0x6cb   : > { %v8820_v22 = vadd.f32 %v8819_v31, %v8818_v46  ;;  %v7148_v48 = vadd.f32 %v7147_v49, %v7083_v59 }
 0x6cd   : > { %v7086_v45 = vadd.f32 %v8820_v22, %v8044_v15 }
 0x6cf   : > { %v7151_v12 = vadd.f32 %v7150_v8, %v7086_v45 }
 0x6dc   : > { %v8821_v54 = vpop.f32.mrf.mxu1 }
 0x6de   : > { %v8822_v18 = vpop.f32.mrf.mxu1 }
 0x6df   : > { %v8823_v30 = vadd.f32 %v8822_v18, %v8821_v54 }
 0x6e0   : > { %v8824_v62 = vpop.f32.mrf.mxu1 }
 0x6e1   : > { %v7091_v53 = vadd.f32 %v8823_v30, %v8044_v15 }
 0x6e2   : > { %v8825_v41 = vpop.f32.mrf.mxu1 }
 0x6e3   : > { %v8826_v50 = vadd.f32 %v8825_v41, %v8824_v62  ;;  %v7156_v57 = vadd.f32 %v9042_v61, %v7091_v53 }
 0x6e5   : > { %v7094_v4 = vadd.f32 %v8826_v50, %v8044_v15 }
 0x6e7   : > { %v7159_v32 = vadd.f32 %v9043_v9, %v7094_v4 }
 0x6f4   : > { %v8827_v34 = vpop.f32.mrf.mxu1 }
 0x6f6   : > { %v8828_v19 = vpop.f32.mrf.mxu1 }
 0x6f7   : > { %v8829_v21 = vadd.f32 %v8828_v19, %v8827_v34 }
 0x6f8   : > { %v8830_v43 = vpop.f32.mrf.mxu1 }
 0x6f9   : > { %v7099_v23 = vadd.f32 %v8829_v21, %v8044_v15 }
 0x6fa   : > { %v8831_v3 = vpop.f32.mrf.mxu1 }
 0x6fb   : > { %v8832_v37 = vadd.f32 %v8831_v3, %v8830_v43  ;;  %v7164_v7 = vadd.f32 %v7163_v2, %v7099_v23 }
 0x6fd   : > { %v7102_v52 = vadd.f32 %v8832_v37, %v8044_v15 }
 0x6ff   : > { %v7167_v63 = vadd.f32 %v7166_v11, %v7102_v52 }
 0x708   : > { %v8833_v26 = vpop.f32.mrf.mxu1 }
 0x70a   : > { %v8834_v10 = vpop.f32.mrf.mxu1 }
 0x70b   : > { %v8835_v38 = vadd.f32 %v8834_v10, %v8833_v26 }
 0x70c   : > { %v8836_v1 = vpop.f32.mrf.mxu1 }
 0x70d   : > { %v7107_v14 = vadd.f32 %v8835_v38, %v8044_v15 }
 0x70e   : > { %v8837_v36 = vpop.f32.mrf.mxu1 }
 0x70f   : > { %v8838_v27 = vadd.f32 %v8837_v36, %v8836_v1  ;;  %v7172_v58 = vadd.f32 %v9046_v0, %v7107_v14 }
 0x711   : > { %v7110_v55 = vadd.f32 %v8838_v27, %v8044_v15 }
 0x713   : > { %v7175_v51 = vadd.f32 %v9047_v20, %v7110_v55 }
 0x715   : > { %9049 = vmatpush3.msra.mxu0 %v7175_v51 }
 0x716   : > { %9050 = vmatprep.subr.mxu0 %v9425_v28 }
 0x717   : > { %9051 = vmatpush3.msra.mxu0 %v7172_v58 }
 0x718   : > { %9052 = vmatprep.subr.mxu0 %v9425_v28 }
 0x719   : > { %9053 = vmatpush3.msra.mxu0 %v7167_v63 }
 0x71a   : > { %9054 = vmatprep.subr.mxu0 %v9425_v28 }
 0x71b   : > { %9055 = vmatpush3.msra.mxu0 %v7164_v7 }
 0x71c   : > { %9056 = vmatprep.subr.mxu0 %v9425_v28 }
 0x71d   : > { %9057 = vmatpush3.msra.mxu0 %v7159_v32 }
 0x71e   : > { %9058 = vmatprep.subr.mxu0 %v9425_v28 }
 0x71f   : > { %9059 = vmatpush3.msra.mxu0 %v7156_v57 }
 0x720   : > { %9060 = vmatprep.subr.mxu0 %v9425_v28 }
 0x721   : > { %9061 = vmatpush3.msra.mxu0 %v7151_v12 }
 0x722   : > { %9062 = vmatprep.subr.mxu0 %v9425_v28 }
 0x723   : > { %9063 = vmatpush3.msra.mxu0 %v7148_v48 }
 0x724   : > { %9065 = vmatmul.mubr.msk.f32.vlgmr.msra.gmra.mxu0 %vm5032_vm9, %v9430_v24 }
 0x7e4   : > { %v7247_v42 = vpop.f32.mrf.mxu0 }
 0x7e5   : > { %v7252_v56 = vsel %vm7251_vm14, %v7247_v42, -inf }
 0x7e6   : > { %7253 = vmax.xlane.f32.xlu0 %v7252_v56  ;;  %v9066_v17 = vpop.f32.mrf.mxu0 }
 0x86f   : > { %v7254_v40 = vpop.xlane.xlu0 %7253 }
 0x870   : > { %v7255_v29 = vsub.f32 %v7247_v42, %v7254_v40 }
 0x872   : > { %v7256_v39 = vmul.f32 1.442695, %v7255_v29 }
 0x874   : > { %9356 = vpow2.f32 %v7256_v39 }
 0x881   : > { %v9357_v33 = vpop.eup %9356 }
 0x882   : > { %v7258_v6 = vsel %vm7251_vm14, %v9357_v33, 0.0 }
 0x883   : > { %7259 = vadd.xlane.f32.xlu1 %v7258_v6 }
 0x90c   : > { %v7260_v28 = vpop.xlane.xlu1 %7259 }
 0x90d   : > { %9358 = vrcp.f32 %v7260_v28 }
 0x91a   : > { %v9359_v44 = vpop.eup %9358 }
 0x91b   : > { %v7262_v60 = vmul.f32 %v9359_v44, %v9357_v33 }
 0x91d   : > { %7263 = vst.msk [vmem:[%s324_s21] sm:$0x1] %vm7251_vm14, %v7262_v60 }
 0x91e   : > { %9375 = shalt.err (!%p9372_p3)
}
 0x91f   : > { %s9376_s29 = scalar_lea.hbm %s7275_s26, 16  ;;  %s9380_s21 = scalar_lea.hbm %s11666_s9, 32 }
 0x920   : > { %p9377_p4 = scmp.ne.s32.totalorder %s7275_s26, %s9376_s29  ;;  %p9381_p9 = scmp.lt.s32.totalorder %s7275_s26, %s11666_s9 }
 0x921   : > { %p9382_p10 = scmp.lt.s32.totalorder %s9380_s21, %s9376_s29 }
 0x922   : > { %p9378_p7 = pnand %p9377_p4, %p9520_p5 }
 0x923   : > { %p9383_p11 = por %p9382_p10, %p9381_p9 }
 0x924   : > { %p9379_p8 = pneg %p9378_p7 }
 0x926   : > { %p9384_p12 = pnand %p9383_p11, %p9379_p8 }
 0x928   : > { %9387 = shalt.err (!%p9384_p12)
}
 0x929   : > { %9067 = dma.vmem_to_hbm [thread:$0]  (%p9520_p5), %s7278_s23, 16, %s7275_s26, %s7265_s14  }
 0x92a PF: > { %p9073_p13 = scmp.ge.s32.totalorder %s9422_s12, 2  ;;  %s7289_s16 = sand.u32 1, %s9410_s30  }
 0x92b   : > { %s7290_s27 = scalar_lea.sflag [#allocation11], %s7289_s16 }
 0x92c   : > { %p9070_p0 = pnand %p9073_p13, %p9524_p6 }
 0x92e   : > { %p9071_p1 = pneg %p9070_p0 }
 0x930   : > { %9405 = dma.done.wait (%p9071_p1), %s7290_s27, 16  }
 0x931   : > { %9407 = vsyncadd (%p9071_p1), %s7290_s27, 4294967280  ;;  %p19_p2 = scmp.ge.s32.totalorder %s9507_s15, 4   ;;  %s11669_s30 = smov %s9414_s10 }
 0x932   : > { %s11670_s10 = smov %s9418_s11  ;;  %s11671_s11 = smov %s9518_s18 }
 0x933   : > { %s11672_s12 = smov %s9507_s15  ;;  %21 = sbr.rel (!%p19_p2) target bundleno = 3 (0x3), region = 175 }
 0x938   :  { %7294 = vsyncpa [#allocation11], 1 }
 0x939   :  { %7296 = vsyncpa [#allocation11 + $0x1], 1 }

</bundles_post_ra>
